<compile_context>
chip_gen: v7x
topology: tpu7x:2x2x1
jax: 0.10.0
libtpu: 0.0.40
codegen_flags: <defaults>
</compile_context>

<pallas_src>
import functools

import jax
import jax.numpy as jnp
from jax.experimental import pallas as pl
from jax.experimental.pallas import tpu as pltpu

D_HIDDEN = 768            # hidden size hard-coded by the module (768 + 768 -> output_dim)
D_OUT = 768               # output_dim default
TOKEN_SLICE_RATIO = 0.5
SUBLANE_BF16 = 16         # bf16 packs 16 rows per (16, 128) vreg tile
LANE = 128


def _round_up(x, m):
    return ((x + m - 1) // m) * m


def _pad_axis(x, size, axis):
    pad = size - x.shape[axis]
    if pad <= 0:
        return x
    widths = [(0, 0)] * x.ndim
    widths[axis] = (0, pad)
    return jnp.pad(x, widths)


def llava_kernel(imgm_ref, wv_ref, bv_ref,
                 temb_ref, wl_ref, bl_ref,
                 wo_img_ref, wo_txt_ref, bo_ref, out_ref):
    # ---- vision path ----------------------------------------------------------
    # mean over patch tokens was hoisted into the wrapper via linearity
    # (mean(X) @ W == mean(X @ W)): one (B, k_pad) @ (k_pad, D) MXU matmul, f32 acc.
    img_feat = (jnp.dot(imgm_ref[...], wv_ref[...],
                        preferred_element_type=jnp.float32)
                + bv_ref[...])                                     # (B, D) f32

    # ---- language path --------------------------------------------------------
    # Stand-in LM is per-token and only token 0 survives [:, 0, :], so only the
    # token-0 embeddings are fed in: (B, D) @ (D, D), f32 acc.
    txt_feat = (jnp.dot(temb_ref[...], wl_ref[...],
                        preferred_element_type=jnp.float32)
                + bl_ref[...])                                     # (B, D) f32

    # ---- concat + output Linear as split-wo: two K=768 MXU matmuls, f32 acc ----
    out = jnp.dot(img_feat.astype(wo_img_ref.dtype), wo_img_ref[...],
                  preferred_element_type=jnp.float32)
    out = out + jnp.dot(txt_feat.astype(wo_txt_ref.dtype), wo_txt_ref[...],
                        preferred_element_type=jnp.float32)
    out_ref[...] = out + bo_ref[...]                               # (B, D_OUT) f32


def extract_patches(image, patch=8):
    # image: (B, C, H, W) NCHW -> (B, n_patches, C*patch*patch)
    B, C, H, W = image.shape
    gh, gw = H // patch, W // patch
    x = image.reshape(B, C, gh, patch, gw, patch)
    x = jnp.transpose(x, (0, 2, 4, 1, 3, 5))                       # (B, gh, gw, C, p, p)
    return x.reshape(B, gh * gw, C * patch * patch)


def prepare_params(params, patch_dim):
    """One-time preprocessing: pad + cast weights to MXU-ready bf16, split wo.

    Done OUTSIDE the per-call hot path so the kernel's weight DMA reads exactly the
    ~2 MiB of bf16 it needs instead of round-tripping f32 through HBM every call.
    """
    k_pad = max(256, _round_up(patch_dim, LANE))                   # MXU-friendly K
    cd = jnp.bfloat16
    return {
        "k_pad": k_pad,
        "wv": _pad_axis(params["wv"], k_pad, axis=0).astype(cd),   # (k_pad, D)
        "wl": params["wl"].astype(cd),                             # (D, D)
        "wo_img": params["wo"][:D_HIDDEN].astype(cd),              # (D, D_OUT)
        "wo_txt": params["wo"][D_HIDDEN:].astype(cd),              # (D, D_OUT)
        "bv": params["bv"].astype(jnp.float32),                    # (1, D)
        "bl": params["bl"].astype(jnp.float32),                    # (1, D)
        "bo": params["bo"].astype(jnp.float32),                    # (1, D_OUT)
        "emb_table": params["emb_table"].astype(cd),               # (V, D)
    }


@functools.partial(jax.jit, static_argnames=("patch", "token_slice_ratio"))
def llava_forward(image, text, prepped, *, patch=8,
                  token_slice_ratio=TOKEN_SLICE_RATIO):
    B = image.shape[0]
    cd = jnp.bfloat16
    k_pad = prepped["wv"].shape[0]

    # --- vision glue: patch extraction + mean over tokens (linearity hoist) ----
    patches = extract_patches(image, patch)                        # (B, P, patch_dim)
    img_mean = jnp.mean(patches, axis=1)                           # (B, patch_dim) f32
    img_mean = _pad_axis(img_mean, k_pad, axis=1)                  # (B, k_pad)

    # --- text glue: only token 0 of the sliced text is consumed by [:, 0, :] ---
    # TODO(synk): optionally fuse this row gather into the kernel (SMEM token ids +
    # emb_table in pl.ANY with manual per-row DMA) to drop the separate XLA gather.
    num_tokens = text.shape[1]
    slice_size = max(1, int(num_tokens * token_slice_ratio))       # guard slice_size==0
    tok0 = text[:, :slice_size][:, 0]                              # (B,)
    temb0 = prepped["emb_table"][tok0]                             # (B, D) bf16

    # --- dtype-aware sublane padding: bf16 LHS rows padded to a multiple of 16 --
    b_pad = _round_up(B, SUBLANE_BF16)
    img_mean = _pad_axis(img_mean, b_pad, axis=0).astype(cd)       # (b_pad, k_pad) bf16
    temb0 = _pad_axis(temb0, b_pad, axis=0)                        # (b_pad, D) bf16

    wv, wl = prepped["wv"], prepped["wl"]
    wo_img, wo_txt = prepped["wo_img"], prepped["wo_txt"]
    bv, bl, bo = prepped["bv"], prepped["bl"], prepped["bo"]

    inputs = (img_mean, wv, bv, temb0, wl, bl, wo_img, wo_txt, bo)
    flops = 2 * b_pad * (k_pad * D_HIDDEN + D_HIDDEN * D_HIDDEN
                         + 2 * D_HIDDEN * D_OUT)
    bytes_accessed = sum(int(a.size) * a.dtype.itemsize for a in inputs)
    bytes_accessed += b_pad * D_OUT * 4                            # f32 output

    vmem_spec = pl.BlockSpec(memory_space=pltpu.MemorySpace.VMEM)  # full-array blocks
    out = pl.pallas_call(
        llava_kernel,
        out_shape=jax.ShapeDtypeStruct((b_pad, D_OUT), jnp.float32),
        in_specs=[vmem_spec] * len(inputs),
        out_specs=vmem_spec,
        cost_estimate=pl.CostEstimate(flops=flops, transcendentals=0,
                                      bytes_accessed=bytes_accessed),
    )(*inputs)
    return out[:B]


def reference_forward(image, text, params, *, patch=8,
                      token_slice_ratio=TOKEN_SLICE_RATIO):
    # Pure f32 JAX reference following the original module structure.
    patches = extract_patches(image, patch)
    img_tok = patches @ params["wv"] + params["bv"]                # (B, P, D)
    img_feat = img_tok.mean(axis=1)                                # (B, D)
    slice_size = max(1, int(text.shape[1] * token_slice_ratio))
    temb = params["emb_table"][text[:, :slice_size]]               # (B, S, D)
    txt_hid = temb @ params["wl"] + params["bl"]
    txt0 = txt_hid[:, 0, :]                                        # (B, D)
    combined = jnp.concatenate([img_feat, txt0], axis=1)           # (B, 2D)
    return combined @ params["wo"] + params["bo"]


def init_params(key, patch_dim, vocab=100):
    ks = jax.random.split(key, 5)
    scale = 0.02
    return {
        "wv": scale * jax.random.normal(ks[0], (patch_dim, D_HIDDEN), jnp.float32),
        "bv": jnp.zeros((1, D_HIDDEN), jnp.float32),
        "emb_table": scale * jax.random.normal(ks[1], (vocab, D_HIDDEN), jnp.float32),
        "wl": scale * jax.random.normal(ks[2], (D_HIDDEN, D_HIDDEN), jnp.float32),
        "bl": jnp.full((1, D_HIDDEN), 0.01, jnp.float32),
        "wo": scale * jax.random.normal(ks[3], (2 * D_HIDDEN, D_OUT), jnp.float32),
        "bo": jnp.full((1, D_OUT), 0.02, jnp.float32),
    }


if __name__ == "__main__":
    key = jax.random.PRNGKey(0)
    k_img, k_txt, k_par = jax.random.split(key, 3)

    B, C, H, W = 2, 3, 32, 32          # small image, 8x8 patches -> 16 tokens
    SEQ, VOCAB = 8, 100
    PATCH = 8
    patch_dim = C * PATCH * PATCH      # 192

    image = jax.random.normal(k_img, (B, C, H, W), jnp.float32)    # NCHW
    text = jax.random.randint(k_txt, (B, SEQ), 0, VOCAB, jnp.int32)
    params = init_params(k_par, patch_dim, vocab=VOCAB)

    # One-time weight preprocessing (outside the per-call hot path).
    prepped = prepare_params(params, patch_dim)
    prepped = jax.tree_util.tree_map(
        lambda x: jax.block_until_ready(x) if isinstance(x, jax.Array) else x, prepped)

    out = llava_forward(image, text, prepped, patch=PATCH)
    out = jax.block_until_ready(out)

    ref = reference_forward(image, text, params, patch=PATCH)
    assert out.shape == (B, D_OUT)
    # bf16 matmul inputs with f32 accumulation vs. pure-f32 reference -> loose-ish tol.
    assert jnp.allclose(out, ref, atol=5e-3, rtol=5e-2), (
        f"max abs err {jnp.max(jnp.abs(out - ref))}")

    print("KERNEL_OK")
</pallas_src>

<mosaic_0001>
module attributes {stable_mosaic.version = 11 : i64} {
  func.func @llava_kernel(%arg0: memref<16x256xbf16, #tpu.memory_space<vmem>>, %arg1: memref<256x768xbf16, #tpu.memory_space<vmem>>, %arg2: memref<1x768xf32, #tpu.memory_space<vmem>>, %arg3: memref<16x768xbf16, #tpu.memory_space<vmem>>, %arg4: memref<768x768xbf16, #tpu.memory_space<vmem>>, %arg5: memref<1x768xf32, #tpu.memory_space<vmem>>, %arg6: memref<768x768xbf16, #tpu.memory_space<vmem>>, %arg7: memref<768x768xbf16, #tpu.memory_space<vmem>>, %arg8: memref<1x768xf32, #tpu.memory_space<vmem>>, %arg9: memref<16x768xf32, #tpu.memory_space<vmem>>) attributes {dimension_semantics = [], scalar_prefetch = 0 : i64, scratch_operands = 0 : i64, tpu.core_type = #tpu.core_type<tc>} {
    %c0 = arith.constant 0 : index
    %c0_0 = arith.constant 0 : index
    %0 = vector.load %arg0[%c0, %c0_0] : memref<16x256xbf16, #tpu.memory_space<vmem>>, vector<16x256xbf16>
    %c0_1 = arith.constant 0 : index
    %c0_2 = arith.constant 0 : index
    %1 = vector.load %arg1[%c0_1, %c0_2] : memref<256x768xbf16, #tpu.memory_space<vmem>>, vector<256x768xbf16>
    %cst = arith.constant dense<0.000000e+00> : vector<16x768xf32>
    %2 = tpu.matmul %0, %1, %cst {dimension_numbers = #tpu.dot_dimension_numbers<[1], [0], [0], [1], [0, 0, 1, 1], [], []>} : vector<16x256xbf16>, vector<256x768xbf16>, vector<16x768xf32> -> vector<16x768xf32>
    %c0_3 = arith.constant 0 : index
    %c0_4 = arith.constant 0 : index
    %3 = vector.load %arg2[%c0_3, %c0_4] : memref<1x768xf32, #tpu.memory_space<vmem>>, vector<1x768xf32>
    %4 = vector.broadcast %3 : vector<1x768xf32> to vector<16x768xf32>
    %5 = arith.addf %2, %4 : vector<16x768xf32>
    %c0_5 = arith.constant 0 : index
    %c0_6 = arith.constant 0 : index
    %6 = vector.load %arg3[%c0_5, %c0_6] : memref<16x768xbf16, #tpu.memory_space<vmem>>, vector<16x768xbf16>
    %c0_7 = arith.constant 0 : index
    %c0_8 = arith.constant 0 : index
    %7 = vector.load %arg4[%c0_7, %c0_8] : memref<768x768xbf16, #tpu.memory_space<vmem>>, vector<768x768xbf16>
    %cst_9 = arith.constant dense<0.000000e+00> : vector<16x768xf32>
    %8 = tpu.matmul %6, %7, %cst_9 {dimension_numbers = #tpu.dot_dimension_numbers<[1], [0], [0], [1], [0, 0, 1, 1], [], []>} : vector<16x768xbf16>, vector<768x768xbf16>, vector<16x768xf32> -> vector<16x768xf32>
    %c0_10 = arith.constant 0 : index
    %c0_11 = arith.constant 0 : index
    %9 = vector.load %arg5[%c0_10, %c0_11] : memref<1x768xf32, #tpu.memory_space<vmem>>, vector<1x768xf32>
    %10 = vector.broadcast %9 : vector<1x768xf32> to vector<16x768xf32>
    %11 = arith.addf %8, %10 : vector<16x768xf32>
    %12 = arith.truncf %5 : vector<16x768xf32> to vector<16x768xbf16>
    %c0_12 = arith.constant 0 : index
    %c0_13 = arith.constant 0 : index
    %13 = vector.load %arg6[%c0_12, %c0_13] : memref<768x768xbf16, #tpu.memory_space<vmem>>, vector<768x768xbf16>
    %cst_14 = arith.constant dense<0.000000e+00> : vector<16x768xf32>
    %14 = tpu.matmul %12, %13, %cst_14 {dimension_numbers = #tpu.dot_dimension_numbers<[1], [0], [0], [1], [0, 0, 1, 1], [], []>} : vector<16x768xbf16>, vector<768x768xbf16>, vector<16x768xf32> -> vector<16x768xf32>
    %15 = arith.truncf %11 : vector<16x768xf32> to vector<16x768xbf16>
    %c0_15 = arith.constant 0 : index
    %c0_16 = arith.constant 0 : index
    %16 = vector.load %arg7[%c0_15, %c0_16] : memref<768x768xbf16, #tpu.memory_space<vmem>>, vector<768x768xbf16>
    %cst_17 = arith.constant dense<0.000000e+00> : vector<16x768xf32>
    %17 = tpu.matmul %15, %16, %cst_17 {dimension_numbers = #tpu.dot_dimension_numbers<[1], [0], [0], [1], [0, 0, 1, 1], [], []>} : vector<16x768xbf16>, vector<768x768xbf16>, vector<16x768xf32> -> vector<16x768xf32>
    %18 = arith.addf %14, %17 : vector<16x768xf32>
    %c0_18 = arith.constant 0 : index
    %c0_19 = arith.constant 0 : index
    %19 = vector.load %arg8[%c0_18, %c0_19] : memref<1x768xf32, #tpu.memory_space<vmem>>, vector<1x768xf32>
    %20 = vector.broadcast %19 : vector<1x768xf32> to vector<16x768xf32>
    %21 = arith.addf %18, %20 : vector<16x768xf32>
    %c0_20 = arith.constant 0 : index
    %c0_21 = arith.constant 0 : index
    %22 = vector.load %arg9[%c0_20, %c0_21] : memref<16x768xf32, #tpu.memory_space<vmem>>, vector<16x768xf32>
    tpu.vector_store %arg9[%c0_20, %c0_21], %21 {strides = array<i32>} : memref<16x768xf32, #tpu.memory_space<vmem>>, vector<16x768xf32>,
    return
  }
}

</mosaic_0001>

<bundles_post_ra>
// kernel: llava_forward.1
= control target key start
LH: loop header
LB: loop body
LE: loop exit
PB: predicated region body
PF: predicated region fallthrough
CT: control target
= control target key end

     0   :  { %14 = vsyncpa [#allocation3], 0  ;;  %s10680_s0 = inlined_call_operand.vmem [shape: bf16[16,256], index: 0, kind: input, shape index: {}]   ;;  %s10681_s1 = inlined_call_operand.vmem [shape: bf16[256,768], index: 1, kind: input, shape index: {}]   ;;  %s10682_s2 = inlined_call_operand.hbm [shape: f32[1,768], index: 2, kind: input, shape index: {}]   ;;  %s10683_s3 = inlined_call_operand.vmem [shape: bf16[16,768], index: 3, kind: input, shape index: {}]   ;;  %s10684_s4 = inlined_call_operand.hbm [shape: bf16[768,768], index: 4, kind: input, shape index: {}]   ;;  %s10685_s5 = inlined_call_operand.hbm [shape: f32[1,768], index: 5, kind: input, shape index: {}]   ;;  %s10686_s6 = inlined_call_operand.hbm [shape: bf16[768,768], index: 6, kind: input, shape index: {}]   ;;  %s10687_s7 = inlined_call_operand.hbm [shape: bf16[768,768], index: 7, kind: input, shape index: {}]   ;;  %s10688_s8 = inlined_call_operand.hbm [shape: f32[1,768], index: 8, kind: input, shape index: {}]   ;;  %s10689_s9 = inlined_call_operand.vmem [shape: f32[16,768], index: 9, kind: output, shape index: {}]  }
   0x1   :  { %15 = vsyncpa [#allocation5], 0 }
   0x2   :  { %16 = vsyncpa [#allocation8], 0 }
   0x3   :  { %17 = vsyncpa [#allocation11], 0  ;;  %s10019_s30 = smov [#allocation4]   ;;  %s9879_s13 = scalar_lea.hbm %s10684_s4, 36864 }
   0x4   :  { %s39_s10 = sshll.u32 %s10019_s30, 4  ;;  %p9880_p0 = scmp.ne.s32.totalorder %s10684_s4, %s9879_s13  ;;  %s40_s10 = int_to_ptr.vmem [resolvable:$true] %s39_s10 }
   0x5   :  { %p9883_p1 = scmp.lt.u32.totalorder %s9879_s13, %s10684_s4 }
   0x7   :  { %p9885_p2 = pnand %p9883_p1, %p9880_p0 }
   0x9   :  { %9888 = shalt.err (!%p9885_p2)
}
   0xa   :  { %s9889_s18 = scalar_lea.vmem %s40_s10, 36864  ;;  %p9894_p4 = scmp.lt.s32.totalorder %s40_s10, %s40_s10 }
   0xb   :  { %p9890_p3 = scmp.ne.s32.totalorder %s40_s10, %s9889_s18  ;;  %p9895_p5 = scmp.lt.s32.totalorder %s9889_s18, %s9889_s18 }
   0xd   :  { %p9896_p6 = por %p9895_p5, %p9894_p4 }
   0xf   :  { %p9897_p7 = pnand %p9896_p6, %p9890_p3 }
  0x11   :  { %9900 = shalt.err (!%p9897_p7)
}
  0x12   :  { %s10020_s19 = smov 384   ;;  %s10021_s20 = smov 24  }
  0x13   :  { %45 = dma.hbm_to_vmem [thread:$0]  %s10684_s4, 36864, %s40_s10, [#allocation5], %s10020_s19, %s10020_s19, %s10021_s20  }
  0x14   :  { %s10022_s23 = smov [#allocation7]   ;;  %s10023_s25 = smov [#allocation2]  }
  0x15   :  { %s61_s24 = sshll.u32 %s10022_s23, 4  ;;  %s28_s26 = sshll.u32 %s10023_s25, 4  ;;  %s62_s24 = int_to_ptr.vmem [resolvable:$true] %s61_s24  ;;  %s29_s26 = int_to_ptr.vmem [resolvable:$true] %s28_s26 }
  0x16   :  { %s9901_s29 = scalar_lea.hbm %s10686_s6, 36864 }
  0x17   :  { %p9902_p8 = scmp.ne.s32.totalorder %s10686_s6, %s9901_s29  ;;  %p9905_p9 = scmp.lt.u32.totalorder %s9901_s29, %s10686_s6 }
  0x19   :  { %p9907_p10 = pnand %p9905_p9, %p9902_p8 }
  0x1b   :  { %9910 = shalt.err (!%p9907_p10)
}
  0x1c   :  { %s9911_s4 = scalar_lea.vmem %s62_s24, 36864  ;;  %p9916_p12 = scmp.lt.s32.totalorder %s62_s24, %s62_s24 }
  0x1d   :  { %p9912_p11 = scmp.ne.s32.totalorder %s62_s24, %s9911_s4  ;;  %p9917_p13 = scmp.lt.s32.totalorder %s9911_s4, %s9911_s4 }
  0x1f   :  { %p9918_p0 = por %p9917_p13, %p9916_p12 }
  0x21   :  { %p9919_p1 = pnand %p9918_p0, %p9912_p11 }
  0x23   :  { %9922 = shalt.err (!%p9919_p1)
}
  0x24   :  { %67 = dma.hbm_to_vmem [thread:$0]  %s10686_s6, 36864, %s62_s24, [#allocation8], %s10020_s19, %s10020_s19, %s10021_s20  }
  0x25   :  { %s9923_s17 = scalar_lea.hbm %s10682_s2, 96 }
  0x26   :  { %p9924_p2 = scmp.ne.s32.totalorder %s10682_s2, %s9923_s17  ;;  %p9927_p3 = scmp.lt.u32.totalorder %s9923_s17, %s10682_s2 }
  0x28   :  { %p9929_p4 = pnand %p9927_p3, %p9924_p2 }
  0x2a   :  { %9932 = shalt.err (!%p9929_p4)
}
  0x2b   :  { %s9933_s25 = scalar_lea.vmem %s29_s26, 96  ;;  %p9938_p6 = scmp.lt.s32.totalorder %s29_s26, %s29_s26 }
  0x2c   :  { %p9934_p5 = scmp.ne.s32.totalorder %s29_s26, %s9933_s25  ;;  %p9939_p7 = scmp.lt.s32.totalorder %s9933_s25, %s9933_s25 }
  0x2e   :  { %p9940_p8 = por %p9939_p7, %p9938_p6 }
  0x30   :  { %p9941_p9 = pnand %p9940_p8, %p9934_p5 }
  0x32   :  { %9944 = shalt.err (!%p9941_p9)
}
  0x33   :  { %31 = dma.hbm_to_vmem [thread:$0]  %s10682_s2, 96, %s29_s26, [#allocation3]  }
  0x34   :  { %s10024_s27 = smov [#allocation6]   ;;  %s10025_s29 = smov [#allocation9]  }
  0x35   :  { %s52_s28 = sshll.u32 %s10024_s27, 4  ;;  %s73_s30 = sshll.u32 %s10025_s29, 4  ;;  %s53_s28 = int_to_ptr.vmem [resolvable:$true] %s52_s28  ;;  %s74_s30 = int_to_ptr.vmem [resolvable:$true] %s73_s30 }
  0x36   :  { %s9945_s13 = scalar_lea.hbm %s10685_s5, 96 }
  0x37   :  { %p9946_p10 = scmp.ne.s32.totalorder %s10685_s5, %s9945_s13  ;;  %p9949_p11 = scmp.lt.u32.totalorder %s9945_s13, %s10685_s5 }
  0x39   :  { %p9951_p12 = pnand %p9949_p11, %p9946_p10 }
  0x3b   :  { %9954 = shalt.err (!%p9951_p12)
}
  0x3c   :  { %s9955_s2 = scalar_lea.vmem %s53_s28, 96  ;;  %p9960_p0 = scmp.lt.s32.totalorder %s53_s28, %s53_s28 }
  0x3d   :  { %p9956_p13 = scmp.ne.s32.totalorder %s53_s28, %s9955_s2  ;;  %p9961_p1 = scmp.lt.s32.totalorder %s9955_s2, %s9955_s2 }
  0x3f   :  { %p9962_p2 = por %p9961_p1, %p9960_p0 }
  0x41   :  { %p9963_p3 = pnand %p9962_p2, %p9956_p13 }
  0x43   :  { %9966 = shalt.err (!%p9963_p3)
}
  0x44   :  { %55 = dma.hbm_to_vmem [thread:$0]  %s10685_s5, 96, %s53_s28, [#allocation5]  }
  0x45   :  { %s9967_s21 = scalar_lea.hbm %s10687_s7, 36864 }
  0x46   :  { %p9968_p4 = scmp.ne.s32.totalorder %s10687_s7, %s9967_s21  ;;  %p9971_p5 = scmp.lt.u32.totalorder %s9967_s21, %s10687_s7 }
  0x48   :  { %p9973_p6 = pnand %p9971_p5, %p9968_p4 }
  0x4a   :  { %9976 = shalt.err (!%p9973_p6)
}
  0x4b   :  { %s9977_s24 = scalar_lea.vmem %s74_s30, 36864  ;;  %p9982_p8 = scmp.lt.s32.totalorder %s74_s30, %s74_s30 }
  0x4c   :  { %p9978_p7 = scmp.ne.s32.totalorder %s74_s30, %s9977_s24  ;;  %p9983_p9 = scmp.lt.s32.totalorder %s9977_s24, %s9977_s24 }
  0x4e   :  { %p9984_p10 = por %p9983_p9, %p9982_p8 }
  0x50   :  { %p9985_p11 = pnand %p9984_p10, %p9978_p7 }
  0x52   :  { %9988 = shalt.err (!%p9985_p11)
}
  0x53   :  { %79 = dma.hbm_to_vmem [thread:$0]  %s10687_s7, 36864, %s74_s30, [#allocation8], %s10020_s19, %s10020_s19, %s10021_s20  }
  0x54   :  { %s10026_s28 = smov [#allocation10]   ;;  %s9989_s13 = scalar_lea.hbm %s10688_s8, 96 }
  0x55   :  { %s86_s29 = sshll.u32 %s10026_s28, 4  ;;  %p9990_p12 = scmp.ne.s32.totalorder %s10688_s8, %s9989_s13  ;;  %s87_s29 = int_to_ptr.vmem [resolvable:$true] %s86_s29 }
  0x56   :  { %p9993_p13 = scmp.lt.u32.totalorder %s9989_s13, %s10688_s8 }
  0x58   :  { %p9995_p0 = pnand %p9993_p13, %p9990_p12 }
  0x5a   :  { %9998 = shalt.err (!%p9995_p0)
}
  0x5b   :  { %s9999_s2 = scalar_lea.vmem %s87_s29, 96  ;;  %p10004_p2 = scmp.lt.s32.totalorder %s87_s29, %s87_s29 }
  0x5c   :  { %p10000_p1 = scmp.ne.s32.totalorder %s87_s29, %s9999_s2  ;;  %p10005_p3 = scmp.lt.s32.totalorder %s9999_s2, %s9999_s2 }
  0x5e   :  { %p10006_p4 = por %p10005_p3, %p10004_p2 }
  0x60   :  { %p10007_p5 = pnand %p10006_p4, %p10000_p1 }
  0x62   :  { %10010 = shalt.err (!%p10007_p5)
}
  0x63   :  { %89 = dma.hbm_to_vmem [thread:$0]  %s10688_s8, 96, %s87_s29, [#allocation11]  }
  0x64   :  { %10011 = dma.done.wait [#allocation3], 96  }
  0x65   :  { %10012 = vsyncadd [#allocation3], 4294967200 }
  0x66   :  { %10013 = dma.done.wait [#allocation5], 36960  }
  0x67   :  { %10014 = vsyncadd [#allocation5], 4294930336 }
  0x68   :  { %10015 = dma.done.wait [#allocation8], 73728  }
  0x69   :  { %10016 = vsyncadd [#allocation8], 4294893568 }
  0x6a   :  { %10017 = dma.done.wait [#allocation11], 96  }
  0x6b   :  { %10018 = vsyncadd [#allocation11], 4294967200  ;;  %v8418_v0 = vld [vmem:[%s10681_s1 + $0x4] ss:$24 sps:$4 sm:$0xff]   ;;  %v8420_v1 = vld [vmem:[%s10681_s1] ss:$24 sps:$4 sm:$0xff]  }
  0x6c   :  { %728 = vmatprep.subr.bf16.mxu1 %v8418_v0  ;;  %v8421_v2 = vld [vmem:[%s10681_s1 + $0x34] ss:$24 sps:$4 sm:$0xff]   ;;  %v8423_v3 = vld [vmem:[%s10681_s1 + $0x30] ss:$24 sps:$4 sm:$0xff]   ;;  %v8424_v4 = vld [vmem:[%s10681_s1 + $0x64] ss:$24 sps:$4 sm:$0xff]  }
  0x6d   :  { %729 = vmatpush1.bf16.msra.mxu1 %v8420_v1  ;;  %v8426_v5 = vld [vmem:[%s10681_s1 + $0x60] ss:$24 sps:$4 sm:$0xff]   ;;  %v8427_v6 = vld [vmem:[%s10681_s1 + $0x94] ss:$24 sps:$4 sm:$0xff]   ;;  %v8429_v7 = vld [vmem:[%s10681_s1 + $0x90] ss:$24 sps:$4 sm:$0xff]  }
  0x6e   :  { %730 = vmatprep.subr.bf16.mxu1 %v8421_v2  ;;  %v8430_v8 = vld [vmem:[%s10681_s1 + $0xc4] ss:$24 sps:$4 sm:$0xff]   ;;  %v8432_v9 = vld [vmem:[%s10681_s1 + $0xc0] ss:$24 sps:$4 sm:$0xff]   ;;  %v8433_v10 = vld [vmem:[%s10681_s1 + $0xf4] ss:$24 sps:$4 sm:$0xff]  }
  0x6f   :  { %v8435_v11 = vld [vmem:[%s10681_s1 + $0xf0] ss:$24 sps:$4 sm:$0xff]   ;;  %v8436_v12 = vld [vmem:[%s10681_s1 + $0x124] ss:$24 sps:$4 sm:$0xff]   ;;  %v8438_v14 = vld [vmem:[%s10681_s1 + $0x120] ss:$24 sps:$4 sm:$0xff]  }
  0x70   :  { %v10200_v13 = vld [vmem:[%s10680_s0 + $0x4] ss:$8 sps:$4 sm:$0xff]   ;;  %v8441_v16 = vld [vmem:[%s10681_s1 + $0x150] ss:$24 sps:$4 sm:$0xff]   ;;  %v8444_v18 = vld [vmem:[%s10681_s1 + $0x180] ss:$24 sps:$4 sm:$0xff]  }
  0x71   :  { %731 = vmatpush1.bf16.msra.mxu1 %v8423_v3  ;;  %v8439_v15 = vld [vmem:[%s10681_s1 + $0x154] ss:$24 sps:$4 sm:$0xff]   ;;  %760 = vmatprep.mubr.bf16.mxu1 %v10200_v13  ;;  %v8442_v17 = vld [vmem:[%s10681_s1 + $0x184] ss:$24 sps:$4 sm:$0xff]   ;;  %v8447_v20 = vld [vmem:[%s10681_s1 + $0x1b0] ss:$24 sps:$4 sm:$0xff]  }
  0x72   :  { %732 = vmatprep.subr.bf16.mxu1 %v8424_v4  ;;  %v8445_v19 = vld [vmem:[%s10681_s1 + $0x1b4] ss:$24 sps:$4 sm:$0xff]   ;;  %v8448_v21 = vld [vmem:[%s10681_s1 + $0x1e4] ss:$24 sps:$4 sm:$0xff]   ;;  %v8450_v22 = vld [vmem:[%s10681_s1 + $0x1e0] ss:$24 sps:$4 sm:$0xff]  }
  0x73   :  { %v8451_v23 = vld [vmem:[%s10681_s1 + $0x214] ss:$24 sps:$4 sm:$0xff]   ;;  %v8453_v24 = vld [vmem:[%s10681_s1 + $0x210] ss:$24 sps:$4 sm:$0xff]   ;;  %v8454_v25 = vld [vmem:[%s10681_s1 + $0x244] ss:$24 sps:$4 sm:$0xff]  }
  0x74   :  { %v8456_v26 = vld [vmem:[%s10681_s1 + $0x240] ss:$24 sps:$4 sm:$0xff]   ;;  %v8457_v27 = vld [vmem:[%s10681_s1 + $0x274] ss:$24 sps:$4 sm:$0xff]   ;;  %v8459_v28 = vld [vmem:[%s10681_s1 + $0x270] ss:$24 sps:$4 sm:$0xff]  }
  0x75   :  { %733 = vmatpush1.bf16.msra.mxu1 %v8426_v5  ;;  %v8460_v29 = vld [vmem:[%s10681_s1 + $0x2a4] ss:$24 sps:$4 sm:$0xff]   ;;  %v8462_v30 = vld [vmem:[%s10681_s1 + $0x2a0] ss:$24 sps:$4 sm:$0xff]   ;;  %v8463_v31 = vld [vmem:[%s10681_s1 + $0x2d4] ss:$24 sps:$4 sm:$0xff]  }
  0x76   :  { %734 = vmatprep.subr.bf16.mxu1 %v8427_v6  ;;  %v8465_v32 = vld [vmem:[%s10681_s1 + $0x2d0] ss:$24 sps:$4 sm:$0xff]   ;;  %v8471_v33 = vld [vmem:[%s10681_s1 + $0xc] ss:$24 sps:$4 sm:$0xff]   ;;  %v8474_v36 = vld [vmem:[%s10681_s1 + $0x3c] ss:$24 sps:$4 sm:$0xff]  }
  0x77   :  { %v10266_v34 = vld [vmem:[%s10680_s0] ss:$8 sps:$4 sm:$0xff]   ;;  %v8472_v39 = vld [vmem:[%s10681_s1 + $0x38] ss:$24 sps:$4 sm:$0xff]   ;;  %v8477_v40 = vld [vmem:[%s10681_s1 + $0x6c] ss:$24 sps:$4 sm:$0xff]  }
  0x78   :  { %v8469_v35 = vld [vmem:[%s10681_s1 + $0x8] ss:$24 sps:$4 sm:$0xff]   ;;  %v8480_v45 = vld [vmem:[%s10681_s1 + $0x9c] ss:$24 sps:$4 sm:$0xff]   ;;  %v8478_v48 = vld [vmem:[%s10681_s1 + $0x98] ss:$24 sps:$4 sm:$0xff]  }
  0x79   :  { %735 = vmatpush1.bf16.msra.mxu1 %v8429_v7  ;;  %v8565_v37 = vld [vmem:[#allocation4 + $0xc] ss:$24 sps:$4 sm:$0xff]   ;;  %v8567_v38 = vld [vmem:[#allocation4 + $0x8] ss:$24 sps:$4 sm:$0xff]   ;;  %v8571_v41 = vld [vmem:[#allocation4 + $0x3c] ss:$24 sps:$4 sm:$0xff]  }
  0x7a   :  { %736 = vmatprep.subr.bf16.mxu1 %v8430_v8  ;;  %2782 = vmatprep.subr.bf16.mxu0 %v8565_v37  ;;  %v8573_v42 = vld [vmem:[#allocation4 + $0x38] ss:$24 sps:$4 sm:$0xff]   ;;  %v8577_v44 = vld [vmem:[#allocation4 + $0x6c] ss:$24 sps:$4 sm:$0xff]   ;;  %v8579_v46 = vld [vmem:[#allocation4 + $0x68] ss:$24 sps:$4 sm:$0xff]  }
  0x7b   :  { %2783 = vmatpush1.bf16.msra.mxu0 %v8567_v38  ;;  %v8475_v43 = vld [vmem:[%s10681_s1 + $0x68] ss:$24 sps:$4 sm:$0xff]   ;;  %v8483_v49 = vld [vmem:[%s10681_s1 + $0xcc] ss:$24 sps:$4 sm:$0xff]   ;;  %v8486_v53 = vld [vmem:[%s10681_s1 + $0xfc] ss:$24 sps:$4 sm:$0xff]  }
  0x7c   :  { %2784 = vmatprep.subr.bf16.mxu0 %v8571_v41  ;;  %v8583_v47 = vld [vmem:[#allocation4 + $0x9c] ss:$24 sps:$4 sm:$0xff]   ;;  %v8585_v50 = vld [vmem:[#allocation4 + $0x98] ss:$24 sps:$4 sm:$0xff]   ;;  %v8589_v51 = vld [vmem:[#allocation4 + $0xcc] ss:$24 sps:$4 sm:$0xff]  }
  0x7d   :  { %737 = vmatpush1.bf16.msra.mxu1 %v8432_v9  ;;  %v8481_v52 = vld [vmem:[%s10681_s1 + $0xc8] ss:$24 sps:$4 sm:$0xff]   ;;  %v8484_v56 = vld [vmem:[%s10681_s1 + $0xf8] ss:$24 sps:$4 sm:$0xff]   ;;  %v8489_v57 = vld [vmem:[%s10681_s1 + $0x12c] ss:$24 sps:$4 sm:$0xff]  }
  0x7e   :  { %738 = vmatprep.subr.bf16.mxu1 %v8433_v10  ;;  %v8591_v54 = vld [vmem:[#allocation4 + $0xc8] ss:$24 sps:$4 sm:$0xff]   ;;  %v8595_v55 = vld [vmem:[#allocation4 + $0xfc] ss:$24 sps:$4 sm:$0xff]   ;;  %v8597_v58 = vld [vmem:[#allocation4 + $0xf8] ss:$24 sps:$4 sm:$0xff]  }
  0x7f   :  { %2785 = vmatpush1.bf16.msra.mxu0 %v8573_v42  ;;  %v8601_v59 = vld [vmem:[#allocation4 + $0x12c] ss:$24 sps:$4 sm:$0xff]   ;;  %v8603_v62 = vld [vmem:[#allocation4 + $0x128] ss:$24 sps:$4 sm:$0xff]   ;;  %v8607_v63 = vld [vmem:[#allocation4 + $0x15c] ss:$24 sps:$4 sm:$0xff]  }
  0x80   :  { %2786 = vmatprep.subr.bf16.mxu0 %v8577_v44  ;;  %v8487_v60 = vld [vmem:[%s10681_s1 + $0x128] ss:$24 sps:$4 sm:$0xff]   ;;  %v8492_v61 = vld [vmem:[%s10681_s1 + $0x15c] ss:$24 sps:$4 sm:$0xff]   ;;  %v8490_v0 = vld [vmem:[%s10681_s1 + $0x158] ss:$24 sps:$4 sm:$0xff]  }
  0x81   :  { %739 = vmatpush1.bf16.msra.mxu1 %v8435_v11  ;;  %v8495_v1 = vld [vmem:[%s10681_s1 + $0x18c] ss:$24 sps:$4 sm:$0xff]   ;;  %v8609_v2 = vld [vmem:[#allocation4 + $0x158] ss:$24 sps:$4 sm:$0xff]  }
  0x82   :  { %740 = vmatprep.subr.bf16.mxu1 %v8436_v12  ;;  %v8613_v3 = vld [vmem:[#allocation4 + $0x18c] ss:$24 sps:$4 sm:$0xff]   ;;  %v8615_v6 = vld [vmem:[#allocation4 + $0x188] ss:$24 sps:$4 sm:$0xff]   ;;  %v8619_v7 = vld [vmem:[#allocation4 + $0x1bc] ss:$24 sps:$4 sm:$0xff]  }
  0x83   :  { %2787 = vmatpush1.bf16.msra.mxu0 %v8579_v46  ;;  %v8493_v4 = vld [vmem:[%s10681_s1 + $0x188] ss:$24 sps:$4 sm:$0xff]   ;;  %v8498_v5 = vld [vmem:[%s10681_s1 + $0x1bc] ss:$24 sps:$4 sm:$0xff]   ;;  %v8496_v8 = vld [vmem:[%s10681_s1 + $0x1b8] ss:$24 sps:$4 sm:$0xff]  }
  0x84   :  { %2788 = vmatprep.subr.bf16.mxu0 %v8583_v47  ;;  %v8501_v9 = vld [vmem:[%s10681_s1 + $0x1ec] ss:$24 sps:$4 sm:$0xff]   ;;  %v8621_v10 = vld [vmem:[#allocation4 + $0x1b8] ss:$24 sps:$4 sm:$0xff]  }
  0x85   :  { %741 = vmatpush1.bf16.msra.mxu1 %v8438_v14  ;;  %v8625_v11 = vld [vmem:[#allocation4 + $0x1ec] ss:$24 sps:$4 sm:$0xff]   ;;  %v10369_v37 = vld [vmem:[%s10683_s3 + $0x4] ss:$24 sps:$4 sm:$0xff]   ;;  %v8666_v42 = vld [vmem:[%s10683_s3] ss:$24 sps:$4 sm:$0xff]  }
  0x86   :  { %742 = vmatprep.subr.bf16.mxu1 %v8439_v15  ;;  %v8499_v12 = vld [vmem:[%s10681_s1 + $0x1e8] ss:$24 sps:$4 sm:$0xff]   ;;  %v8504_v14 = vld [vmem:[%s10681_s1 + $0x21c] ss:$24 sps:$4 sm:$0xff]   ;;  %2814 = vmatprep.mubr.bf16.mxu0 %v10369_v37 }
  0x87   :  { %2789 = vmatpush1.bf16.msra.mxu0 %v8585_v50  ;;  %v8627_v15 = vld [vmem:[#allocation4 + $0x1e8] ss:$24 sps:$4 sm:$0xff]   ;;  %v8665_v38 = vld [vmem:[#allocation4 + $0x30c] ss:$24 sps:$4 sm:$0xff]   ;;  %v8520_v44 = vld [vmem:[%s10681_s1 + $0x40] ss:$24 sps:$4 sm:$0xff]  }
  0x88   :  { %2790 = vmatprep.subr.bf16.mxu0 %v8589_v51  ;;  %v8663_v41 = vld [vmem:[#allocation4 + $0x308] ss:$24 sps:$4 sm:$0xff]   ;;  %v8670_v46 = vld [vmem:[#allocation4 + $0x338] ss:$24 sps:$4 sm:$0xff]   ;;  %v8678_v47 = vld [vmem:[#allocation4 + $0x36c] ss:$24 sps:$4 sm:$0xff]  }
  0x89   :  { %743 = vmatpush1.bf16.msra.mxu1 %v8441_v16  ;;  %v8631_v16 = vld [vmem:[#allocation4 + $0x21c] ss:$24 sps:$4 sm:$0xff]   ;;  %v8531_v51 = vld [vmem:[%s10681_s1 + $0xd4] ss:$24 sps:$4 sm:$0xff]  }
  0x8a   :  { %744 = vmatprep.subr.bf16.mxu1 %v8442_v17  ;;  %v8502_v17 = vld [vmem:[%s10681_s1 + $0x218] ss:$24 sps:$4 sm:$0xff]  }
  0x8b   :  { %2791 = vmatpush1.bf16.msra.mxu0 %v8591_v54  ;;  %v8526_v50 = vld [vmem:[%s10681_s1 + $0xa0] ss:$24 sps:$4 sm:$0xff]   ;;  %v8529_v54 = vld [vmem:[%s10681_s1 + $0xd0] ss:$24 sps:$4 sm:$0xff]  }
  0x8c   :  { %2792 = vmatprep.subr.bf16.mxu0 %v8595_v55  ;;  %v8534_v55 = vld [vmem:[%s10681_s1 + $0x104] ss:$24 sps:$4 sm:$0xff]  }
  0x8d   :  { %745 = vmatpush1.bf16.msra.mxu1 %v8444_v18  ;;  %v8507_v18 = vld [vmem:[%s10681_s1 + $0x24c] ss:$24 sps:$4 sm:$0xff]  }
  0x8e   :  { %746 = vmatprep.subr.bf16.mxu1 %v8445_v19  ;;  %v8633_v19 = vld [vmem:[#allocation4 + $0x218] ss:$24 sps:$4 sm:$0xff]  }
  0x8f   :  { %2793 = vmatpush1.bf16.msra.mxu0 %v8597_v58  ;;  %v8532_v58 = vld [vmem:[%s10681_s1 + $0x100] ss:$24 sps:$4 sm:$0xff]  }
  0x90   :  { %2794 = vmatprep.subr.bf16.mxu0 %v8601_v59  ;;  %v8537_v59 = vld [vmem:[%s10681_s1 + $0x134] ss:$24 sps:$4 sm:$0xff]  }
  0x91   :  { %747 = vmatpush1.bf16.msra.mxu1 %v8447_v20  ;;  %v8637_v20 = vld [vmem:[#allocation4 + $0x24c] ss:$24 sps:$4 sm:$0xff]  }
  0x92   :  { %748 = vmatprep.subr.bf16.mxu1 %v8448_v21  ;;  %v8505_v21 = vld [vmem:[%s10681_s1 + $0x248] ss:$24 sps:$4 sm:$0xff]  }
  0x93   :  { %2795 = vmatpush1.bf16.msra.mxu0 %v8603_v62  ;;  %v8535_v62 = vld [vmem:[%s10681_s1 + $0x130] ss:$24 sps:$4 sm:$0xff]  }
  0x94   :  { %2796 = vmatprep.subr.bf16.mxu0 %v8607_v63  ;;  %v8540_v63 = vld [vmem:[%s10681_s1 + $0x164] ss:$24 sps:$4 sm:$0xff]  }
  0x95   :  { %749 = vmatpush1.bf16.msra.mxu1 %v8450_v22  ;;  %v8510_v22 = vld [vmem:[%s10681_s1 + $0x27c] ss:$24 sps:$4 sm:$0xff]  }
  0x96   :  { %750 = vmatprep.subr.bf16.mxu1 %v8451_v23  ;;  %v8639_v23 = vld [vmem:[#allocation4 + $0x248] ss:$24 sps:$4 sm:$0xff]  }
  0x97   :  { %2797 = vmatpush1.bf16.msra.mxu0 %v8609_v2  ;;  %v8538_v2 = vld [vmem:[%s10681_s1 + $0x160] ss:$24 sps:$4 sm:$0xff]  }
  0x98   :  { %2798 = vmatprep.subr.bf16.mxu0 %v8613_v3  ;;  %v8543_v3 = vld [vmem:[%s10681_s1 + $0x194] ss:$24 sps:$4 sm:$0xff]  }
  0x99   :  { %751 = vmatpush1.bf16.msra.mxu1 %v8453_v24  ;;  %v8643_v24 = vld [vmem:[#allocation4 + $0x27c] ss:$24 sps:$4 sm:$0xff]  }
  0x9a   :  { %752 = vmatprep.subr.bf16.mxu1 %v8454_v25  ;;  %v8508_v25 = vld [vmem:[%s10681_s1 + $0x278] ss:$24 sps:$4 sm:$0xff]  }
  0x9b   :  { %2799 = vmatpush1.bf16.msra.mxu0 %v8615_v6  ;;  %v8541_v6 = vld [vmem:[%s10681_s1 + $0x190] ss:$24 sps:$4 sm:$0xff]  }
  0x9c   :  { %2800 = vmatprep.subr.bf16.mxu0 %v8619_v7  ;;  %v8546_v7 = vld [vmem:[%s10681_s1 + $0x1c4] ss:$24 sps:$4 sm:$0xff]  }
  0x9d   :  { %753 = vmatpush1.bf16.msra.mxu1 %v8456_v26  ;;  %v8513_v26 = vld [vmem:[%s10681_s1 + $0x2ac] ss:$24 sps:$4 sm:$0xff]  }
  0x9e   :  { %754 = vmatprep.subr.bf16.mxu1 %v8457_v27  ;;  %v8645_v27 = vld [vmem:[#allocation4 + $0x278] ss:$24 sps:$4 sm:$0xff]  }
  0x9f   :  { %2801 = vmatpush1.bf16.msra.mxu0 %v8621_v10  ;;  %v8544_v10 = vld [vmem:[%s10681_s1 + $0x1c0] ss:$24 sps:$4 sm:$0xff]  }
  0xa0   :  { %2802 = vmatprep.subr.bf16.mxu0 %v8625_v11  ;;  %v8549_v11 = vld [vmem:[%s10681_s1 + $0x1f4] ss:$24 sps:$4 sm:$0xff]  }
  0xa1   :  { %755 = vmatpush1.bf16.msra.mxu1 %v8459_v28  ;;  %v8649_v28 = vld [vmem:[#allocation4 + $0x2ac] ss:$24 sps:$4 sm:$0xff]  }
  0xa2   :  { %756 = vmatprep.subr.bf16.mxu1 %v8460_v29  ;;  %v8511_v29 = vld [vmem:[%s10681_s1 + $0x2a8] ss:$24 sps:$4 sm:$0xff]  }
  0xa3   :  { %2803 = vmatpush1.bf16.msra.mxu0 %v8627_v15  ;;  %v8547_v15 = vld [vmem:[%s10681_s1 + $0x1f0] ss:$24 sps:$4 sm:$0xff]  }
  0xa4   :  { %2804 = vmatprep.subr.bf16.mxu0 %v8631_v16  ;;  %v8552_v16 = vld [vmem:[%s10681_s1 + $0x224] ss:$24 sps:$4 sm:$0xff]  }
  0xa5   :  { %757 = vmatpush1.bf16.msra.mxu1 %v8462_v30  ;;  %v8516_v30 = vld [vmem:[%s10681_s1 + $0x2dc] ss:$24 sps:$4 sm:$0xff]  }
  0xa6   :  { %758 = vmatprep.subr.bf16.mxu1 %v8463_v31  ;;  %v8651_v31 = vld [vmem:[#allocation4 + $0x2a8] ss:$24 sps:$4 sm:$0xff]  }
  0xa7   :  { %2805 = vmatpush1.bf16.msra.mxu0 %v8633_v19  ;;  %v8550_v19 = vld [vmem:[%s10681_s1 + $0x220] ss:$24 sps:$4 sm:$0xff]  }
  0xa8   :  { %2806 = vmatprep.subr.bf16.mxu0 %v8637_v20  ;;  %v8555_v20 = vld [vmem:[%s10681_s1 + $0x254] ss:$24 sps:$4 sm:$0xff]  }
  0xa9   :  { %759 = vmatpush1.bf16.msra.mxu1 %v8465_v32  ;;  %v8655_v32 = vld [vmem:[#allocation4 + $0x2dc] ss:$24 sps:$4 sm:$0xff]  }
  0xaa   :  { %771 = vmatprep.subr.bf16.mxu1 %v8471_v33  ;;  %v8514_v33 = vld [vmem:[%s10681_s1 + $0x2d8] ss:$24 sps:$4 sm:$0xff]  }
  0xab   :  { %2807 = vmatpush1.bf16.msra.mxu0 %v8639_v23  ;;  %v8553_v23 = vld [vmem:[%s10681_s1 + $0x250] ss:$24 sps:$4 sm:$0xff]  }
  0xac   :  { %761 = vmatmul.mubr.bf16.vlgmr.msra.gmra.mrb[0].mxu1 %v10266_v34  ;;  %2808 = vmatprep.subr.bf16.mxu0 %v8643_v24  ;;  %v8558_v24 = vld [vmem:[%s10681_s1 + $0x284] ss:$24 sps:$4 sm:$0xff]  }
  0xad   :  { %772 = vmatpush1.bf16.msra.mxu1 %v8469_v35  ;;  %803 = vmatprep.mubr.bf16.mxu1 %v10200_v13  ;;  %v8519_v35 = vld [vmem:[%s10681_s1 + $0x14] ss:$24 sps:$4 sm:$0xff]  }
  0xae   :  { %773 = vmatprep.subr.bf16.mxu1 %v8474_v36  ;;  %v8657_v36 = vld [vmem:[#allocation4 + $0x2d8] ss:$24 sps:$4 sm:$0xff]  }
  0xaf   :  { %2809 = vmatpush1.bf16.msra.mxu0 %v8645_v27  ;;  %v8556_v27 = vld [vmem:[%s10681_s1 + $0x280] ss:$24 sps:$4 sm:$0xff]  }
  0xb0   :  { %2810 = vmatprep.subr.bf16.mxu0 %v8649_v28  ;;  %v8561_v28 = vld [vmem:[%s10681_s1 + $0x2b4] ss:$24 sps:$4 sm:$0xff]  }
  0xb1   :  { %774 = vmatpush1.bf16.msra.mxu1 %v8472_v39  ;;  %v8517_v39 = vld [vmem:[%s10681_s1 + $0x10] ss:$24 sps:$4 sm:$0xff]  }
  0xb2   :  { %775 = vmatprep.subr.bf16.mxu1 %v8477_v40  ;;  %v8522_v40 = vld [vmem:[%s10681_s1 + $0x44] ss:$24 sps:$4 sm:$0xff]  }
  0xb3   :  { %2811 = vmatpush1.bf16.msra.mxu0 %v8651_v31  ;;  %v8559_v31 = vld [vmem:[%s10681_s1 + $0x2b0] ss:$24 sps:$4 sm:$0xff]  }
  0xb4   :  { %2812 = vmatprep.subr.bf16.mxu0 %v8655_v32  ;;  %v8564_v32 = vld [vmem:[%s10681_s1 + $0x2e4] ss:$24 sps:$4 sm:$0xff]  }
  0xb5   :  { %776 = vmatpush1.bf16.msra.mxu1 %v8475_v43  ;;  %v8672_v43 = vld [vmem:[#allocation4 + $0x33c] ss:$24 sps:$4 sm:$0xff]  }
  0xb6   :  { %777 = vmatprep.subr.bf16.mxu1 %v8480_v45  ;;  %v8525_v45 = vld [vmem:[%s10681_s1 + $0x74] ss:$24 sps:$4 sm:$0xff]  }
  0xb7   :  { %2813 = vmatpush1.bf16.msra.mxu0 %v8657_v36  ;;  %v8562_v36 = vld [vmem:[%s10681_s1 + $0x2e0] ss:$24 sps:$4 sm:$0xff]  }
  0xb8   :  { %2825 = vmatprep.subr.bf16.mxu0 %v8665_v38  ;;  %v8570_v38 = vld [vmem:[#allocation4 + $0x4] ss:$24 sps:$4 sm:$0xff]  }
  0xb9   :  { %778 = vmatpush1.bf16.msra.mxu1 %v8478_v48  ;;  %v8528_v48 = vld [vmem:[%s10681_s1 + $0xa4] ss:$24 sps:$4 sm:$0xff]  }
  0xba   :  { %779 = vmatprep.subr.bf16.mxu1 %v8483_v49  ;;  %2815 = vmatmul.mubr.bf16.vlgmr.msra.gmra.mrb[0].mxu0 %v8666_v42  ;;  %v8676_v49 = vld [vmem:[#allocation4 + $0x368] ss:$24 sps:$4 sm:$0xff]  }
  0xbb   :  { %2826 = vmatpush1.bf16.msra.mxu0 %v8663_v41  ;;  %v8765_v41 = vld [vmem:[#allocation4 + $0x60c] ss:$24 sps:$4 sm:$0xff]   ;;  %v8568_v42 = vld [vmem:[#allocation4] ss:$24 sps:$4 sm:$0xff]  }
  0xbc   :  { %2827 = vmatprep.subr.bf16.mxu0 %v8672_v43  ;;  %v8576_v43 = vld [vmem:[#allocation4 + $0x34] ss:$24 sps:$4 sm:$0xff]  }
  0xbd   :  { %780 = vmatpush1.bf16.msra.mxu1 %v8481_v52  ;;  %v8682_v52 = vld [vmem:[#allocation4 + $0x398] ss:$24 sps:$4 sm:$0xff]  }
  0xbe   :  { %781 = vmatprep.subr.bf16.mxu1 %v8486_v53  ;;  %v8690_v53 = vld [vmem:[#allocation4 + $0x3cc] ss:$24 sps:$4 sm:$0xff]  }
  0xbf   :  { %2828 = vmatpush1.bf16.msra.mxu0 %v8670_v46  ;;  %v9870_v46 = vld [vmem:[%s10680_s0] ss:$8 sps:$4 sm:$0xff]  }
  0xc0   :  { %2829 = vmatprep.subr.bf16.mxu0 %v8678_v47  ;;  %v8771_v47 = vld [vmem:[#allocation4 + $0x63c] ss:$24 sps:$4 sm:$0xff]  }
  0xc1   :  { %782 = vmatpush1.bf16.msra.mxu1 %v8484_v56  ;;  %v8688_v56 = vld [vmem:[#allocation4 + $0x3c8] ss:$24 sps:$4 sm:$0xff]  }
  0xc2   :  { %783 = vmatprep.subr.bf16.mxu1 %v8489_v57  ;;  %v8696_v57 = vld [vmem:[#allocation4 + $0x3fc] ss:$24 sps:$4 sm:$0xff]  }
  0xc3   :  { %2830 = vmatpush1.bf16.msra.mxu0 %v8676_v49  ;;  %v8769_v49 = vld [vmem:[#allocation4 + $0x638] ss:$24 sps:$4 sm:$0xff]  }
  0xc5   :  { %784 = vmatpush1.bf16.msra.mxu1 %v8487_v60  ;;  %v8694_v60 = vld [vmem:[#allocation4 + $0x3f8] ss:$24 sps:$4 sm:$0xff]  }
  0xc6   :  { %785 = vmatprep.subr.bf16.mxu1 %v8492_v61  ;;  %v8702_v61 = vld [vmem:[#allocation4 + $0x42c] ss:$24 sps:$4 sm:$0xff]  }
  0xc9   :  { %786 = vmatpush1.bf16.msra.mxu1 %v8490_v0  ;;  %v8700_v0 = vld [vmem:[#allocation4 + $0x428] ss:$24 sps:$4 sm:$0xff]  }
  0xca   :  { %787 = vmatprep.subr.bf16.mxu1 %v8495_v1  ;;  %v8708_v1 = vld [vmem:[#allocation4 + $0x45c] ss:$24 sps:$4 sm:$0xff]  }
  0xcd   :  { %788 = vmatpush1.bf16.msra.mxu1 %v8493_v4  ;;  %v8706_v4 = vld [vmem:[#allocation4 + $0x458] ss:$24 sps:$4 sm:$0xff]  }
  0xce   :  { %789 = vmatprep.subr.bf16.mxu1 %v8498_v5  ;;  %v8714_v5 = vld [vmem:[#allocation4 + $0x48c] ss:$24 sps:$4 sm:$0xff]  }
  0xd1   :  { %790 = vmatpush1.bf16.msra.mxu1 %v8496_v8  ;;  %v8712_v8 = vld [vmem:[#allocation4 + $0x488] ss:$24 sps:$4 sm:$0xff]  }
  0xd2   :  { %791 = vmatprep.subr.bf16.mxu1 %v8501_v9  ;;  %v8720_v9 = vld [vmem:[#allocation4 + $0x4bc] ss:$24 sps:$4 sm:$0xff]  }
  0xd5   :  { %792 = vmatpush1.bf16.msra.mxu1 %v8499_v12  ;;  %v8718_v12 = vld [vmem:[#allocation4 + $0x4b8] ss:$24 sps:$4 sm:$0xff]  }
  0xd6   :  { %793 = vmatprep.subr.bf16.mxu1 %v8504_v14  ;;  %v8726_v14 = vld [vmem:[#allocation4 + $0x4ec] ss:$24 sps:$4 sm:$0xff]  }
  0xd9   :  { %794 = vmatpush1.bf16.msra.mxu1 %v8502_v17  ;;  %v8724_v17 = vld [vmem:[#allocation4 + $0x4e8] ss:$24 sps:$4 sm:$0xff]  }
  0xda   :  { %795 = vmatprep.subr.bf16.mxu1 %v8507_v18  ;;  %v8732_v18 = vld [vmem:[#allocation4 + $0x51c] ss:$24 sps:$4 sm:$0xff]  }
  0xdd   :  { %796 = vmatpush1.bf16.msra.mxu1 %v8505_v21  ;;  %v8730_v21 = vld [vmem:[#allocation4 + $0x518] ss:$24 sps:$4 sm:$0xff]  }
  0xde   :  { %797 = vmatprep.subr.bf16.mxu1 %v8510_v22  ;;  %v8738_v22 = vld [vmem:[#allocation4 + $0x54c] ss:$24 sps:$4 sm:$0xff]  }
  0xe1   :  { %798 = vmatpush1.bf16.msra.mxu1 %v8508_v25  ;;  %v8736_v25 = vld [vmem:[#allocation4 + $0x548] ss:$24 sps:$4 sm:$0xff]  }
  0xe2   :  { %799 = vmatprep.subr.bf16.mxu1 %v8513_v26  ;;  %v8744_v26 = vld [vmem:[#allocation4 + $0x57c] ss:$24 sps:$4 sm:$0xff]  }
  0xe5   :  { %800 = vmatpush1.bf16.msra.mxu1 %v8511_v29  ;;  %v8742_v29 = vld [vmem:[#allocation4 + $0x578] ss:$24 sps:$4 sm:$0xff]  }
  0xe6   :  { %801 = vmatprep.subr.bf16.mxu1 %v8516_v30  ;;  %v8750_v30 = vld [vmem:[#allocation4 + $0x5ac] ss:$24 sps:$4 sm:$0xff]  }
  0xe9   :  { %802 = vmatpush1.bf16.msra.mxu1 %v8514_v33  ;;  %v8748_v33 = vld [vmem:[#allocation4 + $0x5a8] ss:$24 sps:$4 sm:$0xff]  }
  0xea   :  { %814 = vmatprep.subr.bf16.mxu1 %v8519_v35  ;;  %v8756_v35 = vld [vmem:[#allocation4 + $0x5dc] ss:$24 sps:$4 sm:$0xff]  }
  0xec   :  { %804 = vmatmul.mubr.bf16.vlgmr.msra.gmra.mrb[4].mxu1 %v10266_v34  ;;  %v8523_v34 = vld [vmem:[%s10681_s1 + $0x70] ss:$24 sps:$4 sm:$0xff]  }
  0xed   :  { %815 = vmatpush1.bf16.msra.mxu1 %v8517_v39  ;;  %846 = vmatprep.mubr.bf16.mxu1 %v10200_v13  ;;  %v8684_v13 = vld [vmem:[#allocation4 + $0x39c] ss:$24 sps:$4 sm:$0xff]   ;;  %v8754_v39 = vld [vmem:[#allocation4 + $0x5d8] ss:$24 sps:$4 sm:$0xff]  }
  0xee   :  { %816 = vmatprep.subr.bf16.mxu1 %v8522_v40  ;;  %2831 = vmatprep.subr.bf16.mxu0 %v8684_v13  ;;  %v10473_v40 = vld [vmem:[%s10683_s3 + $0xc] ss:$24 sps:$4 sm:$0xff]  }
  0xef   :  { %2832 = vmatpush1.bf16.msra.mxu0 %v8682_v52  ;;  %2857 = vmatprep.mubr.bf16.mxu0 %v10473_v40  ;;  %v8777_v13 = vld [vmem:[#allocation4 + $0x66c] ss:$24 sps:$4 sm:$0xff]   ;;  %v8775_v52 = vld [vmem:[#allocation4 + $0x668] ss:$24 sps:$4 sm:$0xff]  }
  0xf0   :  { %2833 = vmatprep.subr.bf16.mxu0 %v8690_v53  ;;  %v8783_v53 = vld [vmem:[#allocation4 + $0x69c] ss:$24 sps:$4 sm:$0xff]  }
  0xf1   :  { %817 = vmatpush1.bf16.msra.mxu1 %v8520_v44  ;;  %v8760_v44 = vld [vmem:[%s10683_s3 + $0x8] ss:$24 sps:$4 sm:$0xff]  }
  0xf2   :  { %818 = vmatprep.subr.bf16.mxu1 %v8525_v45  ;;  %v8763_v45 = vld [vmem:[#allocation4 + $0x608] ss:$24 sps:$4 sm:$0xff]  }
  0xf3   :  { %2834 = vmatpush1.bf16.msra.mxu0 %v8688_v56  ;;  %v8781_v56 = vld [vmem:[#allocation4 + $0x698] ss:$24 sps:$4 sm:$0xff]  }
  0xf4   :  { %2835 = vmatprep.subr.bf16.mxu0 %v8696_v57  ;;  %v8592_v57 = vld [vmem:[#allocation4 + $0xc0] ss:$24 sps:$4 sm:$0xff]  }
  0xf5   :  { %819 = vmatpush1.bf16.msra.mxu1 %v8523_v34  ;;  %v8574_v34 = vld [vmem:[#allocation4 + $0x30] ss:$24 sps:$4 sm:$0xff]  }
  0xf6   :  { %820 = vmatprep.subr.bf16.mxu1 %v8528_v48  ;;  %v8582_v48 = vld [vmem:[#allocation4 + $0x64] ss:$24 sps:$4 sm:$0xff]  }
  0xf7   :  { %2836 = vmatpush1.bf16.msra.mxu0 %v8694_v60  ;;  %v8795_v60 = vld [vmem:[#allocation4 + $0x6fc] ss:$24 sps:$4 sm:$0xff]  }
  0xf8   :  { %2837 = vmatprep.subr.bf16.mxu0 %v8702_v61  ;;  %v8598_v61 = vld [vmem:[#allocation4 + $0xf0] ss:$24 sps:$4 sm:$0xff]  }
  0xf9   :  { %821 = vmatpush1.bf16.msra.mxu1 %v8526_v50  ;;  %v8580_v50 = vld [vmem:[#allocation4 + $0x60] ss:$24 sps:$4 sm:$0xff]  }
  0xfa   :  { %822 = vmatprep.subr.bf16.mxu1 %v8531_v51  ;;  %v8588_v51 = vld [vmem:[#allocation4 + $0x94] ss:$24 sps:$4 sm:$0xff]  }
  0xfb   :  { %2838 = vmatpush1.bf16.msra.mxu0 %v8700_v0  ;;  %v8801_v0 = vld [vmem:[#allocation4 + $0x72c] ss:$24 sps:$4 sm:$0xff]  }
  0xfc   :  { %2839 = vmatprep.subr.bf16.mxu0 %v8708_v1  ;;  %v8604_v1 = vld [vmem:[#allocation4 + $0x120] ss:$24 sps:$4 sm:$0xff]  }
  0xfd   :  { %823 = vmatpush1.bf16.msra.mxu1 %v8529_v54  ;;  %v8586_v54 = vld [vmem:[#allocation4 + $0x90] ss:$24 sps:$4 sm:$0xff]  }
  0xfe   :  { %824 = vmatprep.subr.bf16.mxu1 %v8534_v55  ;;  %v8594_v55 = vld [vmem:[#allocation4 + $0xc4] ss:$24 sps:$4 sm:$0xff]  }
  0xff   :  { %2840 = vmatpush1.bf16.msra.mxu0 %v8706_v4  ;;  %v8807_v4 = vld [vmem:[#allocation4 + $0x75c] ss:$24 sps:$4 sm:$0xff]  }
 0x100   :  { %2841 = vmatprep.subr.bf16.mxu0 %v8714_v5  ;;  %v8610_v5 = vld [vmem:[#allocation4 + $0x150] ss:$24 sps:$4 sm:$0xff]  }
 0x101   :  { %825 = vmatpush1.bf16.msra.mxu1 %v8532_v58  ;;  %v8600_v58 = vld [vmem:[#allocation4 + $0xf4] ss:$24 sps:$4 sm:$0xff]  }
 0x102   :  { %826 = vmatprep.subr.bf16.mxu1 %v8537_v59  ;;  %v8787_v59 = vld [vmem:[#allocation4 + $0x6c8] ss:$24 sps:$4 sm:$0xff]  }
 0x103   :  { %2842 = vmatpush1.bf16.msra.mxu0 %v8712_v8  ;;  %v8813_v8 = vld [vmem:[#allocation4 + $0x78c] ss:$24 sps:$4 sm:$0xff]  }
 0x104   :  { %2843 = vmatprep.subr.bf16.mxu0 %v8720_v9  ;;  %v8616_v9 = vld [vmem:[#allocation4 + $0x180] ss:$24 sps:$4 sm:$0xff]  }
 0x105   :  { %827 = vmatpush1.bf16.msra.mxu1 %v8535_v62  ;;  %v8606_v62 = vld [vmem:[#allocation4 + $0x124] ss:$24 sps:$4 sm:$0xff]  }
 0x106   :  { %828 = vmatprep.subr.bf16.mxu1 %v8540_v63  ;;  %v8793_v63 = vld [vmem:[#allocation4 + $0x6f8] ss:$24 sps:$4 sm:$0xff]  }
 0x107   :  { %2844 = vmatpush1.bf16.msra.mxu0 %v8718_v12  ;;  %v8819_v12 = vld [vmem:[#allocation4 + $0x7bc] ss:$24 sps:$4 sm:$0xff]  }
 0x108   :  { %2845 = vmatprep.subr.bf16.mxu0 %v8726_v14  ;;  %v8622_v14 = vld [vmem:[#allocation4 + $0x1b0] ss:$24 sps:$4 sm:$0xff]  }
 0x109   :  { %829 = vmatpush1.bf16.msra.mxu1 %v8538_v2  ;;  %v8612_v2 = vld [vmem:[#allocation4 + $0x154] ss:$24 sps:$4 sm:$0xff]  }
 0x10a   :  { %830 = vmatprep.subr.bf16.mxu1 %v8543_v3  ;;  %v8799_v3 = vld [vmem:[#allocation4 + $0x728] ss:$24 sps:$4 sm:$0xff]  }
 0x10b   :  { %2846 = vmatpush1.bf16.msra.mxu0 %v8724_v17  ;;  %v8825_v17 = vld [vmem:[#allocation4 + $0x7ec] ss:$24 sps:$4 sm:$0xff]  }
 0x10c   :  { %2847 = vmatprep.subr.bf16.mxu0 %v8732_v18  ;;  %v8628_v18 = vld [vmem:[#allocation4 + $0x1e0] ss:$24 sps:$4 sm:$0xff]  }
 0x10d   :  { %831 = vmatpush1.bf16.msra.mxu1 %v8541_v6  ;;  %v8618_v6 = vld [vmem:[#allocation4 + $0x184] ss:$24 sps:$4 sm:$0xff]  }
 0x10e   :  { %832 = vmatprep.subr.bf16.mxu1 %v8546_v7  ;;  %v8805_v7 = vld [vmem:[#allocation4 + $0x758] ss:$24 sps:$4 sm:$0xff]  }
 0x10f   :  { %2848 = vmatpush1.bf16.msra.mxu0 %v8730_v21  ;;  %v8831_v21 = vld [vmem:[#allocation4 + $0x81c] ss:$24 sps:$4 sm:$0xff]  }
 0x110   :  { %2849 = vmatprep.subr.bf16.mxu0 %v8738_v22  ;;  %v8634_v22 = vld [vmem:[#allocation4 + $0x210] ss:$24 sps:$4 sm:$0xff]  }
 0x111   :  { %833 = vmatpush1.bf16.msra.mxu1 %v8544_v10  ;;  %v8624_v10 = vld [vmem:[#allocation4 + $0x1b4] ss:$24 sps:$4 sm:$0xff]  }
 0x112   :  { %834 = vmatprep.subr.bf16.mxu1 %v8549_v11  ;;  %v8811_v11 = vld [vmem:[#allocation4 + $0x788] ss:$24 sps:$4 sm:$0xff]  }
 0x113   :  { %2850 = vmatpush1.bf16.msra.mxu0 %v8736_v25  ;;  %v8837_v25 = vld [vmem:[#allocation4 + $0x84c] ss:$24 sps:$4 sm:$0xff]  }
 0x114   :  { %2851 = vmatprep.subr.bf16.mxu0 %v8744_v26  ;;  %v8640_v26 = vld [vmem:[#allocation4 + $0x240] ss:$24 sps:$4 sm:$0xff]  }
 0x115   :  { %835 = vmatpush1.bf16.msra.mxu1 %v8547_v15  ;;  %v8630_v15 = vld [vmem:[#allocation4 + $0x1e4] ss:$24 sps:$4 sm:$0xff]  }
 0x116   :  { %836 = vmatprep.subr.bf16.mxu1 %v8552_v16  ;;  %v8817_v16 = vld [vmem:[#allocation4 + $0x7b8] ss:$24 sps:$4 sm:$0xff]  }
 0x117   :  { %2852 = vmatpush1.bf16.msra.mxu0 %v8742_v29  ;;  %v8843_v29 = vld [vmem:[#allocation4 + $0x87c] ss:$24 sps:$4 sm:$0xff]  }
 0x118   :  { %2853 = vmatprep.subr.bf16.mxu0 %v8750_v30  ;;  %v8646_v30 = vld [vmem:[#allocation4 + $0x270] ss:$24 sps:$4 sm:$0xff]  }
 0x119   :  { %837 = vmatpush1.bf16.msra.mxu1 %v8550_v19  ;;  %v8636_v19 = vld [vmem:[#allocation4 + $0x214] ss:$24 sps:$4 sm:$0xff]  }
 0x11a   :  { %838 = vmatprep.subr.bf16.mxu1 %v8555_v20  ;;  %v8823_v20 = vld [vmem:[#allocation4 + $0x7e8] ss:$24 sps:$4 sm:$0xff]  }
 0x11b   :  { %2854 = vmatpush1.bf16.msra.mxu0 %v8748_v33  ;;  %v8849_v33 = vld [vmem:[#allocation4 + $0x8ac] ss:$24 sps:$4 sm:$0xff]  }
 0x11c   :  { %2855 = vmatprep.subr.bf16.mxu0 %v8756_v35  ;;  %v8652_v35 = vld [vmem:[#allocation4 + $0x2a0] ss:$24 sps:$4 sm:$0xff]  }
 0x11d   :  { %839 = vmatpush1.bf16.msra.mxu1 %v8553_v23  ;;  %v8642_v23 = vld [vmem:[#allocation4 + $0x244] ss:$24 sps:$4 sm:$0xff]  }
 0x11e   :  { %840 = vmatprep.subr.bf16.mxu1 %v8558_v24  ;;  %v8829_v24 = vld [vmem:[#allocation4 + $0x818] ss:$24 sps:$4 sm:$0xff]  }
 0x11f   :  { %2856 = vmatpush1.bf16.msra.mxu0 %v8754_v39  ;;  %v8855_v39 = vld [vmem:[#allocation4 + $0x8dc] ss:$24 sps:$4 sm:$0xff]  }
 0x120   :  { %2868 = vmatprep.subr.bf16.mxu0 %v8765_v41  ;;  %v8658_v41 = vld [vmem:[#allocation4 + $0x2d0] ss:$24 sps:$4 sm:$0xff]  }
 0x121   :  { %841 = vmatpush1.bf16.msra.mxu1 %v8556_v27  ;;  %v8648_v27 = vld [vmem:[#allocation4 + $0x274] ss:$24 sps:$4 sm:$0xff]  }
 0x122   :  { %842 = vmatprep.subr.bf16.mxu1 %v8561_v28  ;;  %2858 = vmatmul.mubr.bf16.vlgmr.msra.gmra.mrb[0].mxu0 %v8760_v44  ;;  %v8835_v28 = vld [vmem:[#allocation4 + $0x848] ss:$24 sps:$4 sm:$0xff]  }
 0x123   :  { %2869 = vmatpush1.bf16.msra.mxu0 %v8763_v45  ;;  %v8667_v44 = vld [vmem:[#allocation4 + $0x300] ss:$24 sps:$4 sm:$0xff]   ;;  %v10486_v45 = vld [vmem:[%s10683_s3 + $0x14] ss:$24 sps:$4 sm:$0xff]  }
 0x124   :  { %2870 = vmatprep.subr.bf16.mxu0 %v8771_v47  ;;  %2900 = vmatprep.mubr.bf16.mxu0 %v10486_v45  ;;  %v10492_v47 = vld [vmem:[%s10683_s3 + $0x10] ss:$24 sps:$4 sm:$0xff]  }
 0x125   :  { %843 = vmatpush1.bf16.msra.mxu1 %v8559_v31  ;;  %v8654_v31 = vld [vmem:[#allocation4 + $0x2a4] ss:$24 sps:$4 sm:$0xff]  }
 0x126   :  { %844 = vmatprep.subr.bf16.mxu1 %v8564_v32  ;;  %v8841_v32 = vld [vmem:[#allocation4 + $0x878] ss:$24 sps:$4 sm:$0xff]  }
 0x127   :  { %2871 = vmatpush1.bf16.msra.mxu0 %v8769_v49  ;;  %v8681_v49 = vld [vmem:[#allocation4 + $0x364] ss:$24 sps:$4 sm:$0xff]  }
 0x128   :  { %2872 = vmatprep.subr.bf16.mxu0 %v8777_v13  ;;  %v208_v13 = vlaneseq }
 0x129   :  { %845 = vmatpush1.bf16.msra.mxu1 %v8562_v36  ;;  %v8660_v36 = vld [vmem:[#allocation4 + $0x2d4] ss:$24 sps:$4 sm:$0xff]  }
 0x12a   :  { %2653 = vmatprep.subr.bf16.mxu1 %v8570_v38  ;;  %v8847_v38 = vld [vmem:[#allocation4 + $0x8a8] ss:$24 sps:$4 sm:$0xff]  }
 0x12b   :  { %2873 = vmatpush1.bf16.msra.mxu0 %v8775_v52  ;;  %v10499_v52 = vshrl.u32 %v208_v13, 7 }
 0x12c   :  { %847 = vmatmul.mubr.bf16.vlgmr.msra.gmra.mrb[8].mxu1 %v9870_v46  ;;  %2874 = vmatprep.subr.bf16.mxu0 %v8783_v53  ;;  %v8675_v46 = vld [vmem:[#allocation4 + $0x334] ss:$24 sps:$4 sm:$0xff]   ;;  %v8685_v53 = vld [vmem:[#allocation4 + $0x390] ss:$24 sps:$4 sm:$0xff]  }
 0x12d   :  { %2654 = vmatpush1.bf16.msra.mxu1 %v8568_v42  ;;  %2685 = vmatprep.mubr.bf16.mxu1 %v10369_v37  ;;  %v8789_v37 = vld [vmem:[#allocation4 + $0x6cc] ss:$24 sps:$4 sm:$0xff]  }
 0x12e   :  { %2655 = vmatprep.subr.bf16.mxu1 %v8576_v43  ;;  %v8669_v42 = vld [vmem:[#allocation4 + $0x304] ss:$24 sps:$4 sm:$0xff]   ;;  %v8853_v43 = vld [vmem:[#allocation4 + $0x8d8] ss:$24 sps:$4 sm:$0xff]  }
 0x12f   :  { %2875 = vmatpush1.bf16.msra.mxu0 %v8781_v56  ;;  %v10502_v56 = vsub.s32 0, %v10499_v52 }
 0x130   :  { %2876 = vmatprep.subr.bf16.mxu0 %v8789_v37  ;;  %v8699_v37 = vld [vmem:[#allocation4 + $0x3f4] ss:$24 sps:$4 sm:$0xff]  }
 0x131   :  { %2656 = vmatpush1.bf16.msra.mxu1 %v8574_v34  ;;  %v9871_v34 = vld [vmem:[%s10683_s3] ss:$24 sps:$4 sm:$0xff]  }
 0x132   :  { %2657 = vmatprep.subr.bf16.mxu1 %v8582_v48  ;;  %v8673_v48 = vld [vmem:[#allocation4 + $0x330] ss:$24 sps:$4 sm:$0xff]  }
 0x133   :  { %2877 = vmatpush1.bf16.msra.mxu0 %v8787_v59 }
 0x134   :  { %2878 = vmatprep.subr.bf16.mxu0 %v8795_v60  ;;  %v8705_v60 = vld [vmem:[#allocation4 + $0x424] ss:$24 sps:$4 sm:$0xff]  }
 0x135   :  { %2658 = vmatpush1.bf16.msra.mxu1 %v8580_v50  ;;  %v8679_v50 = vld [vmem:[#allocation4 + $0x360] ss:$24 sps:$4 sm:$0xff]  }
 0x136   :  { %2659 = vmatprep.subr.bf16.mxu1 %v8588_v51  ;;  %v8687_v51 = vld [vmem:[#allocation4 + $0x394] ss:$24 sps:$4 sm:$0xff]  }
 0x137   :  { %2879 = vmatpush1.bf16.msra.mxu0 %v8793_v63  ;;  %v8703_v63 = vld [vmem:[#allocation4 + $0x420] ss:$24 sps:$4 sm:$0xff]  }
 0x138   :  { %2880 = vmatprep.subr.bf16.mxu0 %v8801_v0 }
 0x139   :  { %2660 = vmatpush1.bf16.msra.mxu1 %v8586_v54  ;;  %v8693_v54 = vld [vmem:[#allocation4 + $0x3c4] ss:$24 sps:$4 sm:$0xff]  }
 0x13a   :  { %2661 = vmatprep.subr.bf16.mxu1 %v8594_v55  ;;  %v8691_v55 = vld [vmem:[#allocation4 + $0x3c0] ss:$24 sps:$4 sm:$0xff]  }
 0x13b   :  { %2881 = vmatpush1.bf16.msra.mxu0 %v8799_v3 }
 0x13c   :  { %2882 = vmatprep.subr.bf16.mxu0 %v8807_v4 }
 0x13d   :  { %2662 = vmatpush1.bf16.msra.mxu1 %v8592_v57  ;;  %v10507_v57 = vsub.s32 1, %v10499_v52 }
 0x13e   :  { %2663 = vmatprep.subr.bf16.mxu1 %v8600_v58  ;;  %v8697_v58 = vld [vmem:[#allocation4 + $0x3f0] ss:$24 sps:$4 sm:$0xff]  }
 0x13f   :  { %2883 = vmatpush1.bf16.msra.mxu0 %v8805_v7 }
 0x140   :  { %2884 = vmatprep.subr.bf16.mxu0 %v8813_v8 }
 0x141   :  { %2664 = vmatpush1.bf16.msra.mxu1 %v8598_v61 }
 0x142   :  { %2665 = vmatprep.subr.bf16.mxu1 %v8606_v62 }
 0x143   :  { %2885 = vmatpush1.bf16.msra.mxu0 %v8811_v11  ;;  %v8717_v11 = vld [vmem:[#allocation4 + $0x484] ss:$24 sps:$4 sm:$0xff]  }
 0x144   :  { %2886 = vmatprep.subr.bf16.mxu0 %v8819_v12  ;;  %v8715_v12 = vld [vmem:[#allocation4 + $0x480] ss:$24 sps:$4 sm:$0xff]  }
 0x145   :  { %2666 = vmatpush1.bf16.msra.mxu1 %v8604_v1 }
 0x146   :  { %2667 = vmatprep.subr.bf16.mxu1 %v8612_v2 }
 0x147   :  { %2887 = vmatpush1.bf16.msra.mxu0 %v8817_v16  ;;  %v8729_v16 = vld [vmem:[#allocation4 + $0x4e4] ss:$24 sps:$4 sm:$0xff]  }
 0x148   :  { %2888 = vmatprep.subr.bf16.mxu0 %v8825_v17  ;;  %v8727_v17 = vld [vmem:[#allocation4 + $0x4e0] ss:$24 sps:$4 sm:$0xff]  }
 0x149   :  { %2668 = vmatpush1.bf16.msra.mxu1 %v8610_v5  ;;  %v8711_v5 = vld [vmem:[#allocation4 + $0x454] ss:$24 sps:$4 sm:$0xff]  }
 0x14a   :  { %2669 = vmatprep.subr.bf16.mxu1 %v8618_v6 }
 0x14b   :  { %2889 = vmatpush1.bf16.msra.mxu0 %v8823_v20  ;;  %v8741_v20 = vld [vmem:[#allocation4 + $0x544] ss:$24 sps:$4 sm:$0xff]  }
 0x14c   :  { %2890 = vmatprep.subr.bf16.mxu0 %v8831_v21  ;;  %v8739_v21 = vld [vmem:[#allocation4 + $0x540] ss:$24 sps:$4 sm:$0xff]  }
 0x14d   :  { %2670 = vmatpush1.bf16.msra.mxu1 %v8616_v9 }
 0x14e   :  { %2671 = vmatprep.subr.bf16.mxu1 %v8624_v10  ;;  %v8709_v10 = vld [vmem:[#allocation4 + $0x450] ss:$24 sps:$4 sm:$0xff]  }
 0x14f   :  { %2891 = vmatpush1.bf16.msra.mxu0 %v8829_v24  ;;  %v8753_v24 = vld [vmem:[#allocation4 + $0x5a4] ss:$24 sps:$4 sm:$0xff]  }
 0x150   :  { %2892 = vmatprep.subr.bf16.mxu0 %v8837_v25  ;;  %v8751_v25 = vld [vmem:[#allocation4 + $0x5a0] ss:$24 sps:$4 sm:$0xff]  }
 0x151   :  { %2672 = vmatpush1.bf16.msra.mxu1 %v8622_v14  ;;  %v8723_v14 = vld [vmem:[#allocation4 + $0x4b4] ss:$24 sps:$4 sm:$0xff]  }
 0x152   :  { %2673 = vmatprep.subr.bf16.mxu1 %v8630_v15  ;;  %v8721_v15 = vld [vmem:[#allocation4 + $0x4b0] ss:$24 sps:$4 sm:$0xff]  }
 0x153   :  { %2893 = vmatpush1.bf16.msra.mxu0 %v8835_v28  ;;  %v8768_v28 = vld [vmem:[#allocation4 + $0x604] ss:$24 sps:$4 sm:$0xff]  }
 0x154   :  { %2894 = vmatprep.subr.bf16.mxu0 %v8843_v29  ;;  %v8766_v29 = vld [vmem:[#allocation4 + $0x600] ss:$24 sps:$4 sm:$0xff]  }
 0x155   :  { %2674 = vmatpush1.bf16.msra.mxu1 %v8628_v18  ;;  %v8735_v18 = vld [vmem:[#allocation4 + $0x514] ss:$24 sps:$4 sm:$0xff]  }
 0x156   :  { %2675 = vmatprep.subr.bf16.mxu1 %v8636_v19  ;;  %v8733_v19 = vld [vmem:[#allocation4 + $0x510] ss:$24 sps:$4 sm:$0xff]  }
 0x157   :  { %2895 = vmatpush1.bf16.msra.mxu0 %v8841_v32  ;;  %v8772_v32 = vld [vmem:[#allocation4 + $0x630] ss:$24 sps:$4 sm:$0xff]  }
 0x158   :  { %2896 = vmatprep.subr.bf16.mxu0 %v8849_v33  ;;  %v8780_v33 = vld [vmem:[#allocation4 + $0x664] ss:$24 sps:$4 sm:$0xff]  }
 0x159   :  { %2676 = vmatpush1.bf16.msra.mxu1 %v8634_v22  ;;  %v8747_v22 = vld [vmem:[#allocation4 + $0x574] ss:$24 sps:$4 sm:$0xff]  }
 0x15a   :  { %2677 = vmatprep.subr.bf16.mxu1 %v8642_v23  ;;  %v8745_v23 = vld [vmem:[#allocation4 + $0x570] ss:$24 sps:$4 sm:$0xff]  }
 0x15b   :  { %2897 = vmatpush1.bf16.msra.mxu0 %v8847_v38  ;;  %v8784_v38 = vld [vmem:[#allocation4 + $0x690] ss:$24 sps:$4 sm:$0xff]  }
 0x15c   :  { %2898 = vmatprep.subr.bf16.mxu0 %v8855_v39  ;;  %v8792_v39 = vld [vmem:[#allocation4 + $0x6c4] ss:$24 sps:$4 sm:$0xff]  }
 0x15d   :  { %2678 = vmatpush1.bf16.msra.mxu1 %v8640_v26  ;;  %v8759_v26 = vld [vmem:[#allocation4 + $0x5d4] ss:$24 sps:$4 sm:$0xff]  }
 0x15e   :  { %2679 = vmatprep.subr.bf16.mxu1 %v8648_v27  ;;  %v8757_v27 = vld [vmem:[#allocation4 + $0x5d0] ss:$24 sps:$4 sm:$0xff]  }
 0x15f   :  { %2899 = vmatpush1.bf16.msra.mxu0 %v8853_v43  ;;  %v8798_v43 = vld [vmem:[#allocation4 + $0x6f4] ss:$24 sps:$4 sm:$0xff]  }
 0x161   :  { %2680 = vmatpush1.bf16.msra.mxu1 %v8646_v30  ;;  %v8774_v30 = vld [vmem:[#allocation4 + $0x634] ss:$24 sps:$4 sm:$0xff]  }
 0x162   :  { %2681 = vmatprep.subr.bf16.mxu1 %v8654_v31  ;;  %2901 = vmatmul.mubr.bf16.vlgmr.msra.gmra.mrb[0].mxu0 %v10492_v47  ;;  %v9872_v31 = vld [vmem:[%s10683_s3 + $0x8] ss:$24 sps:$4 sm:$0xff]  }
 0x165   :  { %2682 = vmatpush1.bf16.msra.mxu1 %v8652_v35  ;;  %v8778_v35 = vld [vmem:[#allocation4 + $0x660] ss:$24 sps:$4 sm:$0xff]  }
 0x166   :  { %2683 = vmatprep.subr.bf16.mxu1 %v8660_v36  ;;  %v8786_v36 = vld [vmem:[#allocation4 + $0x694] ss:$24 sps:$4 sm:$0xff]  }
 0x169   :  { %2684 = vmatpush1.bf16.msra.mxu1 %v8658_v41  ;;  %v10522_v41 = vsub.s32 2, %v10499_v52 }
 0x16a   :  { %2696 = vmatprep.subr.bf16.mxu1 %v8669_v42  ;;  %v8790_v42 = vld [vmem:[#allocation4 + $0x6c0] ss:$24 sps:$4 sm:$0xff]  }
 0x16c   :  { %2686 = vmatmul.mubr.bf16.vlgmr.msra.gmra.mrb[12].mxu1 %v9871_v34  ;;  %v8804_v34 = vld [vmem:[#allocation4 + $0x724] ss:$24 sps:$4 sm:$0xff]  }
 0x16d   :  { %2697 = vmatpush1.bf16.msra.mxu1 %v8667_v44  ;;  %2728 = vmatprep.mubr.bf16.mxu1 %v10473_v40  ;;  %v10504_v40 = vld [vmem:[#allocation2] sm:$0x3f]  ;;  %v10525_v44 = vsub.s32 3, %v10499_v52 }
 0x16e   :  { %2698 = vmatprep.subr.bf16.mxu1 %v8675_v46  ;;  %v211_v59 = vrot.slane %v10504_v40, %v10502_v56  ;;  %v215_v62 = vrot.slane %v10504_v40, %v10507_v57  ;;  %v8796_v46 = vld [vmem:[#allocation4 + $0x6f0] ss:$24 sps:$4 sm:$0xff]  }
 0x171   :  { %2699 = vmatpush1.bf16.msra.mxu1 %v8673_v48 }
 0x172   :  { %2700 = vmatprep.subr.bf16.mxu1 %v8681_v49  ;;  %v223_v49 = vrot.slane %v10504_v40, %v10525_v44 }
 0x175   :  { %2701 = vmatpush1.bf16.msra.mxu1 %v8679_v50 }
 0x176   :  { %2702 = vmatprep.subr.bf16.mxu1 %v8687_v51 }
 0x179   :  { %2703 = vmatpush1.bf16.msra.mxu1 %v8685_v53  ;;  %v8802_v53 = vld [vmem:[#allocation4 + $0x720] ss:$24 sps:$4 sm:$0xff]  }
 0x17a   :  { %2704 = vmatprep.subr.bf16.mxu1 %v8693_v54  ;;  %v8810_v54 = vld [vmem:[#allocation4 + $0x754] ss:$24 sps:$4 sm:$0xff]  }
 0x17d   :  { %2705 = vmatpush1.bf16.msra.mxu1 %v8691_v55 }
 0x17e   :  { %2706 = vmatprep.subr.bf16.mxu1 %v8699_v37 }
 0x17f   :  { %v762_v61 = vpop.f32.mrb[0].mxu1 }
 0x180   :  { %v763_v0 = vadd.f32 %v762_v61, %v211_v59  ;;  %v764_v1 = vpop.f32.mrb[1].mxu1 }
 0x181   :  { %v766_v2 = vpop.f32.mrb[2].mxu1  ;;  %2707 = vmatpush1.bf16.msra.mxu1 %v8697_v58  ;;  %v765_v6 = vadd.f32 %v764_v1, %v215_v62  ;;  %v8822_v1 = vld [vmem:[#allocation4 + $0x7b4] ss:$24 sps:$4 sm:$0xff]  }
 0x182   :  { %v767_v3 = vadd.f32 %v766_v2, %v211_v59  ;;  %v768_v4 = vpop.f32.mrb[3].mxu1  ;;  %2708 = vmatprep.subr.bf16.mxu1 %v8705_v60  ;;  %v8820_v2 = vld [vmem:[#allocation4 + $0x7b0] ss:$24 sps:$4 sm:$0xff]  }
 0x183   :  { %v769_v7 = vadd.f32 %v768_v4, %v215_v62  ;;  %v8808_v62 = vld [vmem:[#allocation4 + $0x750] ss:$24 sps:$4 sm:$0xff]   ;;  %v8826_v4 = vld [vmem:[#allocation4 + $0x7e0] ss:$24 sps:$4 sm:$0xff]  }
 0x184   :  { %v10513_v8 = vpack.c.bf16 %v767_v3, %v763_v0  ;;  %v8814_v0 = vld [vmem:[#allocation4 + $0x780] ss:$24 sps:$4 sm:$0xff]   ;;  %v8828_v3 = vld [vmem:[#allocation4 + $0x7e4] ss:$24 sps:$4 sm:$0xff]  }
 0x185   :  { %v10515_v9 = vpack.c.bf16 %v769_v7, %v765_v6  ;;  %2709 = vmatpush1.bf16.msra.mxu1 %v8703_v63  ;;  %v8816_v63 = vld [vmem:[#allocation4 + $0x784] ss:$24 sps:$4 sm:$0xff]   ;;  %v8832_v6 = vld [vmem:[#allocation4 + $0x810] ss:$24 sps:$4 sm:$0xff]  }
 0x186   :  { %2710 = vmatprep.subr.bf16.mxu1 %v8711_v5  ;;  %v8834_v5 = vld [vmem:[#allocation4 + $0x814] ss:$24 sps:$4 sm:$0xff]   ;;  %v8840_v7 = vld [vmem:[#allocation4 + $0x844] ss:$24 sps:$4 sm:$0xff]  }
 0x189   :  { %2711 = vmatpush1.bf16.msra.mxu1 %v8709_v10  ;;  %v8838_v10 = vld [vmem:[#allocation4 + $0x840] ss:$24 sps:$4 sm:$0xff]  }
 0x18a   :  { %2712 = vmatprep.subr.bf16.mxu1 %v8717_v11  ;;  %v8846_v11 = vld [vmem:[#allocation4 + $0x874] ss:$24 sps:$4 sm:$0xff]  }
 0x18d   :  { %2713 = vmatpush1.bf16.msra.mxu1 %v8715_v12  ;;  %v8844_v12 = vld [vmem:[#allocation4 + $0x870] ss:$24 sps:$4 sm:$0xff]  }
 0x18e   :  { %2714 = vmatprep.subr.bf16.mxu1 %v8723_v14  ;;  %v8852_v14 = vld [vmem:[#allocation4 + $0x8a4] ss:$24 sps:$4 sm:$0xff]  }
 0x191   :  { %2715 = vmatpush1.bf16.msra.mxu1 %v8721_v15  ;;  %v8850_v15 = vld [vmem:[#allocation4 + $0x8a0] ss:$24 sps:$4 sm:$0xff]  }
 0x192   :  { %2716 = vmatprep.subr.bf16.mxu1 %v8729_v16  ;;  %v8858_v16 = vld [vmem:[#allocation4 + $0x8d4] ss:$24 sps:$4 sm:$0xff]  }
 0x195   :  { %2717 = vmatpush1.bf16.msra.mxu1 %v8727_v17  ;;  %v8856_v17 = vld [vmem:[#allocation4 + $0x8d0] ss:$24 sps:$4 sm:$0xff]  }
 0x196   :  { %2718 = vmatprep.subr.bf16.mxu1 %v8735_v18  ;;  %v8864_v18 = vld [vmem:[#allocation4 + $0x14] ss:$24 sps:$4 sm:$0xff]  }
 0x199   :  { %2719 = vmatpush1.bf16.msra.mxu1 %v8733_v19  ;;  %v8862_v19 = vld [vmem:[#allocation4 + $0x10] ss:$24 sps:$4 sm:$0xff]  }
 0x19a   :  { %2720 = vmatprep.subr.bf16.mxu1 %v8741_v20  ;;  %v8867_v20 = vld [vmem:[#allocation4 + $0x44] ss:$24 sps:$4 sm:$0xff]  }
 0x19d   :  { %2721 = vmatpush1.bf16.msra.mxu1 %v8739_v21  ;;  %v8865_v21 = vld [vmem:[#allocation4 + $0x40] ss:$24 sps:$4 sm:$0xff]  }
 0x19e   :  { %2722 = vmatprep.subr.bf16.mxu1 %v8747_v22  ;;  %v8870_v22 = vld [vmem:[#allocation4 + $0x74] ss:$24 sps:$4 sm:$0xff]  }
 0x1a1   :  { %2723 = vmatpush1.bf16.msra.mxu1 %v8745_v23  ;;  %v9873_v23 = vld [vmem:[%s10683_s3 + $0x4] ss:$24 sps:$4 sm:$0xff]  }
 0x1a2   :  { %2724 = vmatprep.subr.bf16.mxu1 %v8753_v24  ;;  %v8868_v24 = vld [vmem:[#allocation4 + $0x70] ss:$24 sps:$4 sm:$0xff]  }
 0x1a5   :  { %2725 = vmatpush1.bf16.msra.mxu1 %v8751_v25  ;;  %v8873_v25 = vld [vmem:[#allocation4 + $0xa4] ss:$24 sps:$4 sm:$0xff]  }
 0x1a6   :  { %2726 = vmatprep.subr.bf16.mxu1 %v8759_v26  ;;  %v8871_v26 = vld [vmem:[#allocation4 + $0xa0] ss:$24 sps:$4 sm:$0xff]  }
 0x1a9   :  { %2727 = vmatpush1.bf16.msra.mxu1 %v8757_v27  ;;  %v8876_v27 = vld [vmem:[#allocation4 + $0xd4] ss:$24 sps:$4 sm:$0xff]  }
 0x1aa   :  { %2739 = vmatprep.subr.bf16.mxu1 %v8768_v28  ;;  %v10540_v28 = vsub.s32 4, %v10499_v52 }
 0x1ac   :  { %2729 = vmatmul.mubr.bf16.vlgmr.msra.gmra.mrb[12].mxu1 %v9872_v31  ;;  %v227_v31 = vrot.slane %v10504_v40, %v10540_v28 }
 0x1ad   :  { %2740 = vmatpush1.bf16.msra.mxu1 %v8766_v29  ;;  %2771 = vmatprep.mubr.bf16.mxu1 %v10486_v45  ;;  %v219_v45 = vrot.slane %v10504_v40, %v10522_v41  ;;  %v8879_v29 = vld [vmem:[#allocation4 + $0x104] ss:$24 sps:$4 sm:$0xff]  }
 0x1ae   :  { %2741 = vmatprep.subr.bf16.mxu1 %v8774_v30  ;;  %v10543_v30 = vsub.s32 5, %v10499_v52 }
 0x1b1   :  { %2742 = vmatpush1.bf16.msra.mxu1 %v8772_v32  ;;  %v8877_v32 = vld [vmem:[#allocation4 + $0x100] ss:$24 sps:$4 sm:$0xff]  }
 0x1b2   :  { %2743 = vmatprep.subr.bf16.mxu1 %v8780_v33  ;;  %v8882_v33 = vld [vmem:[#allocation4 + $0x134] ss:$24 sps:$4 sm:$0xff]  }
 0x1b5   :  { %2744 = vmatpush1.bf16.msra.mxu1 %v8778_v35 }
 0x1b6   :  { %2745 = vmatprep.subr.bf16.mxu1 %v8786_v36  ;;  %v231_v36 = vrot.slane %v10504_v40, %v10543_v30  ;;  %v8888_v40 = vld [vmem:[#allocation4 + $0x194] ss:$24 sps:$4 sm:$0xff]  }
 0x1b9   :  { %2746 = vmatpush1.bf16.msra.mxu1 %v8784_v38 }
 0x1ba   :  { %2747 = vmatprep.subr.bf16.mxu1 %v8792_v39 }
 0x1bd   :  { %2748 = vmatpush1.bf16.msra.mxu1 %v8790_v42 }
 0x1be   :  { %2749 = vmatprep.subr.bf16.mxu1 %v8798_v43  ;;  %v8880_v43 = vld [vmem:[#allocation4 + $0x130] ss:$24 sps:$4 sm:$0xff]  }
 0x1bf   :  { %v805_v48 = vpop.f32.mrb[4].mxu1 }
 0x1c0   :  { %v806_v13 = vadd.f32 %v805_v48, %v219_v45  ;;  %v807_v50 = vpop.f32.mrb[5].mxu1 }
 0x1c1   :  { %v809_v51 = vpop.f32.mrb[6].mxu1  ;;  %2750 = vmatpush1.bf16.msra.mxu1 %v8796_v46  ;;  %v808_v58 = vadd.f32 %v807_v50, %v223_v49  ;;  %v8883_v50 = vld [vmem:[#allocation4 + $0x160] ss:$24 sps:$4 sm:$0xff]  }
 0x1c2   :  { %v810_v55 = vadd.f32 %v809_v51, %v219_v45  ;;  %v811_v37 = vpop.f32.mrb[7].mxu1  ;;  %2751 = vmatprep.subr.bf16.mxu1 %v8804_v34  ;;  %v8885_v45 = vld [vmem:[#allocation4 + $0x164] ss:$24 sps:$4 sm:$0xff]  }
 0x1c3   :  { %v812_v59 = vadd.f32 %v811_v37, %v223_v49  ;;  %v8979_v51 = vld [vmem:[#allocation9] ss:$24 sps:$4 sm:$0xff]   ;;  %v8987_v37 = vld [vmem:[#allocation9 + $0x34] ss:$24 sps:$4 sm:$0xff]  }
 0x1c4   :  { %v10531_v60 = vpack.c.bf16 %v810_v55, %v806_v13  ;;  %v8985_v55 = vld [vmem:[#allocation9 + $0x30] ss:$24 sps:$4 sm:$0xff]  }
 0x1c5   :  { %v10533_v61 = vpack.c.bf16 %v812_v59, %v808_v58  ;;  %2752 = vmatpush1.bf16.msra.mxu1 %v8802_v53  ;;  %v8981_v53 = vld [vmem:[#allocation9 + $0x4] ss:$24 sps:$4 sm:$0xff]  }
 0x1c6   :  { %2753 = vmatprep.subr.bf16.mxu1 %v8810_v54  ;;  %5068 = vmatprep.subr.bf16.mxu0 %v8981_v53  ;;  %v8886_v54 = vld [vmem:[#allocation4 + $0x190] ss:$24 sps:$4 sm:$0xff]   ;;  %v8891_v58 = vld [vmem:[#allocation4 + $0x1c4] ss:$24 sps:$4 sm:$0xff]   ;;  %v8889_v59 = vld [vmem:[#allocation4 + $0x1c0] ss:$24 sps:$4 sm:$0xff]  }
 0x1c7   :  { %5069 = vmatpush1.bf16.msra.mxu0 %v8979_v51  ;;  %v8924_v51 = vld [vmem:[#allocation4 + $0x3d4] ss:$24 sps:$4 sm:$0xff]   ;;  %v8922_v53 = vld [vmem:[#allocation4 + $0x3d0] ss:$24 sps:$4 sm:$0xff]  }
 0x1c8   :  { %5070 = vmatprep.subr.bf16.mxu0 %v8987_v37  ;;  %v10559_v37 = vld [vmem:[#allocation6] sm:$0x3f] }
 0x1c9   :  { %2754 = vmatpush1.bf16.msra.mxu1 %v8808_v62  ;;  %v8991_v62 = vld [vmem:[#allocation9 + $0x60] ss:$24 sps:$4 sm:$0xff]  }
 0x1ca   :  { %2755 = vmatprep.subr.bf16.mxu1 %v8816_v63  ;;  %v8993_v63 = vld [vmem:[#allocation9 + $0x64] ss:$24 sps:$4 sm:$0xff]  }
 0x1cb   :  { %5071 = vmatpush1.bf16.msra.mxu0 %v8985_v55  ;;  %v8927_v55 = vld [vmem:[#allocation4 + $0x404] ss:$24 sps:$4 sm:$0xff]  }
 0x1cc   :  { %5072 = vmatprep.subr.bf16.mxu0 %v8993_v63  ;;  %v1164_v63 = vrot.slane %v10559_v37, %v10522_v41 }
 0x1cd   :  { %2756 = vmatpush1.bf16.msra.mxu1 %v8814_v0  ;;  %v8894_v0 = vld [vmem:[#allocation4 + $0x1f4] ss:$24 sps:$4 sm:$0xff]  }
 0x1ce   :  { %2757 = vmatprep.subr.bf16.mxu1 %v8822_v1  ;;  %v8892_v1 = vld [vmem:[#allocation4 + $0x1f0] ss:$24 sps:$4 sm:$0xff]  }
 0x1cf   :  { %5073 = vmatpush1.bf16.msra.mxu0 %v8991_v62  ;;  %v8930_v62 = vld [vmem:[#allocation4 + $0x434] ss:$24 sps:$4 sm:$0xff]  }
 0x1d1   :  { %2758 = vmatpush1.bf16.msra.mxu1 %v8820_v2  ;;  %v8997_v2 = vld [vmem:[#allocation9 + $0x90] ss:$24 sps:$4 sm:$0xff]  }
 0x1d2   :  { %2759 = vmatprep.subr.bf16.mxu1 %v8828_v3  ;;  %v8999_v3 = vld [vmem:[#allocation9 + $0x94] ss:$24 sps:$4 sm:$0xff]  }
 0x1d3   :  { %5074 = vmatprep.subr.bf16.mxu0 %v8999_v3 }
 0x1d4   :  { %5075 = vmatpush1.bf16.msra.mxu0 %v8997_v2  ;;  %v8928_v2 = vld [vmem:[#allocation4 + $0x430] ss:$24 sps:$4 sm:$0xff]  }
 0x1d5   :  { %2760 = vmatpush1.bf16.msra.mxu1 %v8826_v4  ;;  %v8897_v4 = vld [vmem:[#allocation4 + $0x224] ss:$24 sps:$4 sm:$0xff]  }
 0x1d6   :  { %2761 = vmatprep.subr.bf16.mxu1 %v8834_v5  ;;  %v8895_v5 = vld [vmem:[#allocation4 + $0x220] ss:$24 sps:$4 sm:$0xff]  }
 0x1d9   :  { %2762 = vmatpush1.bf16.msra.mxu1 %v8832_v6  ;;  %v9003_v6 = vld [vmem:[#allocation9 + $0xc0] ss:$24 sps:$4 sm:$0xff]  }
 0x1da   :  { %2763 = vmatprep.subr.bf16.mxu1 %v8840_v7  ;;  %v9005_v7 = vld [vmem:[#allocation9 + $0xc4] ss:$24 sps:$4 sm:$0xff]  }
 0x1db   :  { %5076 = vmatprep.subr.bf16.mxu0 %v9005_v7 }
 0x1dc   :  { %5077 = vmatpush1.bf16.msra.mxu0 %v9003_v6 }
 0x1dd   :  { %2764 = vmatpush1.bf16.msra.mxu1 %v8838_v10  ;;  %v8900_v10 = vld [vmem:[#allocation4 + $0x254] ss:$24 sps:$4 sm:$0xff]  }
 0x1de   :  { %2765 = vmatprep.subr.bf16.mxu1 %v8846_v11  ;;  %v8898_v11 = vld [vmem:[#allocation4 + $0x250] ss:$24 sps:$4 sm:$0xff]  }
 0x1e1   :  { %2766 = vmatpush1.bf16.msra.mxu1 %v8844_v12  ;;  %v9009_v12 = vld [vmem:[#allocation9 + $0xf0] ss:$24 sps:$4 sm:$0xff]  }
 0x1e2   :  { %2767 = vmatprep.subr.bf16.mxu1 %v8852_v14  ;;  %v9011_v14 = vld [vmem:[#allocation9 + $0xf4] ss:$24 sps:$4 sm:$0xff]  }
 0x1e3   :  { %5078 = vmatprep.subr.bf16.mxu0 %v9011_v14 }
 0x1e4   :  { %5079 = vmatpush1.bf16.msra.mxu0 %v9009_v12 }
 0x1e5   :  { %2768 = vmatpush1.bf16.msra.mxu1 %v8850_v15  ;;  %v8903_v15 = vld [vmem:[#allocation4 + $0x284] ss:$24 sps:$4 sm:$0xff]  }
 0x1e6   :  { %2769 = vmatprep.subr.bf16.mxu1 %v8858_v16  ;;  %v8901_v16 = vld [vmem:[#allocation4 + $0x280] ss:$24 sps:$4 sm:$0xff]  }
 0x1e9   :  { %2770 = vmatpush1.bf16.msra.mxu1 %v8856_v17  ;;  %v9015_v17 = vld [vmem:[#allocation9 + $0x120] ss:$24 sps:$4 sm:$0xff]  }
 0x1ea   :  { %2911 = vmatprep.subr.bf16.mxu1 %v8864_v18  ;;  %v9017_v18 = vld [vmem:[#allocation9 + $0x124] ss:$24 sps:$4 sm:$0xff]  }
 0x1eb   :  { %5080 = vmatprep.subr.bf16.mxu0 %v9017_v18  ;;  %v9077_v18 = vld [vmem:[#allocation9 + $0x304] ss:$24 sps:$4 sm:$0xff]  }
 0x1ec   :  { %2772 = vmatmul.mubr.bf16.vlgmr.msra.gmra.mrb[12].mxu1 %v10492_v47  ;;  %v8874_v47 = vld [vmem:[#allocation4 + $0xd0] ss:$24 sps:$4 sm:$0xff]   ;;  %5081 = vmatpush1.bf16.msra.mxu0 %v9015_v17 }
 0x1ed   :  { %2912 = vmatpush1.bf16.msra.mxu1 %v8862_v19  ;;  %2943 = vmatprep.mubr.bf16.mxu1 %v9873_v23  ;;  %v8906_v19 = vld [vmem:[#allocation4 + $0x2b4] ss:$24 sps:$4 sm:$0xff]   ;;  %v8909_v23 = vld [vmem:[#allocation4 + $0x2e4] ss:$24 sps:$4 sm:$0xff]  }
 0x1ee   :  { %2913 = vmatprep.subr.bf16.mxu1 %v8867_v20  ;;  %v8904_v20 = vld [vmem:[#allocation4 + $0x2b0] ss:$24 sps:$4 sm:$0xff]  }
 0x1f1   :  { %2914 = vmatpush1.bf16.msra.mxu1 %v8865_v21  ;;  %v9021_v21 = vld [vmem:[#allocation9 + $0x150] ss:$24 sps:$4 sm:$0xff]  }
 0x1f2   :  { %2915 = vmatprep.subr.bf16.mxu1 %v8870_v22  ;;  %v9023_v22 = vld [vmem:[#allocation9 + $0x154] ss:$24 sps:$4 sm:$0xff]  }
 0x1f3   :  { %5082 = vmatprep.subr.bf16.mxu0 %v9023_v22  ;;  %v8934_v22 = vld [vmem:[#allocation4 + $0x490] ss:$24 sps:$4 sm:$0xff]  }
 0x1f4   :  { %5083 = vmatpush1.bf16.msra.mxu0 %v9021_v21 }
 0x1f5   :  { %2916 = vmatpush1.bf16.msra.mxu1 %v8868_v24  ;;  %v8907_v24 = vld [vmem:[#allocation4 + $0x2e0] ss:$24 sps:$4 sm:$0xff]  }
 0x1f6   :  { %2917 = vmatprep.subr.bf16.mxu1 %v8873_v25  ;;  %v9027_v25 = vld [vmem:[#allocation9 + $0x180] ss:$24 sps:$4 sm:$0xff]  }
 0x1f9   :  { %2918 = vmatpush1.bf16.msra.mxu1 %v8871_v26  ;;  %v9029_v26 = vld [vmem:[#allocation9 + $0x184] ss:$24 sps:$4 sm:$0xff]  }
 0x1fa   :  { %2919 = vmatprep.subr.bf16.mxu1 %v8876_v27  ;;  %v8912_v27 = vld [vmem:[#allocation4 + $0x314] ss:$24 sps:$4 sm:$0xff]   ;;  %5084 = vmatprep.subr.bf16.mxu0 %v9029_v26  ;;  %v8940_v26 = vld [vmem:[#allocation4 + $0x4f0] ss:$24 sps:$4 sm:$0xff]  }
 0x1fb   :  { %5085 = vmatpush1.bf16.msra.mxu0 %v9027_v25  ;;  %v8942_v25 = vld [vmem:[#allocation4 + $0x4f4] ss:$24 sps:$4 sm:$0xff]  }
 0x1fd   :  { %2920 = vmatpush1.bf16.msra.mxu1 %v8874_v47  ;;  %v8910_v47 = vld [vmem:[#allocation4 + $0x310] ss:$24 sps:$4 sm:$0xff]  }
 0x1fe   :  { %2921 = vmatprep.subr.bf16.mxu1 %v8879_v29  ;;  %v9033_v29 = vld [vmem:[#allocation9 + $0x1b0] ss:$24 sps:$4 sm:$0xff]  }
 0x1ff   :  { %v848_v35 = vpop.f32.mrb[8].mxu1 }
 0x200   :  { %v849_v38 = vadd.f32 %v848_v35, %v227_v31  ;;  %v850_v39 = vpop.f32.mrb[9].mxu1  ;;  %v8913_v35 = vld [vmem:[#allocation4 + $0x340] ss:$24 sps:$4 sm:$0xff]  }
 0x201   :  { %v852_v42 = vpop.f32.mrb[10].mxu1  ;;  %2922 = vmatpush1.bf16.msra.mxu1 %v8877_v32  ;;  %v851_v34 = vadd.f32 %v850_v39, %v231_v36  ;;  %v8915_v32 = vld [vmem:[#allocation4 + $0x344] ss:$24 sps:$4 sm:$0xff]  }
 0x202   :  { %v853_v46 = vadd.f32 %v852_v42, %v227_v31  ;;  %v854_v52 = vpop.f32.mrb[11].mxu1  ;;  %2923 = vmatprep.subr.bf16.mxu1 %v8882_v33  ;;  %v9035_v31 = vld [vmem:[#allocation9 + $0x1b4] ss:$24 sps:$4 sm:$0xff]   ;;  %v9041_v39 = vld [vmem:[#allocation9 + $0x1e4] ss:$24 sps:$4 sm:$0xff]  }
 0x203   :  { %v855_v48 = vadd.f32 %v854_v52, %v231_v36  ;;  %5086 = vmatprep.subr.bf16.mxu0 %v9035_v31  ;;  %v9874_v33 = vld [vmem:[%s10683_s3] ss:$24 sps:$4 sm:$0xff]   ;;  %v9875_v36 = vld [vmem:[%s10683_s3 + $0xc] ss:$24 sps:$4 sm:$0xff]  }
 0x204   :  { %v10549_v49 = vpack.c.bf16 %v853_v46, %v849_v38  ;;  %5087 = vmatpush1.bf16.msra.mxu0 %v9033_v29  ;;  %v9039_v38 = vld [vmem:[#allocation9 + $0x1e0] ss:$24 sps:$4 sm:$0xff]   ;;  %v8918_v42 = vld [vmem:[#allocation4 + $0x374] ss:$24 sps:$4 sm:$0xff]  }
 0x205   :  { %v10551_v13 = vpack.c.bf16 %v855_v48, %v851_v34  ;;  %2924 = vmatpush1.bf16.msra.mxu1 %v8880_v43  ;;  %5088 = vmatprep.subr.bf16.mxu0 %v9041_v39  ;;  %v8916_v43 = vld [vmem:[#allocation4 + $0x370] ss:$24 sps:$4 sm:$0xff]   ;;  %v8921_v52 = vld [vmem:[#allocation4 + $0x3a4] ss:$24 sps:$4 sm:$0xff]   ;;  %v8919_v34 = vld [vmem:[#allocation4 + $0x3a0] ss:$24 sps:$4 sm:$0xff]  }
 0x206   :  { %2925 = vmatprep.subr.bf16.mxu1 %v8885_v45  ;;  %v9045_v45 = vld [vmem:[#allocation9 + $0x210] ss:$24 sps:$4 sm:$0xff]   ;;  %v9047_v46 = vld [vmem:[#allocation9 + $0x214] ss:$24 sps:$4 sm:$0xff]   ;;  %v9051_v48 = vld [vmem:[#allocation9 + $0x240] ss:$24 sps:$4 sm:$0xff]  }
 0x207   :  { %v8948_v29 = vld [vmem:[#allocation4 + $0x554] ss:$24 sps:$4 sm:$0xff]   ;;  %v8946_v31 = vld [vmem:[#allocation4 + $0x550] ss:$24 sps:$4 sm:$0xff]   ;;  %v8955_v39 = vld [vmem:[#allocation4 + $0x5e0] ss:$24 sps:$4 sm:$0xff]  }
 0x208   :  { %5089 = vmatpush1.bf16.msra.mxu0 %v9039_v38  ;;  %v8957_v38 = vld [vmem:[#allocation4 + $0x5e4] ss:$24 sps:$4 sm:$0xff]  }
 0x209   :  { %2926 = vmatpush1.bf16.msra.mxu1 %v8883_v50  ;;  %5090 = vmatprep.subr.bf16.mxu0 %v9047_v46  ;;  %v9053_v50 = vld [vmem:[#allocation9 + $0x244] ss:$24 sps:$4 sm:$0xff]  }
 0x20a   :  { %2927 = vmatprep.subr.bf16.mxu1 %v8888_v40  ;;  %v9057_v40 = vld [vmem:[#allocation9 + $0x270] ss:$24 sps:$4 sm:$0xff]   ;;  %v9876_v46 = vld [vmem:[%s10683_s3 + $0x8] ss:$24 sps:$4 sm:$0xff]  }
 0x20c   :  { %5091 = vmatpush1.bf16.msra.mxu0 %v9045_v45  ;;  %v8963_v45 = vld [vmem:[#allocation4 + $0x644] ss:$24 sps:$4 sm:$0xff]  }
 0x20d   :  { %2928 = vmatpush1.bf16.msra.mxu1 %v8886_v54  ;;  %5092 = vmatprep.subr.bf16.mxu0 %v9053_v50  ;;  %v9059_v54 = vld [vmem:[#allocation9 + $0x274] ss:$24 sps:$4 sm:$0xff]  }
 0x20e   :  { %2929 = vmatprep.subr.bf16.mxu1 %v8891_v58  ;;  %v8925_v58 = vld [vmem:[#allocation4 + $0x400] ss:$24 sps:$4 sm:$0xff]   ;;  %v8964_v50 = vld [vmem:[#allocation4 + $0x670] ss:$24 sps:$4 sm:$0xff]  }
 0x210   :  { %5093 = vmatpush1.bf16.msra.mxu0 %v9051_v48  ;;  %v8966_v48 = vld [vmem:[#allocation4 + $0x674] ss:$24 sps:$4 sm:$0xff]  }
 0x211   :  { %2930 = vmatpush1.bf16.msra.mxu1 %v8889_v59  ;;  %5094 = vmatprep.subr.bf16.mxu0 %v9059_v54  ;;  %v9065_v59 = vld [vmem:[#allocation9 + $0x2a4] ss:$24 sps:$4 sm:$0xff]  }
 0x212   :  { %2931 = vmatprep.subr.bf16.mxu1 %v8894_v0  ;;  %v9063_v0 = vld [vmem:[#allocation9 + $0x2a0] ss:$24 sps:$4 sm:$0xff]  }
 0x213   :  { %v8970_v54 = vld [vmem:[#allocation4 + $0x6d0] ss:$24 sps:$4 sm:$0xff]  }
 0x214   :  { %5095 = vmatpush1.bf16.msra.mxu0 %v9057_v40  ;;  %v8972_v40 = vld [vmem:[#allocation4 + $0x6d4] ss:$24 sps:$4 sm:$0xff]  }
 0x215   :  { %2932 = vmatpush1.bf16.msra.mxu1 %v8892_v1  ;;  %v1168_v1 = vrot.slane %v10559_v37, %v10525_v44  ;;  %5096 = vmatprep.subr.bf16.mxu0 %v9065_v59  ;;  %v8978_v59 = vld [vmem:[#allocation4 + $0x734] ss:$24 sps:$4 sm:$0xff]  }
 0x216   :  { %2933 = vmatprep.subr.bf16.mxu1 %v8897_v4  ;;  %v9071_v4 = vld [vmem:[#allocation9 + $0x2d4] ss:$24 sps:$4 sm:$0xff]  }
 0x218   :  { %5097 = vmatpush1.bf16.msra.mxu0 %v9063_v0  ;;  %v8982_v0 = vld [vmem:[#allocation4 + $0x760] ss:$24 sps:$4 sm:$0xff]  }
 0x219   :  { %2934 = vmatpush1.bf16.msra.mxu1 %v8895_v5  ;;  %v8933_v5 = vld [vmem:[#allocation4 + $0x464] ss:$24 sps:$4 sm:$0xff]   ;;  %5098 = vmatprep.subr.bf16.mxu0 %v9071_v4  ;;  %v8994_v4 = vld [vmem:[#allocation4 + $0x7c0] ss:$24 sps:$4 sm:$0xff]  }
 0x21a   :  { %2935 = vmatprep.subr.bf16.mxu1 %v8900_v10  ;;  %v9069_v10 = vld [vmem:[#allocation9 + $0x2d0] ss:$24 sps:$4 sm:$0xff]  }
 0x21c   :  { %5099 = vmatpush1.bf16.msra.mxu0 %v9069_v10  ;;  %v9006_v10 = vld [vmem:[#allocation4 + $0x820] ss:$24 sps:$4 sm:$0xff]  }
 0x21d   :  { %2936 = vmatpush1.bf16.msra.mxu1 %v8898_v11  ;;  %5111 = vmatprep.subr.bf16.mxu0 %v9077_v18  ;;  %v9032_v18 = vld [vmem:[#allocation4 + $0x8e4] ss:$24 sps:$4 sm:$0xff]  }
 0x21e   :  { %2937 = vmatprep.subr.bf16.mxu1 %v8903_v15 }
 0x221   :  { %2938 = vmatpush1.bf16.msra.mxu1 %v8901_v16  ;;  %v8931_v16 = vld [vmem:[#allocation4 + $0x460] ss:$24 sps:$4 sm:$0xff]  }
 0x222   :  { %2939 = vmatprep.subr.bf16.mxu1 %v8906_v19  ;;  %v8936_v19 = vld [vmem:[#allocation4 + $0x494] ss:$24 sps:$4 sm:$0xff]  }
 0x225   :  { %2940 = vmatpush1.bf16.msra.mxu1 %v8904_v20 }
 0x226   :  { %2941 = vmatprep.subr.bf16.mxu1 %v8909_v23  ;;  %v8939_v23 = vld [vmem:[#allocation4 + $0x4c4] ss:$24 sps:$4 sm:$0xff]  }
 0x229   :  { %2942 = vmatpush1.bf16.msra.mxu1 %v8907_v24  ;;  %v8937_v24 = vld [vmem:[#allocation4 + $0x4c0] ss:$24 sps:$4 sm:$0xff]  }
 0x22a   :  { %2954 = vmatprep.subr.bf16.mxu1 %v8912_v27  ;;  %v8945_v27 = vld [vmem:[#allocation4 + $0x524] ss:$24 sps:$4 sm:$0xff]  }
 0x22c   :  { %2944 = vmatmul.mubr.bf16.vlgmr.msra.gmra.mrb[16].mxu1 %v9874_v33  ;;  %v8949_v33 = vld [vmem:[#allocation4 + $0x580] ss:$24 sps:$4 sm:$0xff]  }
 0x22d   :  { %2955 = vmatpush1.bf16.msra.mxu1 %v8910_v47  ;;  %2986 = vmatprep.mubr.bf16.mxu1 %v9875_v36  ;;  %v8943_v47 = vld [vmem:[#allocation4 + $0x520] ss:$24 sps:$4 sm:$0xff]   ;;  %v8952_v36 = vld [vmem:[#allocation4 + $0x5b0] ss:$24 sps:$4 sm:$0xff]  }
 0x22e   :  { %2956 = vmatprep.subr.bf16.mxu1 %v8915_v32  ;;  %v8951_v32 = vld [vmem:[#allocation4 + $0x584] ss:$24 sps:$4 sm:$0xff]  }
 0x231   :  { %2957 = vmatpush1.bf16.msra.mxu1 %v8913_v35  ;;  %v8954_v35 = vld [vmem:[#allocation4 + $0x5b4] ss:$24 sps:$4 sm:$0xff]  }
 0x232   :  { %2958 = vmatprep.subr.bf16.mxu1 %v8918_v42  ;;  %v8960_v42 = vld [vmem:[#allocation4 + $0x614] ss:$24 sps:$4 sm:$0xff]  }
 0x235   :  { %2959 = vmatpush1.bf16.msra.mxu1 %v8916_v43  ;;  %v2902_v3 = vpop.f32.mrb[0].mxu0  ;;  %v8958_v43 = vld [vmem:[#allocation4 + $0x610] ss:$24 sps:$4 sm:$0xff]  }
 0x236   :  { %2960 = vmatprep.subr.bf16.mxu1 %v8921_v52  ;;  %v8318_v6 = vadd.f32 %v2902_v3, %v1164_v63  ;;  %v2904_v7 = vpop.f32.mrb[1].mxu0  ;;  %v8961_v52 = vld [vmem:[#allocation4 + $0x640] ss:$24 sps:$4 sm:$0xff]   ;;  %v8996_v3 = vld [vmem:[#allocation4 + $0x7c4] ss:$24 sps:$4 sm:$0xff]  }
 0x237   :  { %v8319_v11 = vadd.f32 %v2904_v7, %v1168_v1  ;;  %v2906_v12 = vpop.f32.mrb[2].mxu0  ;;  %v9008_v7 = vld [vmem:[#allocation4 + $0x824] ss:$24 sps:$4 sm:$0xff]  }
 0x238   :  { %v8320_v14 = vadd.f32 %v2906_v12, %v1164_v63  ;;  %v2908_v15 = vpop.f32.mrb[3].mxu0  ;;  %v8984_v63 = vld [vmem:[#allocation4 + $0x764] ss:$24 sps:$4 sm:$0xff]   ;;  %v9012_v12 = vld [vmem:[#allocation4 + $0x850] ss:$24 sps:$4 sm:$0xff]  }
 0x239   :  { %2961 = vmatpush1.bf16.msra.mxu1 %v8919_v34  ;;  %v8321_v17 = vadd.f32 %v2908_v15, %v1168_v1  ;;  %v9877_v34 = vld [vmem:[%s10683_s3 + $0x14] ss:$24 sps:$4 sm:$0xff]   ;;  %v9018_v15 = vld [vmem:[#allocation4 + $0x880] ss:$24 sps:$4 sm:$0xff]  }
 0x23a   :  { %2962 = vmatprep.subr.bf16.mxu1 %v8924_v51  ;;  %v10565_v20 = vpack.c.bf16 %v8320_v14, %v8318_v6  ;;  %v8969_v51 = vld [vmem:[#allocation4 + $0x6a4] ss:$24 sps:$4 sm:$0xff]   ;;  %v8990_v1 = vld [vmem:[#allocation4 + $0x794] ss:$24 sps:$4 sm:$0xff]   ;;  %v9000_v6 = vld [vmem:[#allocation4 + $0x7f0] ss:$24 sps:$4 sm:$0xff]  }
 0x23b   :  { %v10567_v21 = vpack.c.bf16 %v8321_v17, %v8319_v11  ;;  %v9014_v11 = vld [vmem:[#allocation4 + $0x854] ss:$24 sps:$4 sm:$0xff]   ;;  %v9020_v14 = vld [vmem:[#allocation4 + $0x884] ss:$24 sps:$4 sm:$0xff]   ;;  %v9024_v17 = vld [vmem:[#allocation4 + $0x8b0] ss:$24 sps:$4 sm:$0xff]  }
 0x23d   :  { %2963 = vmatpush1.bf16.msra.mxu1 %v8922_v53  ;;  %v8967_v53 = vld [vmem:[#allocation4 + $0x6a0] ss:$24 sps:$4 sm:$0xff]  }
 0x23e   :  { %2964 = vmatprep.subr.bf16.mxu1 %v8927_v55  ;;  %v8975_v55 = vld [vmem:[#allocation4 + $0x704] ss:$24 sps:$4 sm:$0xff]  }
 0x241   :  { %2965 = vmatpush1.bf16.msra.mxu1 %v8925_v58  ;;  %v8973_v58 = vld [vmem:[#allocation4 + $0x700] ss:$24 sps:$4 sm:$0xff]  }
 0x242   :  { %2966 = vmatprep.subr.bf16.mxu1 %v8930_v62  ;;  %v8976_v62 = vld [vmem:[#allocation4 + $0x730] ss:$24 sps:$4 sm:$0xff]  }
 0x245   :  { %2967 = vmatpush1.bf16.msra.mxu1 %v8928_v2  ;;  %v8988_v2 = vld [vmem:[#allocation4 + $0x790] ss:$24 sps:$4 sm:$0xff]  }
 0x246   :  { %2968 = vmatprep.subr.bf16.mxu1 %v8933_v5  ;;  %v9002_v5 = vld [vmem:[#allocation4 + $0x7f4] ss:$24 sps:$4 sm:$0xff]  }
 0x249   :  { %2969 = vmatpush1.bf16.msra.mxu1 %v8931_v16  ;;  %v9026_v16 = vld [vmem:[#allocation4 + $0x8b4] ss:$24 sps:$4 sm:$0xff]  }
 0x24a   :  { %2970 = vmatprep.subr.bf16.mxu1 %v8936_v19  ;;  %v9030_v19 = vld [vmem:[#allocation4 + $0x8e0] ss:$24 sps:$4 sm:$0xff]  }
 0x24d   :  { %2971 = vmatpush1.bf16.msra.mxu1 %v8934_v22  ;;  %v9038_v22 = vld [vmem:[#allocation9 + $0xc] ss:$24 sps:$4 sm:$0xff]  }
 0x24e   :  { %2972 = vmatprep.subr.bf16.mxu1 %v8939_v23  ;;  %v9036_v23 = vld [vmem:[#allocation9 + $0x8] ss:$24 sps:$4 sm:$0xff]  }
 0x251   :  { %2973 = vmatpush1.bf16.msra.mxu1 %v8937_v24  ;;  %v9044_v24 = vld [vmem:[#allocation9 + $0x3c] ss:$24 sps:$4 sm:$0xff]  }
 0x252   :  { %2974 = vmatprep.subr.bf16.mxu1 %v8942_v25  ;;  %v9878_v25 = vld [vmem:[%s10683_s3 + $0x10] ss:$24 sps:$4 sm:$0xff]  }
 0x255   :  { %2975 = vmatpush1.bf16.msra.mxu1 %v8940_v26  ;;  %v9042_v26 = vld [vmem:[#allocation9 + $0x38] ss:$24 sps:$4 sm:$0xff]  }
 0x256   :  { %2976 = vmatprep.subr.bf16.mxu1 %v8945_v27  ;;  %v9050_v27 = vld [vmem:[#allocation9 + $0x6c] ss:$24 sps:$4 sm:$0xff]  }
 0x259   :  { %2977 = vmatpush1.bf16.msra.mxu1 %v8943_v47  ;;  %v9048_v47 = vld [vmem:[#allocation9 + $0x68] ss:$24 sps:$4 sm:$0xff]  }
 0x25a   :  { %2978 = vmatprep.subr.bf16.mxu1 %v8948_v29  ;;  %v9056_v29 = vld [vmem:[#allocation9 + $0x9c] ss:$24 sps:$4 sm:$0xff]  }
 0x25d   :  { %2979 = vmatpush1.bf16.msra.mxu1 %v8946_v31  ;;  %v9054_v31 = vld [vmem:[#allocation9 + $0x98] ss:$24 sps:$4 sm:$0xff]  }
 0x25e   :  { %2980 = vmatprep.subr.bf16.mxu1 %v8951_v32  ;;  %v9062_v32 = vld [vmem:[#allocation9 + $0xcc] ss:$24 sps:$4 sm:$0xff]  }
 0x261   :  { %2981 = vmatpush1.bf16.msra.mxu1 %v8949_v33  ;;  %v9060_v33 = vld [vmem:[#allocation9 + $0xc8] ss:$24 sps:$4 sm:$0xff]  }
 0x262   :  { %2982 = vmatprep.subr.bf16.mxu1 %v8954_v35  ;;  %v9068_v35 = vld [vmem:[#allocation9 + $0xfc] ss:$24 sps:$4 sm:$0xff]  }
 0x265   :  { %2983 = vmatpush1.bf16.msra.mxu1 %v8952_v36  ;;  %v9066_v36 = vld [vmem:[#allocation9 + $0xf8] ss:$24 sps:$4 sm:$0xff]  }
 0x266   :  { %2984 = vmatprep.subr.bf16.mxu1 %v8957_v38  ;;  %v1156_v38 = vrot.slane %v10559_v37, %v10502_v56 }
 0x269   :  { %2985 = vmatpush1.bf16.msra.mxu1 %v8955_v39  ;;  %v9074_v39 = vld [vmem:[#allocation9 + $0x12c] ss:$24 sps:$4 sm:$0xff]  }
 0x26a   :  { %2997 = vmatprep.subr.bf16.mxu1 %v8960_v42 }
 0x26c   :  { %2987 = vmatmul.mubr.bf16.vlgmr.msra.gmra.mrb[16].mxu1 %v9876_v46 }
 0x26d   :  { %2998 = vmatpush1.bf16.msra.mxu1 %v8958_v43  ;;  %3029 = vmatprep.mubr.bf16.mxu1 %v9877_v34  ;;  %v1160_v43 = vrot.slane %v10559_v37, %v10507_v57 }
 0x26e   :  { %2999 = vmatprep.subr.bf16.mxu1 %v8963_v45 }
 0x271   :  { %3000 = vmatpush1.bf16.msra.mxu1 %v8961_v52  ;;  %v9072_v52 = vld [vmem:[#allocation9 + $0x128] ss:$24 sps:$4 sm:$0xff]  }
 0x272   :  { %3001 = vmatprep.subr.bf16.mxu1 %v8966_v48 }
 0x275   :  { %3002 = vmatpush1.bf16.msra.mxu1 %v8964_v50 }
 0x276   :  { %3003 = vmatprep.subr.bf16.mxu1 %v8969_v51  ;;  %v9080_v51 = vld [vmem:[#allocation9 + $0x15c] ss:$24 sps:$4 sm:$0xff]  }
 0x279   :  { %3004 = vmatpush1.bf16.msra.mxu1 %v8967_v53 }
 0x27a   :  { %3005 = vmatprep.subr.bf16.mxu1 %v8972_v40 }
 0x27d   :  { %3006 = vmatpush1.bf16.msra.mxu1 %v8970_v54 }
 0x27e   :  { %3007 = vmatprep.subr.bf16.mxu1 %v8975_v55 }
 0x281   :  { %3008 = vmatpush1.bf16.msra.mxu1 %v8973_v58  ;;  %v9075_v58 = vld [vmem:[#allocation9 + $0x300] ss:$24 sps:$4 sm:$0xff]  }
 0x282   :  { %3009 = vmatprep.subr.bf16.mxu1 %v8978_v59  ;;  %v9078_v59 = vld [vmem:[#allocation9 + $0x158] ss:$24 sps:$4 sm:$0xff]  }
 0x285   :  { %3010 = vmatpush1.bf16.msra.mxu1 %v8976_v62  ;;  %v9083_v62 = vld [vmem:[#allocation9 + $0x334] ss:$24 sps:$4 sm:$0xff]  }
 0x286   :  { %3011 = vmatprep.subr.bf16.mxu1 %v8984_v63  ;;  %v9086_v63 = vld [vmem:[#allocation9 + $0x18c] ss:$24 sps:$4 sm:$0xff]  }
 0x289   :  { %3012 = vmatpush1.bf16.msra.mxu1 %v8982_v0  ;;  %v9081_v0 = vld [vmem:[#allocation9 + $0x330] ss:$24 sps:$4 sm:$0xff]  }
 0x28a   :  { %3013 = vmatprep.subr.bf16.mxu1 %v8990_v1  ;;  %v9084_v1 = vld [vmem:[#allocation9 + $0x188] ss:$24 sps:$4 sm:$0xff]  }
 0x28d   :  { %3014 = vmatpush1.bf16.msra.mxu1 %v8988_v2  ;;  %v9089_v2 = vld [vmem:[#allocation9 + $0x364] ss:$24 sps:$4 sm:$0xff]  }
 0x28e   :  { %3015 = vmatprep.subr.bf16.mxu1 %v8996_v3  ;;  %v9092_v3 = vld [vmem:[#allocation9 + $0x1bc] ss:$24 sps:$4 sm:$0xff]  }
 0x291   :  { %3016 = vmatpush1.bf16.msra.mxu1 %v8994_v4  ;;  %v9087_v4 = vld [vmem:[#allocation9 + $0x360] ss:$24 sps:$4 sm:$0xff]  }
 0x292   :  { %3017 = vmatprep.subr.bf16.mxu1 %v9002_v5  ;;  %v9090_v5 = vld [vmem:[#allocation9 + $0x1b8] ss:$24 sps:$4 sm:$0xff]  }
 0x295   :  { %3018 = vmatpush1.bf16.msra.mxu1 %v9000_v6  ;;  %v9095_v6 = vld [vmem:[#allocation9 + $0x394] ss:$24 sps:$4 sm:$0xff]  }
 0x296   :  { %3019 = vmatprep.subr.bf16.mxu1 %v9008_v7  ;;  %v9098_v7 = vld [vmem:[#allocation9 + $0x1ec] ss:$24 sps:$4 sm:$0xff]  }
 0x299   :  { %3020 = vmatpush1.bf16.msra.mxu1 %v9006_v10  ;;  %v9093_v10 = vld [vmem:[#allocation9 + $0x390] ss:$24 sps:$4 sm:$0xff]  }
 0x29a   :  { %3021 = vmatprep.subr.bf16.mxu1 %v9014_v11  ;;  %v9096_v11 = vld [vmem:[#allocation9 + $0x1e8] ss:$24 sps:$4 sm:$0xff]  }
 0x29d   :  { %3022 = vmatpush1.bf16.msra.mxu1 %v9012_v12  ;;  %v9101_v12 = vld [vmem:[#allocation9 + $0x3c4] ss:$24 sps:$4 sm:$0xff]  }
 0x29e   :  { %3023 = vmatprep.subr.bf16.mxu1 %v9020_v14  ;;  %v9104_v14 = vld [vmem:[#allocation9 + $0x21c] ss:$24 sps:$4 sm:$0xff]  }
 0x2a1   :  { %3024 = vmatpush1.bf16.msra.mxu1 %v9018_v15  ;;  %v9099_v15 = vld [vmem:[#allocation9 + $0x3c0] ss:$24 sps:$4 sm:$0xff]  }
 0x2a2   :  { %3025 = vmatprep.subr.bf16.mxu1 %v9026_v16  ;;  %v9102_v16 = vld [vmem:[#allocation9 + $0x218] ss:$24 sps:$4 sm:$0xff]  }
 0x2a5   :  { %3026 = vmatpush1.bf16.msra.mxu1 %v9024_v17  ;;  %v9107_v17 = vld [vmem:[#allocation9 + $0x3f4] ss:$24 sps:$4 sm:$0xff]  }
 0x2a6   :  { %3027 = vmatprep.subr.bf16.mxu1 %v9032_v18  ;;  %v9110_v18 = vld [vmem:[#allocation9 + $0x24c] ss:$24 sps:$4 sm:$0xff]  }
 0x2a9   :  { %3028 = vmatpush1.bf16.msra.mxu1 %v9030_v19  ;;  %v9105_v19 = vld [vmem:[#allocation9 + $0x3f0] ss:$24 sps:$4 sm:$0xff]  }
 0x2aa   :  { %5197 = vmatprep.subr.bf16.mxu1 %v9038_v22  ;;  %v9108_v22 = vld [vmem:[#allocation9 + $0x248] ss:$24 sps:$4 sm:$0xff]  }
 0x2ac   :  { %3030 = vmatmul.mubr.bf16.vlgmr.msra.gmra.mrb[16].mxu1 %v9878_v25  ;;  %v9111_v25 = vld [vmem:[#allocation9 + $0x420] ss:$24 sps:$4 sm:$0xff]  }
 0x2ad   :  { %5198 = vmatpush1.bf16.msra.mxu1 %v9036_v23  ;;  %v9113_v23 = vld [vmem:[#allocation9 + $0x424] ss:$24 sps:$4 sm:$0xff]  }
 0x2ae   :  { %5199 = vmatprep.subr.bf16.mxu1 %v9044_v24  ;;  %v9116_v24 = vld [vmem:[#allocation9 + $0x27c] ss:$24 sps:$4 sm:$0xff]  }
 0x2b1   :  { %5200 = vmatpush1.bf16.msra.mxu1 %v9042_v26  ;;  %v9114_v26 = vld [vmem:[#allocation9 + $0x278] ss:$24 sps:$4 sm:$0xff]  }
 0x2b2   :  { %5201 = vmatprep.subr.bf16.mxu1 %v9050_v27  ;;  %v9119_v27 = vld [vmem:[#allocation9 + $0x454] ss:$24 sps:$4 sm:$0xff]  }
 0x2b5   :  { %5202 = vmatpush1.bf16.msra.mxu1 %v9048_v47  ;;  %v9122_v47 = vld [vmem:[#allocation9 + $0x2ac] ss:$24 sps:$4 sm:$0xff]  }
 0x2b6   :  { %5203 = vmatprep.subr.bf16.mxu1 %v9056_v29  ;;  %v9117_v29 = vld [vmem:[#allocation9 + $0x450] ss:$24 sps:$4 sm:$0xff]  }
 0x2b9   :  { %5204 = vmatpush1.bf16.msra.mxu1 %v9054_v31  ;;  %v9120_v31 = vld [vmem:[#allocation9 + $0x2a8] ss:$24 sps:$4 sm:$0xff]  }
 0x2ba   :  { %5205 = vmatprep.subr.bf16.mxu1 %v9062_v32  ;;  %v9125_v32 = vld [vmem:[#allocation9 + $0x484] ss:$24 sps:$4 sm:$0xff]  }
 0x2bd   :  { %5206 = vmatpush1.bf16.msra.mxu1 %v9060_v33  ;;  %v9128_v33 = vld [vmem:[#allocation9 + $0x2dc] ss:$24 sps:$4 sm:$0xff]  }
 0x2be   :  { %5207 = vmatprep.subr.bf16.mxu1 %v9068_v35  ;;  %v9123_v35 = vld [vmem:[#allocation9 + $0x480] ss:$24 sps:$4 sm:$0xff]  }
 0x2bf   :  { %v2773_v42 = vpop.f32.mrb[12].mxu1 }
 0x2c0   :  { %v2775_v45 = vpop.f32.mrb[13].mxu1  ;;  %v8314_v34 = vadd.f32 %v2773_v42, %v1156_v38  ;;  %v9129_v42 = vld [vmem:[#allocation9 + $0x4b0] ss:$24 sps:$4 sm:$0xff]  }
 0x2c1   :  { %v2777_v46 = vpop.f32.mrb[14].mxu1  ;;  %5208 = vmatpush1.bf16.msra.mxu1 %v9066_v36  ;;  %v8315_v53 = vadd.f32 %v2775_v45, %v1160_v43  ;;  %v9126_v36 = vld [vmem:[#allocation9 + $0x2d8] ss:$24 sps:$4 sm:$0xff]   ;;  %v9137_v45 = vld [vmem:[#allocation9 + $0x4e4] ss:$24 sps:$4 sm:$0xff]  }
 0x2c2   :  { %v8316_v48 = vadd.f32 %v2777_v46, %v1156_v38  ;;  %v2779_v50 = vpop.f32.mrb[15].mxu1  ;;  %5209 = vmatprep.subr.bf16.mxu1 %v9074_v39  ;;  %v9131_v38 = vld [vmem:[#allocation9 + $0x4b4] ss:$24 sps:$4 sm:$0xff]  }
 0x2c3   :  { %v8317_v40 = vadd.f32 %v2779_v50, %v1160_v43  ;;  %v9134_v39 = vld [vmem:[#allocation9 + $0x30c] ss:$24 sps:$4 sm:$0xff]   ;;  %v9132_v43 = vld [vmem:[#allocation9 + $0x308] ss:$24 sps:$4 sm:$0xff]   ;;  %v9140_v46 = vld [vmem:[#allocation9 + $0x33c] ss:$24 sps:$4 sm:$0xff]  }
 0x2c4   :  { %v10582_v54 = vpack.c.bf16 %v8316_v48, %v8314_v34  ;;  %v9138_v34 = vld [vmem:[#allocation9 + $0x338] ss:$24 sps:$4 sm:$0xff]   ;;  %v9143_v48 = vld [vmem:[#allocation9 + $0x514] ss:$24 sps:$4 sm:$0xff]  }
 0x2c5   :  { %v10584_v55 = vpack.c.bf16 %v8317_v40, %v8315_v53  ;;  %5210 = vmatpush1.bf16.msra.mxu1 %v9072_v52  ;;  %v9135_v52 = vld [vmem:[#allocation9 + $0x4e0] ss:$24 sps:$4 sm:$0xff]   ;;  %v9146_v50 = vld [vmem:[#allocation9 + $0x36c] ss:$24 sps:$4 sm:$0xff]  }
 0x2c6   :  { %5211 = vmatprep.subr.bf16.mxu1 %v9080_v51  ;;  %v9141_v51 = vld [vmem:[#allocation9 + $0x510] ss:$24 sps:$4 sm:$0xff]   ;;  %v9149_v40 = vld [vmem:[#allocation9 + $0x544] ss:$24 sps:$4 sm:$0xff]  }
 0x2c7   :  { %5100 = vmatprep.mubr.bf16.mxu0 %v10584_v55  ;;  %5229 = vmatprep.mubr.bf16.mxu1 %v10584_v55  ;;  %v9144_v53 = vld [vmem:[#allocation9 + $0x368] ss:$24 sps:$4 sm:$0xff]  }
 0x2c8   :  { %5101 = vmatmul.mubr.bf16.vlgmr.msra.gmra.mrb[4].mxu0 %v10582_v54 }
 0x2c9   :  { %5112 = vmatpush1.bf16.msra.mxu0 %v9075_v58  ;;  %5143 = vmatprep.mubr.bf16.mxu0 %v10567_v21  ;;  %v9152_v58 = vld [vmem:[#allocation9 + $0x39c] ss:$24 sps:$4 sm:$0xff]  }
 0x2ca   :  { %5212 = vmatpush1.bf16.msra.mxu1 %v9078_v59  ;;  %5113 = vmatprep.subr.bf16.mxu0 %v9083_v62  ;;  %v9147_v59 = vld [vmem:[#allocation9 + $0x540] ss:$24 sps:$4 sm:$0xff]  }
 0x2cb   :  { %5213 = vmatprep.subr.bf16.mxu1 %v9086_v63  ;;  %v9150_v62 = vld [vmem:[#allocation9 + $0x398] ss:$24 sps:$4 sm:$0xff]   ;;  %v9155_v63 = vld [vmem:[#allocation9 + $0x574] ss:$24 sps:$4 sm:$0xff]  }
 0x2cd   :  { %5114 = vmatpush1.bf16.msra.mxu0 %v9081_v0  ;;  %v9158_v0 = vld [vmem:[#allocation9 + $0x3cc] ss:$24 sps:$4 sm:$0xff]  }
 0x2ce   :  { %5214 = vmatpush1.bf16.msra.mxu1 %v9084_v1  ;;  %5115 = vmatprep.subr.bf16.mxu0 %v9089_v2  ;;  %v9153_v1 = vld [vmem:[#allocation9 + $0x570] ss:$24 sps:$4 sm:$0xff]  }
 0x2cf   :  { %5215 = vmatprep.subr.bf16.mxu1 %v9092_v3  ;;  %v9156_v2 = vld [vmem:[#allocation9 + $0x3c8] ss:$24 sps:$4 sm:$0xff]   ;;  %v9161_v3 = vld [vmem:[#allocation9 + $0x5a4] ss:$24 sps:$4 sm:$0xff]  }
 0x2d1   :  { %5116 = vmatpush1.bf16.msra.mxu0 %v9087_v4  ;;  %v9164_v4 = vld [vmem:[#allocation9 + $0x3fc] ss:$24 sps:$4 sm:$0xff]  }
 0x2d2   :  { %5216 = vmatpush1.bf16.msra.mxu1 %v9090_v5  ;;  %5117 = vmatprep.subr.bf16.mxu0 %v9095_v6  ;;  %v9159_v5 = vld [vmem:[#allocation9 + $0x5a0] ss:$24 sps:$4 sm:$0xff]  }
 0x2d3   :  { %5217 = vmatprep.subr.bf16.mxu1 %v9098_v7  ;;  %v9162_v6 = vld [vmem:[#allocation9 + $0x3f8] ss:$24 sps:$4 sm:$0xff]   ;;  %v9167_v7 = vld [vmem:[#allocation9 + $0x5d4] ss:$24 sps:$4 sm:$0xff]  }
 0x2d5   :  { %5118 = vmatpush1.bf16.msra.mxu0 %v9093_v10  ;;  %v9170_v10 = vld [vmem:[#allocation9 + $0x42c] ss:$24 sps:$4 sm:$0xff]  }
 0x2d6   :  { %5218 = vmatpush1.bf16.msra.mxu1 %v9096_v11  ;;  %5119 = vmatprep.subr.bf16.mxu0 %v9101_v12  ;;  %v9165_v11 = vld [vmem:[#allocation9 + $0x5d0] ss:$24 sps:$4 sm:$0xff]  }
 0x2d7   :  { %5219 = vmatprep.subr.bf16.mxu1 %v9104_v14  ;;  %v9168_v12 = vld [vmem:[#allocation9 + $0x428] ss:$24 sps:$4 sm:$0xff]   ;;  %v9200_v14 = vld [vmem:[#allocation9 + $0x604] ss:$24 sps:$4 sm:$0xff]  }
 0x2d9   :  { %5120 = vmatpush1.bf16.msra.mxu0 %v9099_v15  ;;  %v9173_v15 = vld [vmem:[#allocation9 + $0x45c] ss:$24 sps:$4 sm:$0xff]  }
 0x2da   :  { %5220 = vmatpush1.bf16.msra.mxu1 %v9102_v16  ;;  %5121 = vmatprep.subr.bf16.mxu0 %v9107_v17  ;;  %v9198_v16 = vld [vmem:[#allocation9 + $0x600] ss:$24 sps:$4 sm:$0xff]  }
 0x2db   :  { %5221 = vmatprep.subr.bf16.mxu1 %v9110_v18  ;;  %v9171_v17 = vld [vmem:[#allocation9 + $0x458] ss:$24 sps:$4 sm:$0xff]   ;;  %v9206_v18 = vld [vmem:[#allocation9 + $0x634] ss:$24 sps:$4 sm:$0xff]  }
 0x2dd   :  { %5122 = vmatpush1.bf16.msra.mxu0 %v9105_v19  ;;  %v9176_v19 = vld [vmem:[#allocation9 + $0x48c] ss:$24 sps:$4 sm:$0xff]  }
 0x2de   :  { %5222 = vmatpush1.bf16.msra.mxu1 %v9108_v22  ;;  %5123 = vmatprep.subr.bf16.mxu0 %v9113_v23  ;;  %v9204_v22 = vld [vmem:[#allocation9 + $0x630] ss:$24 sps:$4 sm:$0xff]  }
 0x2df   :  { %5223 = vmatprep.subr.bf16.mxu1 %v9116_v24  ;;  %v9174_v23 = vld [vmem:[#allocation9 + $0x488] ss:$24 sps:$4 sm:$0xff]   ;;  %v9212_v24 = vld [vmem:[#allocation9 + $0x664] ss:$24 sps:$4 sm:$0xff]  }
 0x2e1   :  { %5124 = vmatpush1.bf16.msra.mxu0 %v9111_v25  ;;  %v9179_v25 = vld [vmem:[#allocation9 + $0x4bc] ss:$24 sps:$4 sm:$0xff]  }
 0x2e2   :  { %5224 = vmatpush1.bf16.msra.mxu1 %v9114_v26  ;;  %5125 = vmatprep.subr.bf16.mxu0 %v9119_v27  ;;  %v9210_v26 = vld [vmem:[#allocation9 + $0x660] ss:$24 sps:$4 sm:$0xff]  }
 0x2e3   :  { %5225 = vmatprep.subr.bf16.mxu1 %v9122_v47  ;;  %v9177_v27 = vld [vmem:[#allocation9 + $0x4b8] ss:$24 sps:$4 sm:$0xff]   ;;  %v9218_v47 = vld [vmem:[#allocation9 + $0x694] ss:$24 sps:$4 sm:$0xff]  }
 0x2e5   :  { %5126 = vmatpush1.bf16.msra.mxu0 %v9117_v29  ;;  %v9182_v29 = vld [vmem:[#allocation9 + $0x4ec] ss:$24 sps:$4 sm:$0xff]  }
 0x2e6   :  { %5226 = vmatpush1.bf16.msra.mxu1 %v9120_v31  ;;  %5127 = vmatprep.subr.bf16.mxu0 %v9125_v32  ;;  %v9216_v31 = vld [vmem:[#allocation9 + $0x690] ss:$24 sps:$4 sm:$0xff]  }
 0x2e7   :  { %5227 = vmatprep.subr.bf16.mxu1 %v9128_v33  ;;  %v9180_v32 = vld [vmem:[#allocation9 + $0x4e8] ss:$24 sps:$4 sm:$0xff]   ;;  %v9224_v33 = vld [vmem:[#allocation9 + $0x6c4] ss:$24 sps:$4 sm:$0xff]  }
 0x2e9   :  { %5128 = vmatpush1.bf16.msra.mxu0 %v9123_v35  ;;  %v9185_v35 = vld [vmem:[#allocation9 + $0x51c] ss:$24 sps:$4 sm:$0xff]  }
 0x2ea   :  { %5228 = vmatpush1.bf16.msra.mxu1 %v9126_v36  ;;  %5129 = vmatprep.subr.bf16.mxu0 %v9131_v38  ;;  %v9222_v36 = vld [vmem:[#allocation9 + $0x6c0] ss:$24 sps:$4 sm:$0xff]  }
 0x2eb   :  { %5240 = vmatprep.subr.bf16.mxu1 %v9134_v39  ;;  %v9183_v38 = vld [vmem:[#allocation9 + $0x518] ss:$24 sps:$4 sm:$0xff]   ;;  %v9230_v39 = vld [vmem:[#allocation9 + $0x6f4] ss:$24 sps:$4 sm:$0xff]  }
 0x2ed   :  { %5130 = vmatpush1.bf16.msra.mxu0 %v9129_v42  ;;  %5230 = vmatmul.mubr.bf16.vlgmr.msra.gmra.mrb[20].mxu1 %v10582_v54  ;;  %v9188_v42 = vld [vmem:[#allocation9 + $0x54c] ss:$24 sps:$4 sm:$0xff]  }
 0x2ee   :  { %5241 = vmatpush1.bf16.msra.mxu1 %v9132_v43  ;;  %5272 = vmatprep.mubr.bf16.mxu1 %v10567_v21  ;;  %v9228_v43 = vld [vmem:[#allocation9 + $0x6f0] ss:$24 sps:$4 sm:$0xff]  }
 0x2ef   :  { %5131 = vmatprep.subr.bf16.mxu0 %v9137_v45  ;;  %5242 = vmatprep.subr.bf16.mxu1 %v9140_v46  ;;  %v9186_v45 = vld [vmem:[#allocation9 + $0x548] ss:$24 sps:$4 sm:$0xff]   ;;  %v9236_v46 = vld [vmem:[#allocation9 + $0x724] ss:$24 sps:$4 sm:$0xff]  }
 0x2f1   :  { %5132 = vmatpush1.bf16.msra.mxu0 %v9135_v52  ;;  %v9191_v52 = vld [vmem:[#allocation9 + $0x57c] ss:$24 sps:$4 sm:$0xff]  }
 0x2f2   :  { %5243 = vmatpush1.bf16.msra.mxu1 %v9138_v34  ;;  %5133 = vmatprep.subr.bf16.mxu0 %v9143_v48  ;;  %v9234_v34 = vld [vmem:[#allocation9 + $0x720] ss:$24 sps:$4 sm:$0xff]  }
 0x2f3   :  { %5244 = vmatprep.subr.bf16.mxu1 %v9146_v50  ;;  %v9189_v48 = vld [vmem:[#allocation9 + $0x578] ss:$24 sps:$4 sm:$0xff]   ;;  %v9242_v50 = vld [vmem:[#allocation9 + $0x754] ss:$24 sps:$4 sm:$0xff]  }
 0x2f5   :  { %5134 = vmatpush1.bf16.msra.mxu0 %v9141_v51  ;;  %v9194_v51 = vld [vmem:[#allocation9 + $0x5ac] ss:$24 sps:$4 sm:$0xff]  }
 0x2f6   :  { %5245 = vmatpush1.bf16.msra.mxu1 %v9144_v53  ;;  %5135 = vmatprep.subr.bf16.mxu0 %v9149_v40  ;;  %v9240_v53 = vld [vmem:[#allocation9 + $0x750] ss:$24 sps:$4 sm:$0xff]  }
 0x2f7   :  { %5246 = vmatprep.subr.bf16.mxu1 %v9152_v58  ;;  %v9192_v40 = vld [vmem:[#allocation9 + $0x5a8] ss:$24 sps:$4 sm:$0xff]   ;;  %v9248_v58 = vld [vmem:[#allocation9 + $0x784] ss:$24 sps:$4 sm:$0xff]  }
 0x2f9   :  { %5136 = vmatpush1.bf16.msra.mxu0 %v9147_v59  ;;  %v9197_v59 = vld [vmem:[#allocation9 + $0x5dc] ss:$24 sps:$4 sm:$0xff]  }
 0x2fa   :  { %5247 = vmatpush1.bf16.msra.mxu1 %v9150_v62  ;;  %5137 = vmatprep.subr.bf16.mxu0 %v9155_v63  ;;  %v9246_v62 = vld [vmem:[#allocation9 + $0x780] ss:$24 sps:$4 sm:$0xff]  }
 0x2fb   :  { %5248 = vmatprep.subr.bf16.mxu1 %v9158_v0  ;;  %v9195_v63 = vld [vmem:[#allocation9 + $0x5d8] ss:$24 sps:$4 sm:$0xff]   ;;  %v9254_v0 = vld [vmem:[#allocation9 + $0x7b4] ss:$24 sps:$4 sm:$0xff]  }
 0x2fd   :  { %5138 = vmatpush1.bf16.msra.mxu0 %v9153_v1  ;;  %v9203_v1 = vld [vmem:[#allocation9 + $0x60c] ss:$24 sps:$4 sm:$0xff]  }
 0x2fe   :  { %5249 = vmatpush1.bf16.msra.mxu1 %v9156_v2  ;;  %5139 = vmatprep.subr.bf16.mxu0 %v9161_v3  ;;  %v9252_v2 = vld [vmem:[#allocation9 + $0x7b0] ss:$24 sps:$4 sm:$0xff]  }
 0x2ff   :  { %5250 = vmatprep.subr.bf16.mxu1 %v9164_v4  ;;  %v9201_v3 = vld [vmem:[#allocation9 + $0x608] ss:$24 sps:$4 sm:$0xff]   ;;  %v9260_v4 = vld [vmem:[#allocation9 + $0x7e4] ss:$24 sps:$4 sm:$0xff]  }
 0x301   :  { %5140 = vmatpush1.bf16.msra.mxu0 %v9159_v5  ;;  %v9209_v5 = vld [vmem:[#allocation9 + $0x63c] ss:$24 sps:$4 sm:$0xff]  }
 0x302   :  { %5251 = vmatpush1.bf16.msra.mxu1 %v9162_v6  ;;  %5141 = vmatprep.subr.bf16.mxu0 %v9167_v7  ;;  %v9258_v6 = vld [vmem:[#allocation9 + $0x7e0] ss:$24 sps:$4 sm:$0xff]  }
 0x303   :  { %5252 = vmatprep.subr.bf16.mxu1 %v9170_v10  ;;  %v9207_v7 = vld [vmem:[#allocation9 + $0x638] ss:$24 sps:$4 sm:$0xff]   ;;  %v9266_v10 = vld [vmem:[#allocation9 + $0x814] ss:$24 sps:$4 sm:$0xff]  }
 0x305   :  { %5142 = vmatpush1.bf16.msra.mxu0 %v9165_v11  ;;  %v9215_v11 = vld [vmem:[#allocation9 + $0x66c] ss:$24 sps:$4 sm:$0xff]  }
 0x306   :  { %5253 = vmatpush1.bf16.msra.mxu1 %v9168_v12  ;;  %5154 = vmatprep.subr.bf16.mxu0 %v9200_v14  ;;  %v9264_v12 = vld [vmem:[#allocation9 + $0x810] ss:$24 sps:$4 sm:$0xff]  }
 0x307   :  { %5254 = vmatprep.subr.bf16.mxu1 %v9173_v15  ;;  %v9213_v14 = vld [vmem:[#allocation9 + $0x668] ss:$24 sps:$4 sm:$0xff]   ;;  %v9272_v15 = vld [vmem:[#allocation9 + $0x844] ss:$24 sps:$4 sm:$0xff]  }
 0x308   :  { %5144 = vmatmul.mubr.bf16.vlgmr.msra.gmra.mrb[4].mxu0 %v10565_v20 }
 0x309   :  { %5155 = vmatpush1.bf16.msra.mxu0 %v9198_v16  ;;  %v9221_v16 = vld [vmem:[#allocation9 + $0x69c] ss:$24 sps:$4 sm:$0xff]  }
 0x30a   :  { %5255 = vmatpush1.bf16.msra.mxu1 %v9171_v17  ;;  %5156 = vmatprep.subr.bf16.mxu0 %v9206_v18  ;;  %v9270_v17 = vld [vmem:[#allocation9 + $0x840] ss:$24 sps:$4 sm:$0xff]  }
 0x30b   :  { %5256 = vmatprep.subr.bf16.mxu1 %v9176_v19  ;;  %v9219_v18 = vld [vmem:[#allocation9 + $0x698] ss:$24 sps:$4 sm:$0xff]   ;;  %v9278_v19 = vld [vmem:[#allocation9 + $0x874] ss:$24 sps:$4 sm:$0xff]  }
 0x30d   :  { %5157 = vmatpush1.bf16.msra.mxu0 %v9204_v22  ;;  %v9227_v22 = vld [vmem:[#allocation9 + $0x6cc] ss:$24 sps:$4 sm:$0xff]  }
 0x30e   :  { %5257 = vmatpush1.bf16.msra.mxu1 %v9174_v23  ;;  %5158 = vmatprep.subr.bf16.mxu0 %v9212_v24  ;;  %v9276_v23 = vld [vmem:[#allocation9 + $0x870] ss:$24 sps:$4 sm:$0xff]  }
 0x30f   :  { %5258 = vmatprep.subr.bf16.mxu1 %v9179_v25  ;;  %v9225_v24 = vld [vmem:[#allocation9 + $0x6c8] ss:$24 sps:$4 sm:$0xff]   ;;  %v9284_v25 = vld [vmem:[#allocation9 + $0x8a4] ss:$24 sps:$4 sm:$0xff]  }
 0x311   :  { %5159 = vmatpush1.bf16.msra.mxu0 %v9210_v26  ;;  %v9233_v26 = vld [vmem:[#allocation9 + $0x6fc] ss:$24 sps:$4 sm:$0xff]  }
 0x312   :  { %5259 = vmatpush1.bf16.msra.mxu1 %v9177_v27  ;;  %5160 = vmatprep.subr.bf16.mxu0 %v9218_v47  ;;  %v9282_v27 = vld [vmem:[#allocation9 + $0x8a0] ss:$24 sps:$4 sm:$0xff]  }
 0x313   :  { %5260 = vmatprep.subr.bf16.mxu1 %v9182_v29  ;;  %v9231_v47 = vld [vmem:[#allocation9 + $0x6f8] ss:$24 sps:$4 sm:$0xff]   ;;  %v9290_v29 = vld [vmem:[#allocation9 + $0x8d4] ss:$24 sps:$4 sm:$0xff]  }
 0x315   :  { %5161 = vmatpush1.bf16.msra.mxu0 %v9216_v31  ;;  %v9239_v31 = vld [vmem:[#allocation9 + $0x72c] ss:$24 sps:$4 sm:$0xff]  }
 0x316   :  { %5261 = vmatpush1.bf16.msra.mxu1 %v9180_v32  ;;  %5162 = vmatprep.subr.bf16.mxu0 %v9224_v33  ;;  %v9288_v32 = vld [vmem:[#allocation9 + $0x8d0] ss:$24 sps:$4 sm:$0xff]  }
 0x317   :  { %5262 = vmatprep.subr.bf16.mxu1 %v9185_v35  ;;  %v9237_v33 = vld [vmem:[#allocation9 + $0x728] ss:$24 sps:$4 sm:$0xff]   ;;  %v9296_v35 = vld [vmem:[#allocation9 + $0x14] ss:$24 sps:$4 sm:$0xff]  }
 0x319   :  { %5163 = vmatpush1.bf16.msra.mxu0 %v9222_v36  ;;  %v9245_v36 = vld [vmem:[#allocation9 + $0x75c] ss:$24 sps:$4 sm:$0xff]  }
 0x31a   :  { %5263 = vmatpush1.bf16.msra.mxu1 %v9183_v38  ;;  %5164 = vmatprep.subr.bf16.mxu0 %v9230_v39  ;;  %v9243_v38 = vld [vmem:[#allocation9 + $0x758] ss:$24 sps:$4 sm:$0xff]   ;;  %v9251_v39 = vld [vmem:[#allocation9 + $0x78c] ss:$24 sps:$4 sm:$0xff]  }
 0x31b   :  { %5264 = vmatprep.subr.bf16.mxu1 %v9188_v42  ;;  %v9249_v42 = vld [vmem:[#allocation9 + $0x788] ss:$24 sps:$4 sm:$0xff]  }
 0x31d   :  { %5165 = vmatpush1.bf16.msra.mxu0 %v9228_v43  ;;  %v9257_v43 = vld [vmem:[#allocation9 + $0x7bc] ss:$24 sps:$4 sm:$0xff]  }
 0x31e   :  { %5265 = vmatpush1.bf16.msra.mxu1 %v9186_v45  ;;  %5166 = vmatprep.subr.bf16.mxu0 %v9236_v46  ;;  %v9255_v45 = vld [vmem:[#allocation9 + $0x7b8] ss:$24 sps:$4 sm:$0xff]   ;;  %v9263_v46 = vld [vmem:[#allocation9 + $0x7ec] ss:$24 sps:$4 sm:$0xff]  }
 0x31f   :  { %5266 = vmatprep.subr.bf16.mxu1 %v9191_v52  ;;  %v9261_v52 = vld [vmem:[#allocation9 + $0x7e8] ss:$24 sps:$4 sm:$0xff]  }
 0x321   :  { %5167 = vmatpush1.bf16.msra.mxu0 %v9234_v34  ;;  %v9269_v34 = vld [vmem:[#allocation9 + $0x81c] ss:$24 sps:$4 sm:$0xff]  }
 0x322   :  { %5267 = vmatpush1.bf16.msra.mxu1 %v9189_v48  ;;  %5168 = vmatprep.subr.bf16.mxu0 %v9242_v50  ;;  %v9267_v48 = vld [vmem:[#allocation9 + $0x818] ss:$24 sps:$4 sm:$0xff]   ;;  %v9275_v50 = vld [vmem:[#allocation9 + $0x84c] ss:$24 sps:$4 sm:$0xff]  }
 0x323   :  { %5268 = vmatprep.subr.bf16.mxu1 %v9194_v51  ;;  %v9273_v51 = vld [vmem:[#allocation9 + $0x848] ss:$24 sps:$4 sm:$0xff]  }
 0x325   :  { %5169 = vmatpush1.bf16.msra.mxu0 %v9240_v53  ;;  %v9281_v53 = vld [vmem:[#allocation9 + $0x87c] ss:$24 sps:$4 sm:$0xff]  }
 0x326   :  { %5269 = vmatpush1.bf16.msra.mxu1 %v9192_v40  ;;  %5170 = vmatprep.subr.bf16.mxu0 %v9248_v58  ;;  %v9279_v40 = vld [vmem:[#allocation9 + $0x878] ss:$24 sps:$4 sm:$0xff]   ;;  %v9287_v58 = vld [vmem:[#allocation9 + $0x8ac] ss:$24 sps:$4 sm:$0xff]  }
 0x327   :  { %5270 = vmatprep.subr.bf16.mxu1 %v9197_v59  ;;  %v9285_v59 = vld [vmem:[#allocation9 + $0x8a8] ss:$24 sps:$4 sm:$0xff]  }
 0x329   :  { %5171 = vmatpush1.bf16.msra.mxu0 %v9246_v62  ;;  %v9293_v62 = vld [vmem:[#allocation9 + $0x8dc] ss:$24 sps:$4 sm:$0xff]  }
 0x32a   :  { %5271 = vmatpush1.bf16.msra.mxu1 %v9195_v63  ;;  %5172 = vmatprep.subr.bf16.mxu0 %v9254_v0  ;;  %v9291_v63 = vld [vmem:[#allocation9 + $0x8d8] ss:$24 sps:$4 sm:$0xff]   ;;  %v9299_v0 = vld [vmem:[#allocation7 + $0xc] ss:$24 sps:$4 sm:$0xff]  }
 0x32b   :  { %5283 = vmatprep.subr.bf16.mxu1 %v9203_v1  ;;  %v1172_v1 = vrot.slane %v10559_v37, %v10540_v28 }
 0x32d   :  { %5273 = vmatmul.mubr.bf16.vlgmr.msra.gmra.mrb[20].mxu1 %v10565_v20  ;;  %5173 = vmatpush1.bf16.msra.mxu0 %v9252_v2 }
 0x32e   :  { %5284 = vmatpush1.bf16.msra.mxu1 %v9201_v3  ;;  %5174 = vmatprep.subr.bf16.mxu0 %v9260_v4  ;;  %v1176_v3 = vrot.slane %v10559_v37, %v10543_v30  ;;  %v9300_v37 = vld [vmem:[#allocation9 + $0x40] ss:$24 sps:$4 sm:$0xff]  }
 0x32f   :  { %5285 = vmatprep.subr.bf16.mxu1 %v9209_v5 }
 0x331   :  { %5175 = vmatpush1.bf16.msra.mxu0 %v9258_v6 }
 0x332   :  { %5286 = vmatpush1.bf16.msra.mxu1 %v9207_v7  ;;  %5176 = vmatprep.subr.bf16.mxu0 %v9266_v10 }
 0x333   :  { %5287 = vmatprep.subr.bf16.mxu1 %v9215_v11 }
 0x335   :  { %5177 = vmatpush1.bf16.msra.mxu0 %v9264_v12 }
 0x336   :  { %5288 = vmatpush1.bf16.msra.mxu1 %v9213_v14  ;;  %5178 = vmatprep.subr.bf16.mxu0 %v9272_v15 }
 0x337   :  { %5289 = vmatprep.subr.bf16.mxu1 %v9221_v16  ;;  %v9294_v16 = vld [vmem:[#allocation9 + $0x10] ss:$24 sps:$4 sm:$0xff]  }
 0x339   :  { %5179 = vmatpush1.bf16.msra.mxu0 %v9270_v17  ;;  %v9297_v17 = vld [vmem:[#allocation7 + $0x8] ss:$24 sps:$4 sm:$0xff]  }
 0x33a   :  { %5290 = vmatpush1.bf16.msra.mxu1 %v9219_v18  ;;  %5180 = vmatprep.subr.bf16.mxu0 %v9278_v19  ;;  %v9302_v18 = vld [vmem:[#allocation9 + $0x44] ss:$24 sps:$4 sm:$0xff]  }
 0x33b   :  { %5291 = vmatprep.subr.bf16.mxu1 %v9227_v22  ;;  %v9305_v19 = vld [vmem:[#allocation7 + $0x3c] ss:$24 sps:$4 sm:$0xff]   ;;  %v9303_v22 = vld [vmem:[#allocation7 + $0x38] ss:$24 sps:$4 sm:$0xff]  }
 0x33d   :  { %5181 = vmatpush1.bf16.msra.mxu0 %v9276_v23  ;;  %v9308_v23 = vld [vmem:[#allocation9 + $0x74] ss:$24 sps:$4 sm:$0xff]  }
 0x33e   :  { %5292 = vmatpush1.bf16.msra.mxu1 %v9225_v24  ;;  %5182 = vmatprep.subr.bf16.mxu0 %v9284_v25  ;;  %v9311_v24 = vld [vmem:[#allocation7 + $0x6c] ss:$24 sps:$4 sm:$0xff]   ;;  %v9306_v25 = vld [vmem:[#allocation9 + $0x70] ss:$24 sps:$4 sm:$0xff]  }
 0x33f   :  { %5293 = vmatprep.subr.bf16.mxu1 %v9233_v26  ;;  %v9309_v26 = vld [vmem:[#allocation7 + $0x68] ss:$24 sps:$4 sm:$0xff]  }
 0x341   :  { %5183 = vmatpush1.bf16.msra.mxu0 %v9282_v27  ;;  %v9314_v27 = vld [vmem:[#allocation9 + $0xa4] ss:$24 sps:$4 sm:$0xff]  }
 0x342   :  { %5294 = vmatpush1.bf16.msra.mxu1 %v9231_v47  ;;  %5184 = vmatprep.subr.bf16.mxu0 %v9290_v29  ;;  %v9317_v47 = vld [vmem:[#allocation7 + $0x9c] ss:$24 sps:$4 sm:$0xff]   ;;  %v9312_v29 = vld [vmem:[#allocation9 + $0xa0] ss:$24 sps:$4 sm:$0xff]  }
 0x343   :  { %5295 = vmatprep.subr.bf16.mxu1 %v9239_v31  ;;  %v9315_v31 = vld [vmem:[#allocation7 + $0x98] ss:$24 sps:$4 sm:$0xff]  }
 0x345   :  { %5185 = vmatpush1.bf16.msra.mxu0 %v9288_v32  ;;  %v9323_v32 = vld [vmem:[#allocation7 + $0xcc] ss:$24 sps:$4 sm:$0xff]  }
 0x346   :  { %5296 = vmatpush1.bf16.msra.mxu1 %v9237_v33  ;;  %5326 = vmatprep.subr.bf16.mxu0 %v9296_v35  ;;  %v9318_v33 = vld [vmem:[#allocation9 + $0xd0] ss:$24 sps:$4 sm:$0xff]  }
 0x347   :  { %5297 = vmatprep.subr.bf16.mxu1 %v9245_v36  ;;  %v9321_v35 = vld [vmem:[#allocation7 + $0xc8] ss:$24 sps:$4 sm:$0xff]   ;;  %v9326_v36 = vld [vmem:[#allocation9 + $0x104] ss:$24 sps:$4 sm:$0xff]  }
 0x34a   :  { %5298 = vmatpush1.bf16.msra.mxu1 %v9243_v38  ;;  %v9329_v38 = vld [vmem:[#allocation7 + $0xfc] ss:$24 sps:$4 sm:$0xff]  }
 0x34b   :  { %5299 = vmatprep.subr.bf16.mxu1 %v9251_v39  ;;  %v9324_v39 = vld [vmem:[#allocation9 + $0x100] ss:$24 sps:$4 sm:$0xff]  }
 0x34e   :  { %5300 = vmatpush1.bf16.msra.mxu1 %v9249_v42  ;;  %v9327_v42 = vld [vmem:[#allocation7 + $0xf8] ss:$24 sps:$4 sm:$0xff]  }
 0x34f   :  { %5301 = vmatprep.subr.bf16.mxu1 %v9257_v43  ;;  %v9332_v43 = vld [vmem:[#allocation9 + $0x134] ss:$24 sps:$4 sm:$0xff]  }
 0x352   :  { %5302 = vmatpush1.bf16.msra.mxu1 %v9255_v45  ;;  %v9335_v45 = vld [vmem:[#allocation7 + $0x12c] ss:$24 sps:$4 sm:$0xff]  }
 0x353   :  { %5303 = vmatprep.subr.bf16.mxu1 %v9263_v46  ;;  %v9330_v46 = vld [vmem:[#allocation9 + $0x130] ss:$24 sps:$4 sm:$0xff]  }
 0x356   :  { %5304 = vmatpush1.bf16.msra.mxu1 %v9261_v52  ;;  %v9333_v52 = vld [vmem:[#allocation7 + $0x128] ss:$24 sps:$4 sm:$0xff]  }
 0x357   :  { %5305 = vmatprep.subr.bf16.mxu1 %v9269_v34  ;;  %v9338_v34 = vld [vmem:[#allocation9 + $0x164] ss:$24 sps:$4 sm:$0xff]  }
 0x35a   :  { %5306 = vmatpush1.bf16.msra.mxu1 %v9267_v48  ;;  %v9341_v48 = vld [vmem:[#allocation7 + $0x15c] ss:$24 sps:$4 sm:$0xff]  }
 0x35b   :  { %5307 = vmatprep.subr.bf16.mxu1 %v9275_v50  ;;  %v9336_v50 = vld [vmem:[#allocation9 + $0x160] ss:$24 sps:$4 sm:$0xff]  }
 0x35e   :  { %5308 = vmatpush1.bf16.msra.mxu1 %v9273_v51  ;;  %v9339_v51 = vld [vmem:[#allocation7 + $0x158] ss:$24 sps:$4 sm:$0xff]  }
 0x35f   :  { %5309 = vmatprep.subr.bf16.mxu1 %v9281_v53  ;;  %v9344_v53 = vld [vmem:[#allocation9 + $0x194] ss:$24 sps:$4 sm:$0xff]  }
 0x362   :  { %5310 = vmatpush1.bf16.msra.mxu1 %v9279_v40  ;;  %v9347_v40 = vld [vmem:[#allocation7 + $0x18c] ss:$24 sps:$4 sm:$0xff]  }
 0x363   :  { %5311 = vmatprep.subr.bf16.mxu1 %v9287_v58  ;;  %v9342_v58 = vld [vmem:[#allocation9 + $0x190] ss:$24 sps:$4 sm:$0xff]  }
 0x366   :  { %5312 = vmatpush1.bf16.msra.mxu1 %v9285_v59  ;;  %v9345_v59 = vld [vmem:[#allocation7 + $0x188] ss:$24 sps:$4 sm:$0xff]  }
 0x367   :  { %5313 = vmatprep.subr.bf16.mxu1 %v9293_v62  ;;  %v9350_v62 = vld [vmem:[#allocation9 + $0x1c4] ss:$24 sps:$4 sm:$0xff]  }
 0x36a   :  { %5314 = vmatpush1.bf16.msra.mxu1 %v9291_v63  ;;  %v9353_v63 = vld [vmem:[#allocation7 + $0x1bc] ss:$24 sps:$4 sm:$0xff]  }
 0x36b   :  { %7024 = vmatprep.subr.bf16.mxu1 %v9299_v0  ;;  %v9348_v0 = vld [vmem:[#allocation9 + $0x1c0] ss:$24 sps:$4 sm:$0xff]  }
 0x37f   :  { %v3031_v2 = vpop.f32.mrb[16].mxu1 }
 0x380   :  { %v3033_v4 = vpop.f32.mrb[17].mxu1  ;;  %v8322_v6 = vadd.f32 %v3031_v2, %v1172_v1  ;;  %v9356_v2 = vld [vmem:[#allocation9 + $0x1f4] ss:$24 sps:$4 sm:$0xff]  }
 0x381   :  { %v3035_v5 = vpop.f32.mrb[18].mxu1  ;;  %v8323_v11 = vadd.f32 %v3033_v4, %v1176_v3  ;;  %v9354_v4 = vld [vmem:[#allocation9 + $0x1f0] ss:$24 sps:$4 sm:$0xff]  }
 0x382   :  { %v8324_v7 = vadd.f32 %v3035_v5, %v1172_v1  ;;  %v3037_v10 = vpop.f32.mrb[19].mxu1  ;;  %v9351_v1 = vld [vmem:[#allocation7 + $0x1b8] ss:$24 sps:$4 sm:$0xff]   ;;  %v9357_v5 = vld [vmem:[#allocation7 + $0x1e8] ss:$24 sps:$4 sm:$0xff]  }
 0x383   :  { %v8325_v12 = vadd.f32 %v3037_v10, %v1176_v3  ;;  %v9359_v3 = vld [vmem:[#allocation7 + $0x1ec] ss:$24 sps:$4 sm:$0xff]   ;;  %v9360_v10 = vld [vmem:[#allocation9 + $0x220] ss:$24 sps:$4 sm:$0xff]  }
 0x384   :  { %v10598_v14 = vpack.c.bf16 %v8324_v7, %v8322_v6  ;;  %v9362_v6 = vld [vmem:[#allocation9 + $0x224] ss:$24 sps:$4 sm:$0xff]  }
 0x385   :  { %v10600_v15 = vpack.c.bf16 %v8325_v12, %v8323_v11  ;;  %v9365_v7 = vld [vmem:[#allocation7 + $0x21c] ss:$24 sps:$4 sm:$0xff]   ;;  %v9363_v11 = vld [vmem:[#allocation7 + $0x218] ss:$24 sps:$4 sm:$0xff]  }
 0x386   :  { %v9368_v12 = vld [vmem:[#allocation9 + $0x254] ss:$24 sps:$4 sm:$0xff]  }
 0x387   :  { %5186 = vmatprep.mubr.bf16.mxu0 %v10600_v15  ;;  %5315 = vmatprep.mubr.bf16.mxu1 %v10600_v15 }
 0x388   :  { %5187 = vmatmul.mubr.bf16.vlgmr.msra.gmra.mrb[4].mxu0 %v10598_v14  ;;  %5316 = vmatmul.mubr.bf16.vlgmr.msra.gmra.mrb[20].mxu1 %v10598_v14 }
 0x389   :  { %5327 = vmatpush1.bf16.msra.mxu0 %v9294_v16  ;;  %7025 = vmatpush1.bf16.msra.mxu1 %v9297_v17  ;;  %v9371_v16 = vld [vmem:[#allocation7 + $0x24c] ss:$24 sps:$4 sm:$0xff]   ;;  %v9366_v17 = vld [vmem:[#allocation9 + $0x250] ss:$24 sps:$4 sm:$0xff]  }
 0x38a   :  { %5358 = vmatprep.mubr.bf16.mxu0 %v10584_v55  ;;  %7056 = vmatprep.mubr.bf16.mxu1 %v10515_v9  ;;  %v9320_v55 = vld [vmem:[#allocation9 + $0xd4] ss:$24 sps:$4 sm:$0xff]  }
 0x38b   :  { %5328 = vmatprep.subr.bf16.mxu0 %v9302_v18  ;;  %7026 = vmatprep.subr.bf16.mxu1 %v9305_v19  ;;  %v9369_v18 = vld [vmem:[#allocation7 + $0x248] ss:$24 sps:$4 sm:$0xff]   ;;  %v9374_v19 = vld [vmem:[#allocation9 + $0x284] ss:$24 sps:$4 sm:$0xff]  }
 0x38d   :  { %5329 = vmatpush1.bf16.msra.mxu0 %v9300_v37  ;;  %7027 = vmatpush1.bf16.msra.mxu1 %v9303_v22  ;;  %v9377_v37 = vld [vmem:[#allocation7 + $0x27c] ss:$24 sps:$4 sm:$0xff]   ;;  %v9372_v22 = vld [vmem:[#allocation9 + $0x280] ss:$24 sps:$4 sm:$0xff]  }
 0x38e   :  { %5330 = vmatprep.subr.bf16.mxu0 %v9308_v23  ;;  %7028 = vmatprep.subr.bf16.mxu1 %v9311_v24  ;;  %v9375_v23 = vld [vmem:[#allocation7 + $0x278] ss:$24 sps:$4 sm:$0xff]   ;;  %v9380_v24 = vld [vmem:[#allocation9 + $0x2b4] ss:$24 sps:$4 sm:$0xff]  }
 0x391   :  { %5331 = vmatpush1.bf16.msra.mxu0 %v9306_v25  ;;  %7029 = vmatpush1.bf16.msra.mxu1 %v9309_v26  ;;  %v9383_v25 = vld [vmem:[#allocation7 + $0x2ac] ss:$24 sps:$4 sm:$0xff]   ;;  %v9378_v26 = vld [vmem:[#allocation9 + $0x2b0] ss:$24 sps:$4 sm:$0xff]  }
 0x392   :  { %5332 = vmatprep.subr.bf16.mxu0 %v9314_v27  ;;  %7030 = vmatprep.subr.bf16.mxu1 %v9317_v47  ;;  %v9381_v27 = vld [vmem:[#allocation7 + $0x2a8] ss:$24 sps:$4 sm:$0xff]   ;;  %v9386_v47 = vld [vmem:[#allocation9 + $0x2e4] ss:$24 sps:$4 sm:$0xff]  }
 0x395   :  { %5333 = vmatpush1.bf16.msra.mxu0 %v9312_v29  ;;  %7031 = vmatpush1.bf16.msra.mxu1 %v9315_v31  ;;  %v9389_v29 = vld [vmem:[#allocation7 + $0x2dc] ss:$24 sps:$4 sm:$0xff]   ;;  %v9384_v31 = vld [vmem:[#allocation9 + $0x2e0] ss:$24 sps:$4 sm:$0xff]  }
 0x396   :  { %5334 = vmatprep.subr.bf16.mxu0 %v9320_v55  ;;  %7032 = vmatprep.subr.bf16.mxu1 %v9323_v32  ;;  %v9387_v55 = vld [vmem:[#allocation7 + $0x2d8] ss:$24 sps:$4 sm:$0xff]   ;;  %v9392_v32 = vld [vmem:[#allocation9 + $0x314] ss:$24 sps:$4 sm:$0xff]  }
 0x399   :  { %5335 = vmatpush1.bf16.msra.mxu0 %v9318_v33  ;;  %7033 = vmatpush1.bf16.msra.mxu1 %v9321_v35  ;;  %v9395_v33 = vld [vmem:[#allocation7 + $0x30c] ss:$24 sps:$4 sm:$0xff]   ;;  %v9390_v35 = vld [vmem:[#allocation9 + $0x310] ss:$24 sps:$4 sm:$0xff]  }
 0x39a   :  { %5336 = vmatprep.subr.bf16.mxu0 %v9326_v36  ;;  %7034 = vmatprep.subr.bf16.mxu1 %v9329_v38  ;;  %v9393_v36 = vld [vmem:[#allocation7 + $0x308] ss:$24 sps:$4 sm:$0xff]   ;;  %v9398_v38 = vld [vmem:[#allocation9 + $0x344] ss:$24 sps:$4 sm:$0xff]  }
 0x39d   :  { %5337 = vmatpush1.bf16.msra.mxu0 %v9324_v39  ;;  %7035 = vmatpush1.bf16.msra.mxu1 %v9327_v42  ;;  %v9401_v39 = vld [vmem:[#allocation7 + $0x33c] ss:$24 sps:$4 sm:$0xff]   ;;  %v9396_v42 = vld [vmem:[#allocation9 + $0x340] ss:$24 sps:$4 sm:$0xff]  }
 0x39e   :  { %5338 = vmatprep.subr.bf16.mxu0 %v9332_v43  ;;  %7036 = vmatprep.subr.bf16.mxu1 %v9335_v45  ;;  %v9399_v43 = vld [vmem:[#allocation7 + $0x338] ss:$24 sps:$4 sm:$0xff]   ;;  %v9404_v45 = vld [vmem:[#allocation9 + $0x374] ss:$24 sps:$4 sm:$0xff]  }
 0x3a1   :  { %5339 = vmatpush1.bf16.msra.mxu0 %v9330_v46  ;;  %7037 = vmatpush1.bf16.msra.mxu1 %v9333_v52  ;;  %v9407_v46 = vld [vmem:[#allocation7 + $0x36c] ss:$24 sps:$4 sm:$0xff]   ;;  %v9402_v52 = vld [vmem:[#allocation9 + $0x370] ss:$24 sps:$4 sm:$0xff]  }
 0x3a2   :  { %5340 = vmatprep.subr.bf16.mxu0 %v9338_v34  ;;  %7038 = vmatprep.subr.bf16.mxu1 %v9341_v48  ;;  %v9405_v34 = vld [vmem:[#allocation7 + $0x368] ss:$24 sps:$4 sm:$0xff]   ;;  %v9413_v48 = vld [vmem:[#allocation7 + $0x39c] ss:$24 sps:$4 sm:$0xff]  }
 0x3a5   :  { %5341 = vmatpush1.bf16.msra.mxu0 %v9336_v50  ;;  %7039 = vmatpush1.bf16.msra.mxu1 %v9339_v51  ;;  %v9408_v50 = vld [vmem:[#allocation9 + $0x3a0] ss:$24 sps:$4 sm:$0xff]   ;;  %v9416_v51 = vld [vmem:[#allocation9 + $0x3d4] ss:$24 sps:$4 sm:$0xff]  }
 0x3a6   :  { %5342 = vmatprep.subr.bf16.mxu0 %v9344_v53  ;;  %7040 = vmatprep.subr.bf16.mxu1 %v9347_v40  ;;  %v9419_v53 = vld [vmem:[#allocation7 + $0x3cc] ss:$24 sps:$4 sm:$0xff]   ;;  %v9414_v40 = vld [vmem:[#allocation9 + $0x3d0] ss:$24 sps:$4 sm:$0xff]  }
 0x3a9   :  { %5343 = vmatpush1.bf16.msra.mxu0 %v9342_v58  ;;  %7041 = vmatpush1.bf16.msra.mxu1 %v9345_v59  ;;  %v9417_v58 = vld [vmem:[#allocation7 + $0x3c8] ss:$24 sps:$4 sm:$0xff]   ;;  %v9422_v59 = vld [vmem:[#allocation9 + $0x404] ss:$24 sps:$4 sm:$0xff]  }
 0x3aa   :  { %5344 = vmatprep.subr.bf16.mxu0 %v9350_v62  ;;  %7042 = vmatprep.subr.bf16.mxu1 %v9353_v63  ;;  %v9425_v62 = vld [vmem:[#allocation7 + $0x3fc] ss:$24 sps:$4 sm:$0xff]   ;;  %v9420_v63 = vld [vmem:[#allocation9 + $0x400] ss:$24 sps:$4 sm:$0xff]  }
 0x3ad   :  { %5345 = vmatpush1.bf16.msra.mxu0 %v9348_v0  ;;  %7043 = vmatpush1.bf16.msra.mxu1 %v9351_v1  ;;  %v9423_v0 = vld [vmem:[#allocation7 + $0x3f8] ss:$24 sps:$4 sm:$0xff]   ;;  %v9428_v1 = vld [vmem:[#allocation9 + $0x434] ss:$24 sps:$4 sm:$0xff]  }
 0x3ae   :  { %5346 = vmatprep.subr.bf16.mxu0 %v9356_v2  ;;  %7044 = vmatprep.subr.bf16.mxu1 %v9359_v3  ;;  %v9431_v2 = vld [vmem:[#allocation7 + $0x42c] ss:$24 sps:$4 sm:$0xff]   ;;  %v9426_v3 = vld [vmem:[#allocation9 + $0x430] ss:$24 sps:$4 sm:$0xff]  }
 0x3b1   :  { %5347 = vmatpush1.bf16.msra.mxu0 %v9354_v4  ;;  %7045 = vmatpush1.bf16.msra.mxu1 %v9357_v5  ;;  %v9429_v4 = vld [vmem:[#allocation7 + $0x428] ss:$24 sps:$4 sm:$0xff]   ;;  %v9434_v5 = vld [vmem:[#allocation9 + $0x464] ss:$24 sps:$4 sm:$0xff]  }
 0x3b2   :  { %5348 = vmatprep.subr.bf16.mxu0 %v9362_v6  ;;  %7046 = vmatprep.subr.bf16.mxu1 %v9365_v7  ;;  %v9437_v6 = vld [vmem:[#allocation7 + $0x45c] ss:$24 sps:$4 sm:$0xff]   ;;  %v9432_v7 = vld [vmem:[#allocation9 + $0x460] ss:$24 sps:$4 sm:$0xff]  }
 0x3b5   :  { %5349 = vmatpush1.bf16.msra.mxu0 %v9360_v10  ;;  %7047 = vmatpush1.bf16.msra.mxu1 %v9363_v11  ;;  %v9435_v10 = vld [vmem:[#allocation7 + $0x458] ss:$24 sps:$4 sm:$0xff]   ;;  %v9440_v11 = vld [vmem:[#allocation9 + $0x494] ss:$24 sps:$4 sm:$0xff]  }
 0x3b6   :  { %5350 = vmatprep.subr.bf16.mxu0 %v9368_v12  ;;  %7048 = vmatprep.subr.bf16.mxu1 %v9371_v16  ;;  %v9443_v12 = vld [vmem:[#allocation7 + $0x48c] ss:$24 sps:$4 sm:$0xff]   ;;  %v9438_v16 = vld [vmem:[#allocation9 + $0x490] ss:$24 sps:$4 sm:$0xff]  }
 0x3b9   :  { %5351 = vmatpush1.bf16.msra.mxu0 %v9366_v17  ;;  %7049 = vmatpush1.bf16.msra.mxu1 %v9369_v18  ;;  %v9441_v17 = vld [vmem:[#allocation7 + $0x488] ss:$24 sps:$4 sm:$0xff]   ;;  %v9446_v18 = vld [vmem:[#allocation9 + $0x4c4] ss:$24 sps:$4 sm:$0xff]  }
 0x3ba   :  { %5352 = vmatprep.subr.bf16.mxu0 %v9374_v19  ;;  %7050 = vmatprep.subr.bf16.mxu1 %v9377_v37  ;;  %v9449_v19 = vld [vmem:[#allocation7 + $0x4bc] ss:$24 sps:$4 sm:$0xff]   ;;  %v9444_v37 = vld [vmem:[#allocation9 + $0x4c0] ss:$24 sps:$4 sm:$0xff]  }
 0x3bd   :  { %5353 = vmatpush1.bf16.msra.mxu0 %v9372_v22  ;;  %7051 = vmatpush1.bf16.msra.mxu1 %v9375_v23  ;;  %v9447_v22 = vld [vmem:[#allocation7 + $0x4b8] ss:$24 sps:$4 sm:$0xff]   ;;  %v9452_v23 = vld [vmem:[#allocation9 + $0x4f4] ss:$24 sps:$4 sm:$0xff]  }
 0x3be   :  { %5354 = vmatprep.subr.bf16.mxu0 %v9380_v24  ;;  %7052 = vmatprep.subr.bf16.mxu1 %v9383_v25  ;;  %v9455_v24 = vld [vmem:[#allocation7 + $0x4ec] ss:$24 sps:$4 sm:$0xff]   ;;  %v9450_v25 = vld [vmem:[#allocation9 + $0x4f0] ss:$24 sps:$4 sm:$0xff]  }
 0x3c1   :  { %5355 = vmatpush1.bf16.msra.mxu0 %v9378_v26  ;;  %7053 = vmatpush1.bf16.msra.mxu1 %v9381_v27  ;;  %v9453_v26 = vld [vmem:[#allocation7 + $0x4e8] ss:$24 sps:$4 sm:$0xff]   ;;  %v9458_v27 = vld [vmem:[#allocation9 + $0x524] ss:$24 sps:$4 sm:$0xff]  }
 0x3c2   :  { %5356 = vmatprep.subr.bf16.mxu0 %v9386_v47  ;;  %7054 = vmatprep.subr.bf16.mxu1 %v9389_v29  ;;  %v9461_v47 = vld [vmem:[#allocation7 + $0x51c] ss:$24 sps:$4 sm:$0xff]   ;;  %v9456_v29 = vld [vmem:[#allocation9 + $0x520] ss:$24 sps:$4 sm:$0xff]  }
 0x3c5   :  { %5357 = vmatpush1.bf16.msra.mxu0 %v9384_v31  ;;  %7055 = vmatpush1.bf16.msra.mxu1 %v9387_v55  ;;  %v9459_v31 = vld [vmem:[#allocation7 + $0x518] ss:$24 sps:$4 sm:$0xff]   ;;  %v9464_v55 = vld [vmem:[#allocation9 + $0x554] ss:$24 sps:$4 sm:$0xff]  }
 0x3c6   :  { %5369 = vmatprep.subr.bf16.mxu0 %v9392_v32  ;;  %7067 = vmatprep.subr.bf16.mxu1 %v9395_v33  ;;  %v9467_v32 = vld [vmem:[#allocation7 + $0x54c] ss:$24 sps:$4 sm:$0xff]   ;;  %v9462_v33 = vld [vmem:[#allocation9 + $0x550] ss:$24 sps:$4 sm:$0xff]  }
 0x3c8   :  { %5359 = vmatmul.mubr.bf16.vlgmr.msra.gmra.mrb[8].mxu0 %v10582_v54  ;;  %7057 = vmatmul.mubr.bf16.vlgmr.msra.gmra.mrb[20].mxu1 %v10513_v8  ;;  %v9410_v54 = vld [vmem:[#allocation9 + $0x3a4] ss:$24 sps:$4 sm:$0xff]  }
 0x3c9   :  { %5370 = vmatpush1.bf16.msra.mxu0 %v9390_v35  ;;  %5401 = vmatprep.mubr.bf16.mxu0 %v10567_v21  ;;  %v9411_v21 = vld [vmem:[#allocation7 + $0x398] ss:$24 sps:$4 sm:$0xff]   ;;  %v9465_v35 = vld [vmem:[#allocation7 + $0x548] ss:$24 sps:$4 sm:$0xff]  }
 0x3ca   :  { %7068 = vmatpush1.bf16.msra.mxu1 %v9393_v36  ;;  %7099 = vmatprep.mubr.bf16.mxu1 %v10533_v61  ;;  %v9470_v36 = vld [vmem:[#allocation9 + $0x584] ss:$24 sps:$4 sm:$0xff]  }
 0x3cb   :  { %5371 = vmatprep.subr.bf16.mxu0 %v9398_v38  ;;  %7069 = vmatprep.subr.bf16.mxu1 %v9401_v39  ;;  %v9473_v38 = vld [vmem:[#allocation7 + $0x57c] ss:$24 sps:$4 sm:$0xff]   ;;  %v9468_v39 = vld [vmem:[#allocation9 + $0x580] ss:$24 sps:$4 sm:$0xff]  }
 0x3cd   :  { %5372 = vmatpush1.bf16.msra.mxu0 %v9396_v42  ;;  %v9471_v42 = vld [vmem:[#allocation7 + $0x578] ss:$24 sps:$4 sm:$0xff]  }
 0x3ce   :  { %7070 = vmatpush1.bf16.msra.mxu1 %v9399_v43  ;;  %5373 = vmatprep.subr.bf16.mxu0 %v9404_v45  ;;  %v9476_v43 = vld [vmem:[#allocation9 + $0x5b4] ss:$24 sps:$4 sm:$0xff]  }
 0x3cf   :  { %7071 = vmatprep.subr.bf16.mxu1 %v9407_v46  ;;  %v9479_v45 = vld [vmem:[#allocation7 + $0x5ac] ss:$24 sps:$4 sm:$0xff]   ;;  %v9474_v46 = vld [vmem:[#allocation9 + $0x5b0] ss:$24 sps:$4 sm:$0xff]  }
 0x3d1   :  { %5374 = vmatpush1.bf16.msra.mxu0 %v9402_v52  ;;  %v9477_v52 = vld [vmem:[#allocation7 + $0x5a8] ss:$24 sps:$4 sm:$0xff]  }
 0x3d2   :  { %7072 = vmatpush1.bf16.msra.mxu1 %v9405_v34  ;;  %5375 = vmatprep.subr.bf16.mxu0 %v9410_v54  ;;  %v9482_v34 = vld [vmem:[#allocation9 + $0x5e4] ss:$24 sps:$4 sm:$0xff]  }
 0x3d3   :  { %7073 = vmatprep.subr.bf16.mxu1 %v9413_v48  ;;  %v9485_v54 = vld [vmem:[#allocation7 + $0x5dc] ss:$24 sps:$4 sm:$0xff]   ;;  %v9480_v48 = vld [vmem:[#allocation9 + $0x5e0] ss:$24 sps:$4 sm:$0xff]  }
 0x3d5   :  { %5376 = vmatpush1.bf16.msra.mxu0 %v9408_v50  ;;  %v9483_v50 = vld [vmem:[#allocation7 + $0x5d8] ss:$24 sps:$4 sm:$0xff]  }
 0x3d6   :  { %7074 = vmatpush1.bf16.msra.mxu1 %v9411_v21  ;;  %5377 = vmatprep.subr.bf16.mxu0 %v9416_v51  ;;  %v9488_v21 = vld [vmem:[#allocation9 + $0x614] ss:$24 sps:$4 sm:$0xff]  }
 0x3d7   :  { %7075 = vmatprep.subr.bf16.mxu1 %v9419_v53  ;;  %v9491_v51 = vld [vmem:[#allocation7 + $0x60c] ss:$24 sps:$4 sm:$0xff]   ;;  %v9486_v53 = vld [vmem:[#allocation9 + $0x610] ss:$24 sps:$4 sm:$0xff]  }
 0x3d9   :  { %5378 = vmatpush1.bf16.msra.mxu0 %v9414_v40  ;;  %v9489_v40 = vld [vmem:[#allocation7 + $0x608] ss:$24 sps:$4 sm:$0xff]  }
 0x3da   :  { %7076 = vmatpush1.bf16.msra.mxu1 %v9417_v58  ;;  %5379 = vmatprep.subr.bf16.mxu0 %v9422_v59  ;;  %v9494_v58 = vld [vmem:[#allocation9 + $0x644] ss:$24 sps:$4 sm:$0xff]  }
 0x3db   :  { %7077 = vmatprep.subr.bf16.mxu1 %v9425_v62  ;;  %v9497_v59 = vld [vmem:[#allocation7 + $0x63c] ss:$24 sps:$4 sm:$0xff]   ;;  %v9492_v62 = vld [vmem:[#allocation9 + $0x640] ss:$24 sps:$4 sm:$0xff]  }
 0x3dd   :  { %5380 = vmatpush1.bf16.msra.mxu0 %v9420_v63  ;;  %v9495_v63 = vld [vmem:[#allocation7 + $0x638] ss:$24 sps:$4 sm:$0xff]  }
 0x3de   :  { %7078 = vmatpush1.bf16.msra.mxu1 %v9423_v0  ;;  %5381 = vmatprep.subr.bf16.mxu0 %v9428_v1  ;;  %v9500_v0 = vld [vmem:[#allocation9 + $0x674] ss:$24 sps:$4 sm:$0xff]  }
 0x3df   :  { %7079 = vmatprep.subr.bf16.mxu1 %v9431_v2  ;;  %v9503_v1 = vld [vmem:[#allocation7 + $0x66c] ss:$24 sps:$4 sm:$0xff]   ;;  %v9498_v2 = vld [vmem:[#allocation9 + $0x670] ss:$24 sps:$4 sm:$0xff]  }
 0x3e1   :  { %5382 = vmatpush1.bf16.msra.mxu0 %v9426_v3  ;;  %v9506_v3 = vld [vmem:[#allocation9 + $0x6a4] ss:$24 sps:$4 sm:$0xff]  }
 0x3e2   :  { %7080 = vmatpush1.bf16.msra.mxu1 %v9429_v4  ;;  %5383 = vmatprep.subr.bf16.mxu0 %v9434_v5  ;;  %v9509_v4 = vld [vmem:[#allocation7 + $0x69c] ss:$24 sps:$4 sm:$0xff]   ;;  %v9504_v5 = vld [vmem:[#allocation9 + $0x6a0] ss:$24 sps:$4 sm:$0xff]  }
 0x3e3   :  { %7081 = vmatprep.subr.bf16.mxu1 %v9437_v6  ;;  %v9512_v6 = vld [vmem:[#allocation9 + $0x6d4] ss:$24 sps:$4 sm:$0xff]  }
 0x3e5   :  { %5384 = vmatpush1.bf16.msra.mxu0 %v9432_v7  ;;  %v9515_v7 = vld [vmem:[#allocation7 + $0x6cc] ss:$24 sps:$4 sm:$0xff]  }
 0x3e6   :  { %7082 = vmatpush1.bf16.msra.mxu1 %v9435_v10  ;;  %5385 = vmatprep.subr.bf16.mxu0 %v9440_v11  ;;  %v9510_v10 = vld [vmem:[#allocation9 + $0x6d0] ss:$24 sps:$4 sm:$0xff]  }
 0x3e7   :  { %7083 = vmatprep.subr.bf16.mxu1 %v9443_v12  ;;  %v9513_v11 = vld [vmem:[#allocation7 + $0x6c8] ss:$24 sps:$4 sm:$0xff]   ;;  %v9518_v12 = vld [vmem:[#allocation9 + $0x704] ss:$24 sps:$4 sm:$0xff]  }
 0x3e9   :  { %5386 = vmatpush1.bf16.msra.mxu0 %v9438_v16  ;;  %v9521_v16 = vld [vmem:[#allocation7 + $0x6fc] ss:$24 sps:$4 sm:$0xff]  }
 0x3ea   :  { %7084 = vmatpush1.bf16.msra.mxu1 %v9441_v17  ;;  %5387 = vmatprep.subr.bf16.mxu0 %v9446_v18  ;;  %v9516_v17 = vld [vmem:[#allocation9 + $0x700] ss:$24 sps:$4 sm:$0xff]  }
 0x3eb   :  { %7085 = vmatprep.subr.bf16.mxu1 %v9449_v19  ;;  %v9519_v18 = vld [vmem:[#allocation7 + $0x6f8] ss:$24 sps:$4 sm:$0xff]   ;;  %v9524_v19 = vld [vmem:[#allocation9 + $0x734] ss:$24 sps:$4 sm:$0xff]  }
 0x3ed   :  { %5388 = vmatpush1.bf16.msra.mxu0 %v9444_v37  ;;  %v9527_v37 = vld [vmem:[#allocation7 + $0x72c] ss:$24 sps:$4 sm:$0xff]  }
 0x3ee   :  { %7086 = vmatpush1.bf16.msra.mxu1 %v9447_v22  ;;  %5389 = vmatprep.subr.bf16.mxu0 %v9452_v23  ;;  %v9522_v22 = vld [vmem:[#allocation9 + $0x730] ss:$24 sps:$4 sm:$0xff]  }
 0x3ef   :  { %7087 = vmatprep.subr.bf16.mxu1 %v9455_v24  ;;  %v9525_v23 = vld [vmem:[#allocation7 + $0x728] ss:$24 sps:$4 sm:$0xff]   ;;  %v9530_v24 = vld [vmem:[#allocation9 + $0x764] ss:$24 sps:$4 sm:$0xff]  }
 0x3f1   :  { %5390 = vmatpush1.bf16.msra.mxu0 %v9450_v25  ;;  %v9533_v25 = vld [vmem:[#allocation7 + $0x75c] ss:$24 sps:$4 sm:$0xff]  }
 0x3f2   :  { %7088 = vmatpush1.bf16.msra.mxu1 %v9453_v26  ;;  %5391 = vmatprep.subr.bf16.mxu0 %v9458_v27  ;;  %v9528_v26 = vld [vmem:[#allocation9 + $0x760] ss:$24 sps:$4 sm:$0xff]  }
 0x3f3   :  { %7089 = vmatprep.subr.bf16.mxu1 %v9461_v47  ;;  %v9531_v27 = vld [vmem:[#allocation7 + $0x758] ss:$24 sps:$4 sm:$0xff]   ;;  %v9536_v47 = vld [vmem:[#allocation9 + $0x794] ss:$24 sps:$4 sm:$0xff]  }
 0x3f5   :  { %5392 = vmatpush1.bf16.msra.mxu0 %v9456_v29  ;;  %v9539_v29 = vld [vmem:[#allocation7 + $0x78c] ss:$24 sps:$4 sm:$0xff]  }
 0x3f6   :  { %7090 = vmatpush1.bf16.msra.mxu1 %v9459_v31  ;;  %5393 = vmatprep.subr.bf16.mxu0 %v9464_v55  ;;  %v9534_v31 = vld [vmem:[#allocation9 + $0x790] ss:$24 sps:$4 sm:$0xff]  }
 0x3f7   :  { %7091 = vmatprep.subr.bf16.mxu1 %v9467_v32  ;;  %v9537_v55 = vld [vmem:[#allocation7 + $0x788] ss:$24 sps:$4 sm:$0xff]   ;;  %v9542_v32 = vld [vmem:[#allocation9 + $0x7c4] ss:$24 sps:$4 sm:$0xff]  }
 0x3f9   :  { %5394 = vmatpush1.bf16.msra.mxu0 %v9462_v33  ;;  %v9545_v33 = vld [vmem:[#allocation7 + $0x7bc] ss:$24 sps:$4 sm:$0xff]  }
 0x3fa   :  { %7092 = vmatpush1.bf16.msra.mxu1 %v9465_v35  ;;  %5395 = vmatprep.subr.bf16.mxu0 %v9470_v36  ;;  %v9540_v35 = vld [vmem:[#allocation9 + $0x7c0] ss:$24 sps:$4 sm:$0xff]  }
 0x3fb   :  { %7093 = vmatprep.subr.bf16.mxu1 %v9473_v38  ;;  %v9543_v36 = vld [vmem:[#allocation7 + $0x7b8] ss:$24 sps:$4 sm:$0xff]   ;;  %v9548_v38 = vld [vmem:[#allocation9 + $0x7f4] ss:$24 sps:$4 sm:$0xff]  }
 0x3fd   :  { %5396 = vmatpush1.bf16.msra.mxu0 %v9468_v39  ;;  %v9551_v39 = vld [vmem:[#allocation7 + $0x7ec] ss:$24 sps:$4 sm:$0xff]  }
 0x3fe   :  { %7094 = vmatpush1.bf16.msra.mxu1 %v9471_v42  ;;  %5397 = vmatprep.subr.bf16.mxu0 %v9476_v43  ;;  %v9546_v42 = vld [vmem:[#allocation9 + $0x7f0] ss:$24 sps:$4 sm:$0xff]  }
 0x3ff   :  { %7095 = vmatprep.subr.bf16.mxu1 %v9479_v45  ;;  %v9549_v43 = vld [vmem:[#allocation7 + $0x7e8] ss:$24 sps:$4 sm:$0xff]   ;;  %v9554_v45 = vld [vmem:[#allocation9 + $0x824] ss:$24 sps:$4 sm:$0xff]  }
 0x401   :  { %5398 = vmatpush1.bf16.msra.mxu0 %v9474_v46  ;;  %v9557_v46 = vld [vmem:[#allocation7 + $0x81c] ss:$24 sps:$4 sm:$0xff]  }
 0x402   :  { %7096 = vmatpush1.bf16.msra.mxu1 %v9477_v52  ;;  %5399 = vmatprep.subr.bf16.mxu0 %v9482_v34  ;;  %v9552_v52 = vld [vmem:[#allocation9 + $0x820] ss:$24 sps:$4 sm:$0xff]  }
 0x403   :  { %7097 = vmatprep.subr.bf16.mxu1 %v9485_v54  ;;  %v9555_v34 = vld [vmem:[#allocation7 + $0x818] ss:$24 sps:$4 sm:$0xff]   ;;  %v9560_v54 = vld [vmem:[#allocation9 + $0x854] ss:$24 sps:$4 sm:$0xff]  }
 0x405   :  { %5400 = vmatpush1.bf16.msra.mxu0 %v9480_v48  ;;  %v9563_v48 = vld [vmem:[#allocation7 + $0x84c] ss:$24 sps:$4 sm:$0xff]  }
 0x406   :  { %7098 = vmatpush1.bf16.msra.mxu1 %v9483_v50  ;;  %5412 = vmatprep.subr.bf16.mxu0 %v9488_v21  ;;  %v9558_v50 = vld [vmem:[#allocation9 + $0x850] ss:$24 sps:$4 sm:$0xff]  }
 0x407   :  { %7110 = vmatprep.subr.bf16.mxu1 %v9491_v51  ;;  %v9561_v21 = vld [vmem:[#allocation7 + $0x848] ss:$24 sps:$4 sm:$0xff]   ;;  %v9566_v51 = vld [vmem:[#allocation9 + $0x884] ss:$24 sps:$4 sm:$0xff]  }
 0x408   :  { %5402 = vmatmul.mubr.bf16.vlgmr.msra.gmra.mrb[8].mxu0 %v10565_v20  ;;  %v9501_v20 = vld [vmem:[#allocation7 + $0x668] ss:$24 sps:$4 sm:$0xff]  }
 0x409   :  { %7100 = vmatmul.mubr.bf16.vlgmr.msra.gmra.mrb[20].mxu1 %v10531_v60  ;;  %5413 = vmatpush1.bf16.msra.mxu0 %v9486_v53  ;;  %v9569_v53 = vld [vmem:[#allocation7 + $0x87c] ss:$24 sps:$4 sm:$0xff]  }
 0x40a   :  { %5444 = vmatprep.mubr.bf16.mxu0 %v10600_v15  ;;  %7111 = vmatpush1.bf16.msra.mxu1 %v9489_v40  ;;  %v9507_v15 = vld [vmem:[#allocation7 + $0x698] ss:$24 sps:$4 sm:$0xff]  }
 0x40b   :  { %7142 = vmatprep.mubr.bf16.mxu1 %v10551_v13  ;;  %5414 = vmatprep.subr.bf16.mxu0 %v9494_v58  ;;  %v9564_v40 = vld [vmem:[#allocation9 + $0x880] ss:$24 sps:$4 sm:$0xff]  }
 0x40c   :  { %7112 = vmatprep.subr.bf16.mxu1 %v9497_v59  ;;  %v9567_v58 = vld [vmem:[#allocation7 + $0x878] ss:$24 sps:$4 sm:$0xff]   ;;  %v9572_v59 = vld [vmem:[#allocation9 + $0x8b4] ss:$24 sps:$4 sm:$0xff]  }
 0x40d   :  { %5415 = vmatpush1.bf16.msra.mxu0 %v9492_v62  ;;  %v9575_v62 = vld [vmem:[#allocation7 + $0x8ac] ss:$24 sps:$4 sm:$0xff]  }
 0x40e   :  { %7113 = vmatpush1.bf16.msra.mxu1 %v9495_v63  ;;  %5416 = vmatprep.subr.bf16.mxu0 %v9500_v0  ;;  %v9570_v63 = vld [vmem:[#allocation9 + $0x8b0] ss:$24 sps:$4 sm:$0xff]  }
 0x40f   :  { %7114 = vmatprep.subr.bf16.mxu1 %v9503_v1  ;;  %v9573_v0 = vld [vmem:[#allocation7 + $0x8a8] ss:$24 sps:$4 sm:$0xff]   ;;  %v9578_v1 = vld [vmem:[#allocation9 + $0x8e4] ss:$24 sps:$4 sm:$0xff]  }
 0x411   :  { %5417 = vmatpush1.bf16.msra.mxu0 %v9498_v2  ;;  %v9581_v2 = vld [vmem:[#allocation7 + $0x8dc] ss:$24 sps:$4 sm:$0xff]  }
 0x412   :  { %7115 = vmatpush1.bf16.msra.mxu1 %v9501_v20  ;;  %5418 = vmatprep.subr.bf16.mxu0 %v9506_v3  ;;  %v9576_v20 = vld [vmem:[#allocation9 + $0x8e0] ss:$24 sps:$4 sm:$0xff]  }
 0x413   :  { %7116 = vmatprep.subr.bf16.mxu1 %v9509_v4  ;;  %v9579_v3 = vld [vmem:[#allocation7 + $0x8d8] ss:$24 sps:$4 sm:$0xff]   ;;  %v9584_v4 = vld [vmem:[#allocation7 + $0x4] ss:$24 sps:$4 sm:$0xff]  }
 0x415   :  { %5419 = vmatpush1.bf16.msra.mxu0 %v9504_v5  ;;  %v9582_v5 = vld [vmem:[#allocation7] ss:$24 sps:$4 sm:$0xff]  }
 0x416   :  { %7117 = vmatpush1.bf16.msra.mxu1 %v9507_v15  ;;  %5420 = vmatprep.subr.bf16.mxu0 %v9512_v6  ;;  %v9587_v15 = vld [vmem:[#allocation7 + $0x34] ss:$24 sps:$4 sm:$0xff]   ;;  %v9585_v6 = vld [vmem:[#allocation7 + $0x30] ss:$24 sps:$4 sm:$0xff]  }
 0x417   :  { %7118 = vmatprep.subr.bf16.mxu1 %v9515_v7  ;;  %v9590_v7 = vld [vmem:[#allocation7 + $0x64] ss:$24 sps:$4 sm:$0xff]  }
 0x419   :  { %5421 = vmatpush1.bf16.msra.mxu0 %v9510_v10  ;;  %v9588_v10 = vld [vmem:[#allocation7 + $0x60] ss:$24 sps:$4 sm:$0xff]  }
 0x41a   :  { %7119 = vmatpush1.bf16.msra.mxu1 %v9513_v11  ;;  %5422 = vmatprep.subr.bf16.mxu0 %v9518_v12  ;;  %v9593_v11 = vld [vmem:[#allocation7 + $0x94] ss:$24 sps:$4 sm:$0xff]   ;;  %v9591_v12 = vld [vmem:[#allocation7 + $0x90] ss:$24 sps:$4 sm:$0xff]  }
 0x41b   :  { %7120 = vmatprep.subr.bf16.mxu1 %v9521_v16  ;;  %v9596_v16 = vld [vmem:[#allocation7 + $0xc4] ss:$24 sps:$4 sm:$0xff]  }
 0x41d   :  { %5423 = vmatpush1.bf16.msra.mxu0 %v9516_v17  ;;  %v9594_v17 = vld [vmem:[#allocation7 + $0xc0] ss:$24 sps:$4 sm:$0xff]  }
 0x41e   :  { %7121 = vmatpush1.bf16.msra.mxu1 %v9519_v18  ;;  %5424 = vmatprep.subr.bf16.mxu0 %v9524_v19  ;;  %v9597_v18 = vld [vmem:[#allocation7 + $0xf0] ss:$24 sps:$4 sm:$0xff]   ;;  %v9602_v19 = vld [vmem:[#allocation7 + $0x124] ss:$24 sps:$4 sm:$0xff]  }
 0x41f   :  { %7122 = vmatprep.subr.bf16.mxu1 %v9527_v37  ;;  %v9600_v37 = vld [vmem:[#allocation7 + $0x120] ss:$24 sps:$4 sm:$0xff]  }
 0x421   :  { %5425 = vmatpush1.bf16.msra.mxu0 %v9522_v22  ;;  %v9605_v22 = vld [vmem:[#allocation7 + $0x154] ss:$24 sps:$4 sm:$0xff]  }
 0x422   :  { %7123 = vmatpush1.bf16.msra.mxu1 %v9525_v23  ;;  %5426 = vmatprep.subr.bf16.mxu0 %v9530_v24  ;;  %v9603_v23 = vld [vmem:[#allocation7 + $0x150] ss:$24 sps:$4 sm:$0xff]   ;;  %v9608_v24 = vld [vmem:[#allocation7 + $0x184] ss:$24 sps:$4 sm:$0xff]  }
 0x423   :  { %7124 = vmatprep.subr.bf16.mxu1 %v9533_v25  ;;  %v9606_v25 = vld [vmem:[#allocation7 + $0x180] ss:$24 sps:$4 sm:$0xff]  }
 0x425   :  { %5427 = vmatpush1.bf16.msra.mxu0 %v9528_v26  ;;  %v9611_v26 = vld [vmem:[#allocation7 + $0x1b4] ss:$24 sps:$4 sm:$0xff]  }
 0x426   :  { %7125 = vmatpush1.bf16.msra.mxu1 %v9531_v27  ;;  %5428 = vmatprep.subr.bf16.mxu0 %v9536_v47  ;;  %v9609_v27 = vld [vmem:[#allocation7 + $0x1b0] ss:$24 sps:$4 sm:$0xff]   ;;  %v9614_v47 = vld [vmem:[#allocation7 + $0x1e4] ss:$24 sps:$4 sm:$0xff]  }
 0x427   :  { %7126 = vmatprep.subr.bf16.mxu1 %v9539_v29  ;;  %v9612_v29 = vld [vmem:[#allocation7 + $0x1e0] ss:$24 sps:$4 sm:$0xff]  }
 0x429   :  { %5429 = vmatpush1.bf16.msra.mxu0 %v9534_v31  ;;  %v9617_v31 = vld [vmem:[#allocation7 + $0x214] ss:$24 sps:$4 sm:$0xff]  }
 0x42a   :  { %7127 = vmatpush1.bf16.msra.mxu1 %v9537_v55  ;;  %5430 = vmatprep.subr.bf16.mxu0 %v9542_v32  ;;  %v9615_v55 = vld [vmem:[#allocation7 + $0x210] ss:$24 sps:$4 sm:$0xff]   ;;  %v9620_v32 = vld [vmem:[#allocation7 + $0x244] ss:$24 sps:$4 sm:$0xff]  }
 0x42b   :  { %7128 = vmatprep.subr.bf16.mxu1 %v9545_v33  ;;  %v9618_v33 = vld [vmem:[#allocation7 + $0x240] ss:$24 sps:$4 sm:$0xff]  }
 0x42d   :  { %5431 = vmatpush1.bf16.msra.mxu0 %v9540_v35  ;;  %v9623_v35 = vld [vmem:[#allocation7 + $0x274] ss:$24 sps:$4 sm:$0xff]  }
 0x42e   :  { %7129 = vmatpush1.bf16.msra.mxu1 %v9543_v36  ;;  %5432 = vmatprep.subr.bf16.mxu0 %v9548_v38  ;;  %v9621_v36 = vld [vmem:[#allocation7 + $0x270] ss:$24 sps:$4 sm:$0xff]   ;;  %v9626_v38 = vld [vmem:[#allocation7 + $0x2a4] ss:$24 sps:$4 sm:$0xff]  }
 0x42f   :  { %7130 = vmatprep.subr.bf16.mxu1 %v9551_v39  ;;  %v9624_v39 = vld [vmem:[#allocation7 + $0x2a0] ss:$24 sps:$4 sm:$0xff]  }
 0x431   :  { %5433 = vmatpush1.bf16.msra.mxu0 %v9546_v42  ;;  %v9629_v42 = vld [vmem:[#allocation7 + $0x2d4] ss:$24 sps:$4 sm:$0xff]  }
 0x432   :  { %7131 = vmatpush1.bf16.msra.mxu1 %v9549_v43  ;;  %5434 = vmatprep.subr.bf16.mxu0 %v9554_v45  ;;  %v9627_v43 = vld [vmem:[#allocation7 + $0x2d0] ss:$24 sps:$4 sm:$0xff]   ;;  %v9632_v45 = vld [vmem:[#allocation7 + $0x304] ss:$24 sps:$4 sm:$0xff]  }
 0x433   :  { %7132 = vmatprep.subr.bf16.mxu1 %v9557_v46  ;;  %v9630_v46 = vld [vmem:[#allocation7 + $0x300] ss:$24 sps:$4 sm:$0xff]  }
 0x435   :  { %5435 = vmatpush1.bf16.msra.mxu0 %v9552_v52  ;;  %v9635_v52 = vld [vmem:[#allocation7 + $0x334] ss:$24 sps:$4 sm:$0xff]  }
 0x436   :  { %7133 = vmatpush1.bf16.msra.mxu1 %v9555_v34  ;;  %5436 = vmatprep.subr.bf16.mxu0 %v9560_v54  ;;  %v9633_v34 = vld [vmem:[#allocation7 + $0x330] ss:$24 sps:$4 sm:$0xff]   ;;  %v9638_v54 = vld [vmem:[#allocation7 + $0x364] ss:$24 sps:$4 sm:$0xff]  }
 0x437   :  { %7134 = vmatprep.subr.bf16.mxu1 %v9563_v48  ;;  %v9636_v48 = vld [vmem:[#allocation7 + $0x360] ss:$24 sps:$4 sm:$0xff]  }
 0x439   :  { %5437 = vmatpush1.bf16.msra.mxu0 %v9558_v50  ;;  %v9641_v50 = vld [vmem:[#allocation7 + $0x394] ss:$24 sps:$4 sm:$0xff]  }
 0x43a   :  { %7135 = vmatpush1.bf16.msra.mxu1 %v9561_v21  ;;  %5438 = vmatprep.subr.bf16.mxu0 %v9566_v51  ;;  %v9639_v21 = vld [vmem:[#allocation7 + $0x390] ss:$24 sps:$4 sm:$0xff]   ;;  %v9644_v51 = vld [vmem:[#allocation7 + $0x3c4] ss:$24 sps:$4 sm:$0xff]  }
 0x43b   :  { %7136 = vmatprep.subr.bf16.mxu1 %v9569_v53  ;;  %v9642_v53 = vld [vmem:[#allocation7 + $0x3c0] ss:$24 sps:$4 sm:$0xff]  }
 0x43d   :  { %5439 = vmatpush1.bf16.msra.mxu0 %v9564_v40  ;;  %v9647_v40 = vld [vmem:[#allocation7 + $0x3f4] ss:$24 sps:$4 sm:$0xff]  }
 0x43e   :  { %7137 = vmatpush1.bf16.msra.mxu1 %v9567_v58  ;;  %5440 = vmatprep.subr.bf16.mxu0 %v9572_v59  ;;  %v9645_v58 = vld [vmem:[#allocation7 + $0x3f0] ss:$24 sps:$4 sm:$0xff]   ;;  %v9650_v59 = vld [vmem:[#allocation7 + $0x424] ss:$24 sps:$4 sm:$0xff]  }
 0x43f   :  { %7138 = vmatprep.subr.bf16.mxu1 %v9575_v62  ;;  %v9648_v62 = vld [vmem:[#allocation7 + $0x420] ss:$24 sps:$4 sm:$0xff]  }
 0x441   :  { %5441 = vmatpush1.bf16.msra.mxu0 %v9570_v63  ;;  %v9653_v63 = vld [vmem:[#allocation7 + $0x454] ss:$24 sps:$4 sm:$0xff]  }
 0x442   :  { %7139 = vmatpush1.bf16.msra.mxu1 %v9573_v0  ;;  %5442 = vmatprep.subr.bf16.mxu0 %v9578_v1  ;;  %v9651_v0 = vld [vmem:[#allocation7 + $0x450] ss:$24 sps:$4 sm:$0xff]   ;;  %v9656_v1 = vld [vmem:[#allocation7 + $0x484] ss:$24 sps:$4 sm:$0xff]  }
 0x443   :  { %7140 = vmatprep.subr.bf16.mxu1 %v9581_v2  ;;  %v9654_v2 = vld [vmem:[#allocation7 + $0x480] ss:$24 sps:$4 sm:$0xff]  }
 0x445   :  { %5443 = vmatpush1.bf16.msra.mxu0 %v9576_v20  ;;  %v9659_v20 = vld [vmem:[#allocation7 + $0x4b4] ss:$24 sps:$4 sm:$0xff]  }
 0x446   :  { %7141 = vmatpush1.bf16.msra.mxu1 %v9579_v3  ;;  %6895 = vmatprep.subr.bf16.mxu0 %v9584_v4  ;;  %v9657_v3 = vld [vmem:[#allocation7 + $0x4b0] ss:$24 sps:$4 sm:$0xff]   ;;  %v9662_v4 = vld [vmem:[#allocation7 + $0x4e4] ss:$24 sps:$4 sm:$0xff]  }
 0x448   :  { %5445 = vmatmul.mubr.bf16.vlgmr.msra.gmra.mrb[8].mxu0 %v10598_v14  ;;  %v9599_v14 = vld [vmem:[#allocation7 + $0xf4] ss:$24 sps:$4 sm:$0xff]  }
 0x449   :  { %7143 = vmatmul.mubr.bf16.vlgmr.msra.gmra.mrb[20].mxu1 %v10549_v49  ;;  %6896 = vmatpush1.bf16.msra.mxu0 %v9582_v5  ;;  %v9660_v5 = vld [vmem:[#allocation7 + $0x4e0] ss:$24 sps:$4 sm:$0xff]  }
 0x44a   :  { %6927 = vmatprep.mubr.bf16.mxu0 %v10515_v9  ;;  %6897 = vmatprep.subr.bf16.mxu0 %v9587_v15  ;;  %v9665_v15 = vld [vmem:[#allocation7 + $0x514] ss:$24 sps:$4 sm:$0xff]  }
 0x44d   :  { %6898 = vmatpush1.bf16.msra.mxu0 %v9585_v6  ;;  %v9663_v6 = vld [vmem:[#allocation7 + $0x510] ss:$24 sps:$4 sm:$0xff]  }
 0x44e   :  { %6899 = vmatprep.subr.bf16.mxu0 %v9590_v7  ;;  %v9668_v7 = vld [vmem:[#allocation7 + $0x544] ss:$24 sps:$4 sm:$0xff]  }
 0x451   :  { %6900 = vmatpush1.bf16.msra.mxu0 %v9588_v10  ;;  %v9666_v10 = vld [vmem:[#allocation7 + $0x540] ss:$24 sps:$4 sm:$0xff]  }
 0x452   :  { %6901 = vmatprep.subr.bf16.mxu0 %v9593_v11  ;;  %v9671_v11 = vld [vmem:[#allocation7 + $0x574] ss:$24 sps:$4 sm:$0xff]  }
 0x455   :  { %6902 = vmatpush1.bf16.msra.mxu0 %v9591_v12  ;;  %v9669_v12 = vld [vmem:[#allocation7 + $0x570] ss:$24 sps:$4 sm:$0xff]  }
 0x456   :  { %6903 = vmatprep.subr.bf16.mxu0 %v9596_v16  ;;  %v9674_v16 = vld [vmem:[#allocation7 + $0x5a4] ss:$24 sps:$4 sm:$0xff]  }
 0x459   :  { %6904 = vmatpush1.bf16.msra.mxu0 %v9594_v17  ;;  %v9672_v17 = vld [vmem:[#allocation7 + $0x5a0] ss:$24 sps:$4 sm:$0xff]  }
 0x45a   :  { %6905 = vmatprep.subr.bf16.mxu0 %v9599_v14  ;;  %v9677_v14 = vld [vmem:[#allocation7 + $0x5d4] ss:$24 sps:$4 sm:$0xff]  }
 0x45d   :  { %6906 = vmatpush1.bf16.msra.mxu0 %v9597_v18  ;;  %v9675_v18 = vld [vmem:[#allocation7 + $0x5d0] ss:$24 sps:$4 sm:$0xff]  }
 0x45e   :  { %6907 = vmatprep.subr.bf16.mxu0 %v9602_v19  ;;  %v9680_v19 = vld [vmem:[#allocation7 + $0x604] ss:$24 sps:$4 sm:$0xff]  }
 0x461   :  { %6908 = vmatpush1.bf16.msra.mxu0 %v9600_v37  ;;  %v9678_v37 = vld [vmem:[#allocation7 + $0x600] ss:$24 sps:$4 sm:$0xff]  }
 0x462   :  { %6909 = vmatprep.subr.bf16.mxu0 %v9605_v22  ;;  %v9683_v22 = vld [vmem:[#allocation7 + $0x634] ss:$24 sps:$4 sm:$0xff]  }
 0x465   :  { %6910 = vmatpush1.bf16.msra.mxu0 %v9603_v23  ;;  %v9681_v23 = vld [vmem:[#allocation7 + $0x630] ss:$24 sps:$4 sm:$0xff]  }
 0x466   :  { %6911 = vmatprep.subr.bf16.mxu0 %v9608_v24  ;;  %v9686_v24 = vld [vmem:[#allocation7 + $0x664] ss:$24 sps:$4 sm:$0xff]  }
 0x469   :  { %6912 = vmatpush1.bf16.msra.mxu0 %v9606_v25  ;;  %v9684_v25 = vld [vmem:[#allocation7 + $0x660] ss:$24 sps:$4 sm:$0xff]  }
 0x46a   :  { %6913 = vmatprep.subr.bf16.mxu0 %v9611_v26  ;;  %v9689_v26 = vld [vmem:[#allocation7 + $0x694] ss:$24 sps:$4 sm:$0xff]  }
 0x46d   :  { %6914 = vmatpush1.bf16.msra.mxu0 %v9609_v27  ;;  %v9687_v27 = vld [vmem:[#allocation7 + $0x690] ss:$24 sps:$4 sm:$0xff]  }
 0x46e   :  { %6915 = vmatprep.subr.bf16.mxu0 %v9614_v47  ;;  %v9692_v47 = vld [vmem:[#allocation7 + $0x6c4] ss:$24 sps:$4 sm:$0xff]  }
 0x471   :  { %6916 = vmatpush1.bf16.msra.mxu0 %v9612_v29  ;;  %v9690_v29 = vld [vmem:[#allocation7 + $0x6c0] ss:$24 sps:$4 sm:$0xff]  }
 0x472   :  { %6917 = vmatprep.subr.bf16.mxu0 %v9617_v31  ;;  %v9695_v31 = vld [vmem:[#allocation7 + $0x6f4] ss:$24 sps:$4 sm:$0xff]  }
 0x475   :  { %6918 = vmatpush1.bf16.msra.mxu0 %v9615_v55  ;;  %v9693_v55 = vld [vmem:[#allocation7 + $0x6f0] ss:$24 sps:$4 sm:$0xff]  }
 0x476   :  { %6919 = vmatprep.subr.bf16.mxu0 %v9620_v32  ;;  %v9698_v32 = vld [vmem:[#allocation7 + $0x724] ss:$24 sps:$4 sm:$0xff]  }
 0x479   :  { %6920 = vmatpush1.bf16.msra.mxu0 %v9618_v33  ;;  %v9696_v33 = vld [vmem:[#allocation7 + $0x720] ss:$24 sps:$4 sm:$0xff]  }
 0x47a   :  { %6921 = vmatprep.subr.bf16.mxu0 %v9623_v35  ;;  %v9701_v35 = vld [vmem:[#allocation7 + $0x754] ss:$24 sps:$4 sm:$0xff]  }
 0x47d   :  { %6922 = vmatpush1.bf16.msra.mxu0 %v9621_v36  ;;  %v9699_v36 = vld [vmem:[#allocation7 + $0x750] ss:$24 sps:$4 sm:$0xff]  }
 0x47e   :  { %6923 = vmatprep.subr.bf16.mxu0 %v9626_v38  ;;  %v9704_v38 = vld [vmem:[#allocation7 + $0x784] ss:$24 sps:$4 sm:$0xff]  }
 0x481   :  { %6924 = vmatpush1.bf16.msra.mxu0 %v9624_v39  ;;  %v9702_v39 = vld [vmem:[#allocation7 + $0x780] ss:$24 sps:$4 sm:$0xff]  }
 0x482   :  { %6925 = vmatprep.subr.bf16.mxu0 %v9629_v42  ;;  %v9707_v42 = vld [vmem:[#allocation7 + $0x7b4] ss:$24 sps:$4 sm:$0xff]  }
 0x485   :  { %6926 = vmatpush1.bf16.msra.mxu0 %v9627_v43  ;;  %v9705_v43 = vld [vmem:[#allocation7 + $0x7b0] ss:$24 sps:$4 sm:$0xff]  }
 0x486   :  { %6938 = vmatprep.subr.bf16.mxu0 %v9632_v45  ;;  %v9710_v45 = vld [vmem:[#allocation7 + $0x7e4] ss:$24 sps:$4 sm:$0xff]  }
 0x488   :  { %6928 = vmatmul.mubr.bf16.vlgmr.msra.gmra.mrb[4].mxu0 %v10513_v8 }
 0x489   :  { %6939 = vmatpush1.bf16.msra.mxu0 %v9630_v46  ;;  %6970 = vmatprep.mubr.bf16.mxu0 %v10533_v61  ;;  %v9708_v46 = vld [vmem:[#allocation7 + $0x7e0] ss:$24 sps:$4 sm:$0xff]  }
 0x48a   :  { %6940 = vmatprep.subr.bf16.mxu0 %v9635_v52  ;;  %v9713_v52 = vld [vmem:[#allocation7 + $0x814] ss:$24 sps:$4 sm:$0xff]  }
 0x48d   :  { %6941 = vmatpush1.bf16.msra.mxu0 %v9633_v34  ;;  %v9711_v34 = vld [vmem:[#allocation7 + $0x810] ss:$24 sps:$4 sm:$0xff]  }
 0x48e   :  { %6942 = vmatprep.subr.bf16.mxu0 %v9638_v54  ;;  %v9716_v54 = vld [vmem:[#allocation7 + $0x844] ss:$24 sps:$4 sm:$0xff]  }
 0x491   :  { %6943 = vmatpush1.bf16.msra.mxu0 %v9636_v48  ;;  %v9714_v48 = vld [vmem:[#allocation7 + $0x840] ss:$24 sps:$4 sm:$0xff]  }
 0x492   :  { %6944 = vmatprep.subr.bf16.mxu0 %v9641_v50  ;;  %v9719_v50 = vld [vmem:[#allocation7 + $0x874] ss:$24 sps:$4 sm:$0xff]  }
 0x495   :  { %6945 = vmatpush1.bf16.msra.mxu0 %v9639_v21  ;;  %v9717_v21 = vld [vmem:[#allocation7 + $0x870] ss:$24 sps:$4 sm:$0xff]  }
 0x496   :  { %6946 = vmatprep.subr.bf16.mxu0 %v9644_v51  ;;  %v9722_v51 = vld [vmem:[#allocation7 + $0x8a4] ss:$24 sps:$4 sm:$0xff]  }
 0x499   :  { %6947 = vmatpush1.bf16.msra.mxu0 %v9642_v53  ;;  %v9720_v53 = vld [vmem:[#allocation7 + $0x8a0] ss:$24 sps:$4 sm:$0xff]  }
 0x49a   :  { %6948 = vmatprep.subr.bf16.mxu0 %v9647_v40  ;;  %v9725_v40 = vld [vmem:[#allocation7 + $0x8d4] ss:$24 sps:$4 sm:$0xff]  }
 0x49d   :  { %6949 = vmatpush1.bf16.msra.mxu0 %v9645_v58  ;;  %v9723_v58 = vld [vmem:[#allocation7 + $0x8d0] ss:$24 sps:$4 sm:$0xff]  }
 0x49e   :  { %6950 = vmatprep.subr.bf16.mxu0 %v9650_v59  ;;  %v9728_v59 = vld [vmem:[#allocation7 + $0x14] ss:$24 sps:$4 sm:$0xff]  }
 0x4a1   :  { %6951 = vmatpush1.bf16.msra.mxu0 %v9648_v62  ;;  %v9726_v62 = vld [vmem:[#allocation7 + $0x10] ss:$24 sps:$4 sm:$0xff]  }
 0x4a2   :  { %6952 = vmatprep.subr.bf16.mxu0 %v9653_v63  ;;  %v9731_v63 = vld [vmem:[#allocation7 + $0x44] ss:$24 sps:$4 sm:$0xff]  }
 0x4a5   :  { %6953 = vmatpush1.bf16.msra.mxu0 %v9651_v0  ;;  %v9729_v0 = vld [vmem:[#allocation7 + $0x40] ss:$24 sps:$4 sm:$0xff]  }
 0x4a6   :  { %6954 = vmatprep.subr.bf16.mxu0 %v9656_v1  ;;  %v9734_v1 = vld [vmem:[#allocation7 + $0x74] ss:$24 sps:$4 sm:$0xff]  }
 0x4a9   :  { %6955 = vmatpush1.bf16.msra.mxu0 %v9654_v2  ;;  %v9732_v2 = vld [vmem:[#allocation7 + $0x70] ss:$24 sps:$4 sm:$0xff]  }
 0x4aa   :  { %6956 = vmatprep.subr.bf16.mxu0 %v9659_v20  ;;  %v9737_v20 = vld [vmem:[#allocation7 + $0xa4] ss:$24 sps:$4 sm:$0xff]  }
 0x4ad   :  { %6957 = vmatpush1.bf16.msra.mxu0 %v9657_v3  ;;  %v9735_v3 = vld [vmem:[#allocation7 + $0xa0] ss:$24 sps:$4 sm:$0xff]  }
 0x4ae   :  { %6958 = vmatprep.subr.bf16.mxu0 %v9662_v4  ;;  %v9740_v4 = vld [vmem:[#allocation7 + $0xd4] ss:$24 sps:$4 sm:$0xff]  }
 0x4b1   :  { %6959 = vmatpush1.bf16.msra.mxu0 %v9660_v5  ;;  %v9738_v5 = vld [vmem:[#allocation7 + $0xd0] ss:$24 sps:$4 sm:$0xff]  }
 0x4b2   :  { %6960 = vmatprep.subr.bf16.mxu0 %v9665_v15  ;;  %v10625_v15 = vld [vmem:[#allocation10] sm:$0x3f] }
 0x4b5   :  { %6961 = vmatpush1.bf16.msra.mxu0 %v9663_v6  ;;  %v9743_v6 = vld [vmem:[#allocation7 + $0x104] ss:$24 sps:$4 sm:$0xff]  }
 0x4b6   :  { %6962 = vmatprep.subr.bf16.mxu0 %v9668_v7  ;;  %v9741_v7 = vld [vmem:[#allocation7 + $0x100] ss:$24 sps:$4 sm:$0xff]  }
 0x4b9   :  { %6963 = vmatpush1.bf16.msra.mxu0 %v9666_v10  ;;  %v7299_v10 = vrot.slane %v10625_v15, %v10525_v44 }
 0x4ba   :  { %6964 = vmatprep.subr.bf16.mxu0 %v9671_v11  ;;  %v9746_v11 = vld [vmem:[#allocation7 + $0x134] ss:$24 sps:$4 sm:$0xff]  }
 0x4bd   :  { %6965 = vmatpush1.bf16.msra.mxu0 %v9669_v12 }
 0x4be   :  { %6966 = vmatprep.subr.bf16.mxu0 %v9674_v16 }
 0x4c1   :  { %6967 = vmatpush1.bf16.msra.mxu0 %v9672_v17 }
 0x4c2   :  { %6968 = vmatprep.subr.bf16.mxu0 %v9677_v14  ;;  %v9744_v14 = vld [vmem:[#allocation7 + $0x130] ss:$24 sps:$4 sm:$0xff]  }
 0x4c5   :  { %6969 = vmatpush1.bf16.msra.mxu0 %v9675_v18 }
 0x4c6   :  { %6981 = vmatprep.subr.bf16.mxu0 %v9680_v19 }
 0x4c8   :  { %6971 = vmatmul.mubr.bf16.vlgmr.msra.gmra.mrb[4].mxu0 %v10531_v60 }
 0x4c9   :  { %6982 = vmatpush1.bf16.msra.mxu0 %v9678_v37  ;;  %7013 = vmatprep.mubr.bf16.mxu0 %v10551_v13  ;;  %v9749_v37 = vld [vmem:[#allocation7 + $0x164] ss:$24 sps:$4 sm:$0xff]  }
 0x4ca   :  { %6983 = vmatprep.subr.bf16.mxu0 %v9683_v22 }
 0x4cd   :  { %6984 = vmatpush1.bf16.msra.mxu0 %v9681_v23  ;;  %v9747_v23 = vld [vmem:[#allocation7 + $0x160] ss:$24 sps:$4 sm:$0xff]  }
 0x4ce   :  { %6985 = vmatprep.subr.bf16.mxu0 %v9686_v24  ;;  %v9752_v24 = vld [vmem:[#allocation7 + $0x194] ss:$24 sps:$4 sm:$0xff]  }
 0x4d1   :  { %6986 = vmatpush1.bf16.msra.mxu0 %v9684_v25  ;;  %v9750_v25 = vld [vmem:[#allocation7 + $0x190] ss:$24 sps:$4 sm:$0xff]  }
 0x4d2   :  { %6987 = vmatprep.subr.bf16.mxu0 %v9689_v26  ;;  %v9755_v26 = vld [vmem:[#allocation7 + $0x1c4] ss:$24 sps:$4 sm:$0xff]  }
 0x4d5   :  { %6988 = vmatpush1.bf16.msra.mxu0 %v9687_v27  ;;  %v9753_v27 = vld [vmem:[#allocation7 + $0x1c0] ss:$24 sps:$4 sm:$0xff]  }
 0x4d6   :  { %6989 = vmatprep.subr.bf16.mxu0 %v9692_v47  ;;  %v9758_v47 = vld [vmem:[#allocation7 + $0x1f4] ss:$24 sps:$4 sm:$0xff]  }
 0x4d9   :  { %6990 = vmatpush1.bf16.msra.mxu0 %v9690_v29  ;;  %v9756_v29 = vld [vmem:[#allocation7 + $0x1f0] ss:$24 sps:$4 sm:$0xff]  }
 0x4da   :  { %6991 = vmatprep.subr.bf16.mxu0 %v9695_v31  ;;  %v9761_v31 = vld [vmem:[#allocation7 + $0x224] ss:$24 sps:$4 sm:$0xff]  }
 0x4dd   :  { %6992 = vmatpush1.bf16.msra.mxu0 %v9693_v55  ;;  %v9759_v55 = vld [vmem:[#allocation7 + $0x220] ss:$24 sps:$4 sm:$0xff]  }
 0x4de   :  { %6993 = vmatprep.subr.bf16.mxu0 %v9698_v32  ;;  %v9764_v32 = vld [vmem:[#allocation7 + $0x254] ss:$24 sps:$4 sm:$0xff]  }
 0x4e1   :  { %6994 = vmatpush1.bf16.msra.mxu0 %v9696_v33  ;;  %v9762_v33 = vld [vmem:[#allocation7 + $0x250] ss:$24 sps:$4 sm:$0xff]  }
 0x4e2   :  { %6995 = vmatprep.subr.bf16.mxu0 %v9701_v35  ;;  %v9767_v35 = vld [vmem:[#allocation7 + $0x284] ss:$24 sps:$4 sm:$0xff]  }
 0x4e5   :  { %6996 = vmatpush1.bf16.msra.mxu0 %v9699_v36  ;;  %v9765_v36 = vld [vmem:[#allocation7 + $0x280] ss:$24 sps:$4 sm:$0xff]  }
 0x4e6   :  { %6997 = vmatprep.subr.bf16.mxu0 %v9704_v38  ;;  %v9770_v38 = vld [vmem:[#allocation7 + $0x2b4] ss:$24 sps:$4 sm:$0xff]  }
 0x4e9   :  { %6998 = vmatpush1.bf16.msra.mxu0 %v9702_v39  ;;  %v9768_v39 = vld [vmem:[#allocation7 + $0x2b0] ss:$24 sps:$4 sm:$0xff]  }
 0x4ea   :  { %6999 = vmatprep.subr.bf16.mxu0 %v9707_v42  ;;  %v9773_v42 = vld [vmem:[#allocation7 + $0x2e4] ss:$24 sps:$4 sm:$0xff]  }
 0x4ed   :  { %7000 = vmatpush1.bf16.msra.mxu0 %v9705_v43  ;;  %v9771_v43 = vld [vmem:[#allocation7 + $0x2e0] ss:$24 sps:$4 sm:$0xff]  }
 0x4ee   :  { %7001 = vmatprep.subr.bf16.mxu0 %v9710_v45  ;;  %v9776_v45 = vld [vmem:[#allocation7 + $0x314] ss:$24 sps:$4 sm:$0xff]  }
 0x4f1   :  { %7002 = vmatpush1.bf16.msra.mxu0 %v9708_v46  ;;  %v9774_v46 = vld [vmem:[#allocation7 + $0x310] ss:$24 sps:$4 sm:$0xff]  }
 0x4f2   :  { %7003 = vmatprep.subr.bf16.mxu0 %v9713_v52  ;;  %v9779_v52 = vld [vmem:[#allocation7 + $0x344] ss:$24 sps:$4 sm:$0xff]  }
 0x4f5   :  { %7004 = vmatpush1.bf16.msra.mxu0 %v9711_v34  ;;  %v9777_v34 = vld [vmem:[#allocation7 + $0x340] ss:$24 sps:$4 sm:$0xff]  }
 0x4f6   :  { %7005 = vmatprep.subr.bf16.mxu0 %v9716_v54  ;;  %v9782_v54 = vld [vmem:[#allocation7 + $0x374] ss:$24 sps:$4 sm:$0xff]  }
 0x4f9   :  { %7006 = vmatpush1.bf16.msra.mxu0 %v9714_v48  ;;  %v9780_v48 = vld [vmem:[#allocation7 + $0x370] ss:$24 sps:$4 sm:$0xff]  }
 0x4fa   :  { %7007 = vmatprep.subr.bf16.mxu0 %v9719_v50  ;;  %v9785_v50 = vld [vmem:[#allocation7 + $0x3a4] ss:$24 sps:$4 sm:$0xff]  }
 0x4fd   :  { %7008 = vmatpush1.bf16.msra.mxu0 %v9717_v21  ;;  %v9783_v21 = vld [vmem:[#allocation7 + $0x3a0] ss:$24 sps:$4 sm:$0xff]  }
 0x4fe   :  { %7009 = vmatprep.subr.bf16.mxu0 %v9722_v51  ;;  %v9788_v51 = vld [vmem:[#allocation7 + $0x3d4] ss:$24 sps:$4 sm:$0xff]  }
 0x501   :  { %7010 = vmatpush1.bf16.msra.mxu0 %v9720_v53  ;;  %v9786_v53 = vld [vmem:[#allocation7 + $0x3d0] ss:$24 sps:$4 sm:$0xff]  }
 0x502   :  { %7011 = vmatprep.subr.bf16.mxu0 %v9725_v40  ;;  %v9791_v40 = vld [vmem:[#allocation7 + $0x404] ss:$24 sps:$4 sm:$0xff]  }
 0x505   :  { %7012 = vmatpush1.bf16.msra.mxu0 %v9723_v58  ;;  %v9794_v58 = vld [vmem:[#allocation7 + $0x434] ss:$24 sps:$4 sm:$0xff]  }
 0x506   :  { %7153 = vmatprep.subr.bf16.mxu0 %v9728_v59  ;;  %v9797_v59 = vld [vmem:[#allocation7 + $0x464] ss:$24 sps:$4 sm:$0xff]  }
 0x508   :  { %7014 = vmatmul.mubr.bf16.vlgmr.msra.gmra.mrb[4].mxu0 %v10549_v49 }
 0x509   :  { %7154 = vmatpush1.bf16.msra.mxu0 %v9726_v62  ;;  %7185 = vmatprep.mubr.bf16.mxu0 %v10515_v9  ;;  %v7295_v9 = vrot.slane %v10625_v15, %v10522_v41  ;;  %v9795_v62 = vld [vmem:[#allocation7 + $0x460] ss:$24 sps:$4 sm:$0xff]  }
 0x50a   :  { %7155 = vmatprep.subr.bf16.mxu0 %v9731_v63  ;;  %v9800_v63 = vld [vmem:[#allocation7 + $0x494] ss:$24 sps:$4 sm:$0xff]  }
 0x50d   :  { %7156 = vmatpush1.bf16.msra.mxu0 %v9729_v0  ;;  %v9798_v0 = vld [vmem:[#allocation7 + $0x490] ss:$24 sps:$4 sm:$0xff]  }
 0x50e   :  { %7157 = vmatprep.subr.bf16.mxu0 %v9734_v1  ;;  %v9803_v1 = vld [vmem:[#allocation7 + $0x4c4] ss:$24 sps:$4 sm:$0xff]  }
 0x511   :  { %7158 = vmatpush1.bf16.msra.mxu0 %v9732_v2  ;;  %v9801_v2 = vld [vmem:[#allocation7 + $0x4c0] ss:$24 sps:$4 sm:$0xff]  }
 0x512   :  { %7159 = vmatprep.subr.bf16.mxu0 %v9737_v20  ;;  %v9806_v20 = vld [vmem:[#allocation7 + $0x4f4] ss:$24 sps:$4 sm:$0xff]  }
 0x515   :  { %7160 = vmatpush1.bf16.msra.mxu0 %v9735_v3  ;;  %v9804_v3 = vld [vmem:[#allocation7 + $0x4f0] ss:$24 sps:$4 sm:$0xff]  }
 0x516   :  { %7161 = vmatprep.subr.bf16.mxu0 %v9740_v4  ;;  %v9809_v4 = vld [vmem:[#allocation7 + $0x524] ss:$24 sps:$4 sm:$0xff]  }
 0x519   :  { %7162 = vmatpush1.bf16.msra.mxu0 %v9738_v5  ;;  %v9807_v5 = vld [vmem:[#allocation7 + $0x520] ss:$24 sps:$4 sm:$0xff]  }
 0x51a   :  { %7163 = vmatprep.subr.bf16.mxu0 %v9743_v6  ;;  %v9812_v6 = vld [vmem:[#allocation7 + $0x554] ss:$24 sps:$4 sm:$0xff]  }
 0x51c   :  { %v7144_v12 = vpop.f32.mrb[20].mxu1 }
 0x51d   :  { %v7316_v16 = vadd.f32 %v7295_v9, %v7144_v12  ;;  %v7146_v17 = vpop.f32.mrb[21].mxu1  ;;  %7164 = vmatpush1.bf16.msra.mxu0 %v9741_v7  ;;  %v9815_v7 = vld [vmem:[#allocation7 + $0x584] ss:$24 sps:$4 sm:$0xff]   ;;  %v9816_v12 = vld [vmem:[#allocation7 + $0x5b0] ss:$24 sps:$4 sm:$0xff]  }
 0x51e   :  { %v7317_v18 = vadd.f32 %v7299_v10, %v7146_v17  ;;  %v7148_v19 = vpop.f32.mrb[22].mxu1  ;;  %7165 = vmatprep.subr.bf16.mxu0 %v9746_v11  ;;  %v9818_v11 = vld [vmem:[#allocation7 + $0x5b4] ss:$24 sps:$4 sm:$0xff]   ;;  %v9819_v17 = vld [vmem:[#allocation7 + $0x5e0] ss:$24 sps:$4 sm:$0xff]  }
 0x51f   :  { %7328 = vst [vmem:[%s10689_s9 + $0x10] sm:$0xff] %v7316_v16  ;;  %v7322_v41 = vadd.f32 %v7295_v9, %v7148_v19  ;;  %v7150_v22 = vpop.f32.mrb[23].mxu1  ;;  %v9810_v9 = vld [vmem:[#allocation7 + $0x550] ss:$24 sps:$4 sm:$0xff]   ;;  %v9821_v16 = vld [vmem:[#allocation7 + $0x5e4] ss:$24 sps:$4 sm:$0xff]  }
 0x520   :  { %7329 = vst [vmem:[%s10689_s9 + $0x18] sm:$0xff] %v7317_v18  ;;  %v7323_v44 = vadd.f32 %v7299_v10, %v7150_v22  ;;  %v9813_v10 = vld [vmem:[#allocation7 + $0x580] ss:$24 sps:$4 sm:$0xff]   ;;  %v9822_v18 = vld [vmem:[#allocation7 + $0x610] ss:$24 sps:$4 sm:$0xff]  }
 0x521   :  { %7334 = vst [vmem:[%s10689_s9 + $0x40] sm:$0xff] %v7322_v41  ;;  %7166 = vmatpush1.bf16.msra.mxu0 %v9744_v14  ;;  %v9824_v14 = vld [vmem:[#allocation7 + $0x614] ss:$24 sps:$4 sm:$0xff]   ;;  %v9827_v19 = vld [vmem:[#allocation7 + $0x644] ss:$24 sps:$4 sm:$0xff]  }
 0x522   :  { %7335 = vst [vmem:[%s10689_s9 + $0x48] sm:$0xff] %v7323_v44  ;;  %7167 = vmatprep.subr.bf16.mxu0 %v9749_v37  ;;  %v9825_v37 = vld [vmem:[#allocation7 + $0x640] ss:$24 sps:$4 sm:$0xff]   ;;  %v9830_v41 = vld [vmem:[#allocation7 + $0x674] ss:$24 sps:$4 sm:$0xff]  }
 0x523   :  { %v9828_v22 = vld [vmem:[#allocation7 + $0x670] ss:$24 sps:$4 sm:$0xff]   ;;  %v9833_v44 = vld [vmem:[#allocation7 + $0x6a4] ss:$24 sps:$4 sm:$0xff]  }
 0x525   :  { %7168 = vmatpush1.bf16.msra.mxu0 %v9747_v23  ;;  %v9831_v23 = vld [vmem:[#allocation7 + $0x6a0] ss:$24 sps:$4 sm:$0xff]  }
 0x526   :  { %7169 = vmatprep.subr.bf16.mxu0 %v9752_v24  ;;  %v9836_v24 = vld [vmem:[#allocation7 + $0x6d4] ss:$24 sps:$4 sm:$0xff]  }
 0x529   :  { %7170 = vmatpush1.bf16.msra.mxu0 %v9750_v25  ;;  %v9834_v25 = vld [vmem:[#allocation7 + $0x6d0] ss:$24 sps:$4 sm:$0xff]  }
 0x52a   :  { %7171 = vmatprep.subr.bf16.mxu0 %v9755_v26  ;;  %v9839_v26 = vld [vmem:[#allocation7 + $0x704] ss:$24 sps:$4 sm:$0xff]  }
 0x52d   :  { %7172 = vmatpush1.bf16.msra.mxu0 %v9753_v27  ;;  %v9842_v27 = vld [vmem:[#allocation7 + $0x734] ss:$24 sps:$4 sm:$0xff]  }
 0x52e   :  { %7173 = vmatprep.subr.bf16.mxu0 %v9758_v47  ;;  %v9845_v47 = vld [vmem:[#allocation7 + $0x764] ss:$24 sps:$4 sm:$0xff]  }
 0x531   :  { %7174 = vmatpush1.bf16.msra.mxu0 %v9756_v29  ;;  %v9843_v29 = vld [vmem:[#allocation7 + $0x760] ss:$24 sps:$4 sm:$0xff]  }
 0x532   :  { %7175 = vmatprep.subr.bf16.mxu0 %v9761_v31  ;;  %v9848_v31 = vld [vmem:[#allocation7 + $0x794] ss:$24 sps:$4 sm:$0xff]  }
 0x535   :  { %7176 = vmatpush1.bf16.msra.mxu0 %v9759_v55  ;;  %v9846_v55 = vld [vmem:[#allocation7 + $0x790] ss:$24 sps:$4 sm:$0xff]  }
 0x536   :  { %7177 = vmatprep.subr.bf16.mxu0 %v9764_v32  ;;  %v9851_v32 = vld [vmem:[#allocation7 + $0x7c4] ss:$24 sps:$4 sm:$0xff]  }
 0x539   :  { %7178 = vmatpush1.bf16.msra.mxu0 %v9762_v33  ;;  %v9849_v33 = vld [vmem:[#allocation7 + $0x7c0] ss:$24 sps:$4 sm:$0xff]  }
 0x53a   :  { %7179 = vmatprep.subr.bf16.mxu0 %v9767_v35  ;;  %v9854_v35 = vld [vmem:[#allocation7 + $0x7f4] ss:$24 sps:$4 sm:$0xff]  }
 0x53d   :  { %7180 = vmatpush1.bf16.msra.mxu0 %v9765_v36  ;;  %v9852_v36 = vld [vmem:[#allocation7 + $0x7f0] ss:$24 sps:$4 sm:$0xff]  }
 0x53e   :  { %7181 = vmatprep.subr.bf16.mxu0 %v9770_v38  ;;  %v9857_v38 = vld [vmem:[#allocation7 + $0x824] ss:$24 sps:$4 sm:$0xff]  }
 0x541   :  { %7182 = vmatpush1.bf16.msra.mxu0 %v9768_v39  ;;  %v9855_v39 = vld [vmem:[#allocation7 + $0x820] ss:$24 sps:$4 sm:$0xff]  }
 0x542   :  { %7183 = vmatprep.subr.bf16.mxu0 %v9773_v42  ;;  %v9860_v42 = vld [vmem:[#allocation7 + $0x854] ss:$24 sps:$4 sm:$0xff]  }
 0x545   :  { %7184 = vmatpush1.bf16.msra.mxu0 %v9771_v43  ;;  %v9858_v43 = vld [vmem:[#allocation7 + $0x850] ss:$24 sps:$4 sm:$0xff]  }
 0x546   :  { %7196 = vmatprep.subr.bf16.mxu0 %v9776_v45  ;;  %v9863_v45 = vld [vmem:[#allocation7 + $0x884] ss:$24 sps:$4 sm:$0xff]  }
 0x548   :  { %7186 = vmatmul.mubr.bf16.vlgmr.msra.gmra.mrb[8].mxu0 %v10513_v8  ;;  %v9789_v8 = vld [vmem:[#allocation7 + $0x400] ss:$24 sps:$4 sm:$0xff]  }
 0x549   :  { %7197 = vmatpush1.bf16.msra.mxu0 %v9774_v46  ;;  %7228 = vmatprep.mubr.bf16.mxu0 %v10533_v61  ;;  %v9792_v61 = vld [vmem:[#allocation7 + $0x430] ss:$24 sps:$4 sm:$0xff]   ;;  %v9861_v46 = vld [vmem:[#allocation7 + $0x880] ss:$24 sps:$4 sm:$0xff]  }
 0x54a   :  { %7198 = vmatprep.subr.bf16.mxu0 %v9779_v52  ;;  %v9866_v52 = vld [vmem:[#allocation7 + $0x8b4] ss:$24 sps:$4 sm:$0xff]  }
 0x54d   :  { %7199 = vmatpush1.bf16.msra.mxu0 %v9777_v34  ;;  %v9864_v34 = vld [vmem:[#allocation7 + $0x8b0] ss:$24 sps:$4 sm:$0xff]  }
 0x54e   :  { %7200 = vmatprep.subr.bf16.mxu0 %v9782_v54  ;;  %v9869_v54 = vld [vmem:[#allocation7 + $0x8e4] ss:$24 sps:$4 sm:$0xff]  }
 0x551   :  { %7201 = vmatpush1.bf16.msra.mxu0 %v9780_v48  ;;  %v9867_v48 = vld [vmem:[#allocation7 + $0x8e0] ss:$24 sps:$4 sm:$0xff]  }
 0x552   :  { %7202 = vmatprep.subr.bf16.mxu0 %v9785_v50  ;;  %v7287_v50 = vrot.slane %v10625_v15, %v10502_v56  ;;  %v7303_v56 = vrot.slane %v10625_v15, %v10540_v28 }
 0x555   :  { %7203 = vmatpush1.bf16.msra.mxu0 %v9783_v21  ;;  %v7291_v21 = vrot.slane %v10625_v15, %v10507_v57  ;;  %v7307_v57 = vrot.slane %v10625_v15, %v10543_v30 }
 0x556   :  { %7204 = vmatprep.subr.bf16.mxu0 %v9788_v51 }
 0x559   :  { %7205 = vmatpush1.bf16.msra.mxu0 %v9786_v53 }
 0x55a   :  { %7206 = vmatprep.subr.bf16.mxu0 %v9791_v40 }
 0x55d   :  { %7207 = vmatpush1.bf16.msra.mxu0 %v9789_v8 }
 0x55e   :  { %7208 = vmatprep.subr.bf16.mxu0 %v9794_v58 }
 0x561   :  { %7209 = vmatpush1.bf16.msra.mxu0 %v9792_v61 }
 0x562   :  { %7210 = vmatprep.subr.bf16.mxu0 %v9797_v59 }
 0x565   :  { %7211 = vmatpush1.bf16.msra.mxu0 %v9795_v62 }
 0x566   :  { %7212 = vmatprep.subr.bf16.mxu0 %v9800_v63 }
 0x569   :  { %7213 = vmatpush1.bf16.msra.mxu0 %v9798_v0 }
 0x56a   :  { %7214 = vmatprep.subr.bf16.mxu0 %v9803_v1 }
 0x56d   :  { %7215 = vmatpush1.bf16.msra.mxu0 %v9801_v2 }
 0x56e   :  { %7216 = vmatprep.subr.bf16.mxu0 %v9806_v20 }
 0x571   :  { %7217 = vmatpush1.bf16.msra.mxu0 %v9804_v3 }
 0x572   :  { %7218 = vmatprep.subr.bf16.mxu0 %v9809_v4 }
 0x575   :  { %7219 = vmatpush1.bf16.msra.mxu0 %v9807_v5 }
 0x576   :  { %7220 = vmatprep.subr.bf16.mxu0 %v9812_v6 }
 0x579   :  { %7221 = vmatpush1.bf16.msra.mxu0 %v9810_v9 }
 0x57a   :  { %7222 = vmatprep.subr.bf16.mxu0 %v9815_v7 }
 0x57d   :  { %7223 = vmatpush1.bf16.msra.mxu0 %v9813_v10 }
 0x57e   :  { %7224 = vmatprep.subr.bf16.mxu0 %v9818_v11 }
 0x581   :  { %7225 = vmatpush1.bf16.msra.mxu0 %v9816_v12 }
 0x582   :  { %7226 = vmatprep.subr.bf16.mxu0 %v9821_v16 }
 0x585   :  { %7227 = vmatpush1.bf16.msra.mxu0 %v9819_v17 }
 0x586   :  { %7239 = vmatprep.subr.bf16.mxu0 %v9824_v14 }
 0x588   :  { %7229 = vmatmul.mubr.bf16.vlgmr.msra.gmra.mrb[8].mxu0 %v10531_v60  ;;  %v9837_v60 = vld [vmem:[#allocation7 + $0x700] ss:$24 sps:$4 sm:$0xff]  }
 0x589   :  { %7240 = vmatpush1.bf16.msra.mxu0 %v9822_v18  ;;  %7271 = vmatprep.mubr.bf16.mxu0 %v10551_v13  ;;  %v9840_v13 = vld [vmem:[#allocation7 + $0x730] ss:$24 sps:$4 sm:$0xff]  }
 0x58a   :  { %7241 = vmatprep.subr.bf16.mxu0 %v9827_v19 }
 0x58d   :  { %7242 = vmatpush1.bf16.msra.mxu0 %v9825_v37 }
 0x58e   :  { %7243 = vmatprep.subr.bf16.mxu0 %v9830_v41 }
 0x591   :  { %7244 = vmatpush1.bf16.msra.mxu0 %v9828_v22 }
 0x592   :  { %7245 = vmatprep.subr.bf16.mxu0 %v9833_v44 }
 0x595   :  { %7246 = vmatpush1.bf16.msra.mxu0 %v9831_v23 }
 0x596   :  { %7247 = vmatprep.subr.bf16.mxu0 %v9836_v24 }
 0x599   :  { %7248 = vmatpush1.bf16.msra.mxu0 %v9834_v25 }
 0x59a   :  { %7249 = vmatprep.subr.bf16.mxu0 %v9839_v26 }
 0x59d   :  { %7250 = vmatpush1.bf16.msra.mxu0 %v9837_v60 }
 0x59e   :  { %7251 = vmatprep.subr.bf16.mxu0 %v9842_v27 }
 0x5a1   :  { %7252 = vmatpush1.bf16.msra.mxu0 %v9840_v13 }
 0x5a2   :  { %7253 = vmatprep.subr.bf16.mxu0 %v9845_v47 }
 0x5a5   :  { %7254 = vmatpush1.bf16.msra.mxu0 %v9843_v29 }
 0x5a6   :  { %7255 = vmatprep.subr.bf16.mxu0 %v9848_v31 }
 0x5a9   :  { %7256 = vmatpush1.bf16.msra.mxu0 %v9846_v55 }
 0x5aa   :  { %7257 = vmatprep.subr.bf16.mxu0 %v9851_v32 }
 0x5ad   :  { %7258 = vmatpush1.bf16.msra.mxu0 %v9849_v33 }
 0x5ae   :  { %7259 = vmatprep.subr.bf16.mxu0 %v9854_v35 }
 0x5b1   :  { %7260 = vmatpush1.bf16.msra.mxu0 %v9852_v36 }
 0x5b2   :  { %7261 = vmatprep.subr.bf16.mxu0 %v9857_v38 }
 0x5b5   :  { %7262 = vmatpush1.bf16.msra.mxu0 %v9855_v39 }
 0x5b6   :  { %7263 = vmatprep.subr.bf16.mxu0 %v9860_v42 }
 0x5b9   :  { %7264 = vmatpush1.bf16.msra.mxu0 %v9858_v43 }
 0x5ba   :  { %7265 = vmatprep.subr.bf16.mxu0 %v9863_v45 }
 0x5bd   :  { %7266 = vmatpush1.bf16.msra.mxu0 %v9861_v46 }
 0x5be   :  { %7267 = vmatprep.subr.bf16.mxu0 %v9866_v52 }
 0x5c1   :  { %7268 = vmatpush1.bf16.msra.mxu0 %v9864_v34 }
 0x5c2   :  { %7269 = vmatprep.subr.bf16.mxu0 %v9869_v54 }
 0x5c5   :  { %7270 = vmatpush1.bf16.msra.mxu0 %v9867_v48 }
 0x5c8   :  { %7272 = vmatmul.mubr.bf16.vlgmr.msra.gmra.mrb[8].mxu0 %v10549_v49 }
 0x5db   :  { %v7015_v51 = vpop.f32.mrb[4].mxu0 }
 0x5dc   :  { %v7314_v53 = vadd.f32 %v7287_v50, %v7015_v51  ;;  %v7017_v40 = vpop.f32.mrb[5].mxu0 }
 0x5dd   :  { %v7315_v8 = vadd.f32 %v7291_v21, %v7017_v40  ;;  %v7019_v58 = vpop.f32.mrb[6].mxu0 }
 0x5de   :  { %7326 = vst [vmem:[%s10689_s9] sm:$0xff] %v7314_v53  ;;  %v7320_v61 = vadd.f32 %v7287_v50, %v7019_v58  ;;  %v7021_v59 = vpop.f32.mrb[7].mxu0 }
 0x5df   :  { %7327 = vst [vmem:[%s10689_s9 + $0x8] sm:$0xff] %v7315_v8  ;;  %v7321_v49 = vadd.f32 %v7291_v21, %v7021_v59 }
 0x5e0   :  { %7332 = vst [vmem:[%s10689_s9 + $0x30] sm:$0xff] %v7320_v61 }
 0x5e1   :  { %7333 = vst [vmem:[%s10689_s9 + $0x38] sm:$0xff] %v7321_v49 }
 0x69b   :  { %v7273_v62 = vpop.f32.mrb[8].mxu0 }
 0x69c   :  { %v7318_v63 = vadd.f32 %v7303_v56, %v7273_v62  ;;  %v7275_v0 = vpop.f32.mrb[9].mxu0 }
 0x69d   :  { %v7319_v1 = vadd.f32 %v7307_v57, %v7275_v0  ;;  %v7277_v2 = vpop.f32.mrb[10].mxu0 }
 0x69e   :  { %7330 = vst [vmem:[%s10689_s9 + $0x20] sm:$0xff] %v7318_v63  ;;  %v7324_v20 = vadd.f32 %v7303_v56, %v7277_v2  ;;  %v7279_v3 = vpop.f32.mrb[11].mxu0 }
 0x69f   :  { %7331 = vst [vmem:[%s10689_s9 + $0x28] sm:$0xff] %v7319_v1  ;;  %v7325_v4 = vadd.f32 %v7307_v57, %v7279_v3 }
 0x6a0   :  { %7336 = vst [vmem:[%s10689_s9 + $0x50] sm:$0xff] %v7324_v20 }
 0x6a1   :  { %7337 = vst [vmem:[%s10689_s9 + $0x58] sm:$0xff] %v7325_v4 }
 0x6a2   :  { %7342 = vsyncpa [#allocation3], 1 }
 0x6a3   :  { %7343 = vsyncpa [#allocation5], 1 }
 0x6a4   :  { %7344 = vsyncpa [#allocation8], 1 }
 0x6a5   :  { %7345 = vsyncpa [#allocation11], 1 }

</bundles_post_ra>
